<compile_context>
chip_gen: v7x
topology: tpu7x:2x2x1
jax: 0.10.0
libtpu: 0.0.40
codegen_flags: <defaults>
</compile_context>

<pallas_src>
import jax
import jax.numpy as jnp
from jax.experimental import pallas as pl
from jax.experimental.pallas import tpu as pltpu

LEAKY_SLOPE = 0.01   # F.leaky_relu default
BN_EPS = 1e-5        # nn.BatchNorm1d default
QPAD = 128           # lane-dense padded width of the fc4 output slab


# ----------------------------------------------------------------------------
# in-kernel helpers (operate on values already resident in vregs)
# ----------------------------------------------------------------------------
def _bn_rows(y, gamma, beta):
    # Training-mode BatchNorm1d (biased variance) over all rows; single-pass stats.
    inv_n = 1.0 / y.shape[0]
    mean = jnp.sum(y, axis=0, keepdims=True) * inv_n
    ex2 = jnp.sum(y * y, axis=0, keepdims=True) * inv_n
    var = ex2 - mean * mean
    return (y - mean) * jax.lax.rsqrt(var + BN_EPS) * gamma + beta


def _lrelu(y):
    return jnp.where(y > 0, y, LEAKY_SLOPE * y)


def _dot(a_f32, w_bf16):
    # Weights are pre-cast to bf16 at init; cast activations, accumulate in f32 on MXU.
    return jnp.dot(a_f32.astype(jnp.bfloat16), w_bf16,
                   preferred_element_type=jnp.float32)


def _full_spec(shape):
    n = len(shape)
    return pl.BlockSpec(shape, lambda i, _n=n: (0,) * _n)


# ----------------------------------------------------------------------------
# The single fused kernel
# ----------------------------------------------------------------------------
def make_fused_kernel(B, T, H):
    def kernel(x_ref, lens_ref,
               w1_ref, b1_ref, g1_ref, be1_ref,
               w2_ref, b2_ref, g2_ref, be2_ref,
               wih_ref, whh_ref, bl_ref,
               g3_ref, be3_ref, w3_ref, b3_ref,
               g4_ref, be4_ref, w4_ref, b4_ref,
               q_ref, hn_ref, cn_ref,
               rnn_ref):
        N = B * T

        # ---- head MLP: fc1 -> bn1 -> lrelu -> fc2 -> bn2 -> lrelu -> gate preacts ----
        x = x_ref[...].astype(jnp.float32)                       # [N, Din]
        y = _dot(x, w1_ref[...]) + b1_ref[...]
        y = _lrelu(_bn_rows(y, g1_ref[...], be1_ref[...]))
        y = _dot(y, w2_ref[...]) + b2_ref[...]
        y = _lrelu(_bn_rows(y, g2_ref[...], be2_ref[...]))
        xg = _dot(y, wih_ref[...]) + bl_ref[...]                 # [N, 4H] gate preacts
        xg3 = xg.reshape(B, T, 4 * H)                            # major-dim split, lanes kept

        # ---- LSTM recurrence: state in vregs, per-step outputs to VMEM scratch only ----
        lens = lens_ref[...]                                     # (B, 1) int32, read once
        whh = whh_ref[...]                                       # bf16, resident
        h = jnp.zeros((B, H), jnp.float32)
        c = jnp.zeros((B, H), jnp.float32)
        # TODO(synk): for large T use lax.fori_loop(..., unroll=k) with pl.ds time index.
        for t in range(T):                                       # static unroll (T small)
            gates = xg3[:, t, :] + jnp.dot(h.astype(jnp.bfloat16), whh,
                                           preferred_element_type=jnp.float32)
            # 4H = 128 lanes = one vreg: activate the whole vreg on the EUP, then slice.
            sg = jax.nn.sigmoid(gates)
            tg = jnp.tanh(gates)
            i_g = sg[:, 0 * H:1 * H]                             # PyTorch order: i, f, g, o
            f_g = sg[:, 1 * H:2 * H]
            g_g = tg[:, 2 * H:3 * H]
            o_g = sg[:, 3 * H:4 * H]
            c_new = f_g * c + i_g * g_g
            h_new = o_g * jnp.tanh(c_new)
            valid = lens > t                                     # (B, 1) scalar compare
            h = jnp.where(valid, h_new, h)                       # freeze past seq end
            c = jnp.where(valid, c_new, c)
            rnn_ref[:, t, :] = jnp.where(valid, h_new, 0.0)      # VMEM scratch, not HBM
        hn_ref[...] = h                                          # state at last valid step
        cn_ref[...] = c

        # ---- tail MLP: bn3 -> fc3 -> bn4 -> lrelu -> fc4 (lane-dense padded output) ----
        r = rnn_ref[...].reshape(N, H)
        z = _bn_rows(r, g3_ref[...], be3_ref[...])
        z = _dot(z, w3_ref[...]) + b3_ref[...]
        z = _lrelu(_bn_rows(z, g4_ref[...], be4_ref[...]))
        q_ref[...] = _dot(z, w4_ref[...]) + b4_ref[...]          # [N, QPAD] lane-dense store

    return kernel


def bn_ddrqn_fused(params, x2d, lens_b1, B, T, H):
    N = B * T
    args = (x2d, lens_b1,
            params['w1'], params['b1'], params['g1'], params['be1'],
            params['w2'], params['b2'], params['g2'], params['be2'],
            params['w_ih'], params['w_hh'], params['b_lstm'],
            params['g3'], params['be3'], params['w3'], params['b3'],
            params['g4'], params['be4'], params['w4'], params['b4'])
    return pl.pallas_call(
        make_fused_kernel(B, T, H),
        out_shape=(jax.ShapeDtypeStruct((N, QPAD), jnp.float32),
                   jax.ShapeDtypeStruct((B, H), jnp.float32),
                   jax.ShapeDtypeStruct((B, H), jnp.float32)),
        grid=(1,),
        in_specs=[_full_spec(a.shape) for a in args],
        out_specs=(_full_spec((N, QPAD)),
                   _full_spec((B, H)),
                   _full_spec((B, H))),
        scratch_shapes=[pltpu.VMEM((B, T, H), jnp.float32)],
        compiler_params=pltpu.CompilerParams(dimension_semantics=("arbitrary",)),
    )(*args)


# ----------------------------------------------------------------------------
# Parameters (deterministic, shapes from BN_DDRQN.__init__); weights bf16.
# ----------------------------------------------------------------------------
def init_params(key, input_dim, output_dim, rnn_h):
    ks = jax.random.split(key, 8)

    def xavier(k, fan_in, fan_out, gain):
        bound = gain * (6.0 / (fan_in + fan_out)) ** 0.5
        return jax.random.uniform(k, (fan_in, fan_out), jnp.float32, -bound, bound)

    g_lrelu = (2.0 / (1.0 + LEAKY_SLOPE ** 2)) ** 0.5
    p = {}
    # Linear weights stored pre-transposed ([in, out]) and pre-cast to bf16 (MXU-native).
    p['w1'] = xavier(ks[0], input_dim, 64, g_lrelu).astype(jnp.bfloat16)
    p['b1'] = jnp.zeros((1, 64), jnp.float32)
    p['w2'] = xavier(ks[1], 64, rnn_h, g_lrelu).astype(jnp.bfloat16)
    p['b2'] = jnp.zeros((1, rnn_h), jnp.float32)
    p['w3'] = xavier(ks[2], rnn_h, 64, g_lrelu).astype(jnp.bfloat16)
    p['b3'] = jnp.zeros((1, 64), jnp.float32)
    # fc4 padded to QPAD output lanes (lane-dense store); real columns = output_dim.
    w4 = xavier(ks[3], 64, output_dim, 1.0)
    p['w4'] = jnp.zeros((64, QPAD), jnp.float32).at[:, :output_dim].set(w4).astype(jnp.bfloat16)
    p['b4'] = jnp.zeros((1, QPAD), jnp.float32)
    # LSTM weights pre-transposed ([in, 4H]) so the kernel computes x @ W; bf16.
    kk = 1.0 / (rnn_h ** 0.5)
    p['w_ih'] = jax.random.uniform(ks[4], (rnn_h, 4 * rnn_h), jnp.float32, -kk, kk).astype(jnp.bfloat16)
    p['w_hh'] = jax.random.uniform(ks[5], (rnn_h, 4 * rnn_h), jnp.float32, -kk, kk).astype(jnp.bfloat16)
    b_ih = jax.random.uniform(ks[6], (4 * rnn_h,), jnp.float32, -kk, kk)
    b_hh = jax.random.uniform(ks[7], (4 * rnn_h,), jnp.float32, -kk, kk)
    p['b_lstm'] = (b_ih + b_hh).reshape(1, 4 * rnn_h)
    # BatchNorm1d defaults: weight=1, bias=0.
    for i, dim in [(1, 64), (2, rnn_h), (3, rnn_h), (4, 64)]:
        p[f'g{i}'] = jnp.ones((1, dim), jnp.float32)
        p[f'be{i}'] = jnp.zeros((1, dim), jnp.float32)
    return p


# ----------------------------------------------------------------------------
# Forward (thin jitted glue: free reshapes, output slice, single in-jit gather)
# ----------------------------------------------------------------------------
def bn_ddrqn_forward(params, x_padded, lengths, gather_idx, output_dim):
    B, T, Din = x_padded.shape
    N = B * T
    H = params['w_hh'].shape[0]
    x2d = x_padded.reshape(N, Din)                          # free reshape
    lens_b1 = lengths.astype(jnp.int32).reshape(B, 1)

    q_pad, hn, cn = bn_ddrqn_fused(params, x2d, lens_b1, B, T, H)

    q2d = q_pad[:, :output_dim]                             # drop lane padding
    q_flat = jnp.take(q2d, gather_idx, axis=0)              # x[mask] gather, inside jit
    mask_bt = jnp.arange(T)[None, :] < lengths[:, None]
    return q_flat, mask_bt, (hn[None, ...], cn[None, ...])


if __name__ == "__main__":
    input_dim, output_dim, rnn_h = 10, 5, 32
    lengths_py = [8, 5, 3]
    B, T = len(lengths_py), max(lengths_py)

    key = jax.random.PRNGKey(0)
    pkey, dkey = jax.random.split(key)
    params = init_params(pkey, input_dim, output_dim, rnn_h)

    # Build variable-length sequences and zero-pad (pad_sequence equivalent).
    seq_keys = jax.random.split(dkey, B)
    seqs = [jax.random.normal(seq_keys[b], (lengths_py[b], input_dim), jnp.float32)
            for b in range(B)]
    x_padded = jnp.zeros((B, T, input_dim), jnp.float32)
    for b in range(B):
        x_padded = x_padded.at[b, :lengths_py[b]].set(seqs[b])
    lengths = jnp.array(lengths_py, jnp.int32)
    # Static row indices of valid (b, t) positions in row-major [B, T] order == x[mask].
    gather_idx = jnp.array([b * T + t for b in range(B) for t in range(lengths_py[b])],
                           jnp.int32)

    fwd = jax.jit(bn_ddrqn_forward, static_argnames=('output_dim',))
    q_flat, mask_bt, (h_n, c_n) = fwd(params, x_padded, lengths, gather_idx,
                                      output_dim=output_dim)

    jax.block_until_ready((q_flat, h_n, c_n))
    assert q_flat.shape == (sum(lengths_py), output_dim)
    assert h_n.shape == (1, B, rnn_h) and c_n.shape == (1, B, rnn_h)
    assert bool(jnp.all(jnp.isfinite(q_flat)))
    print("KERNEL_OK")
</pallas_src>

<mosaic_0001>
module attributes {stable_mosaic.version = 11 : i64} {
  func.func @kernel(%arg0: i32, %arg1: memref<24x10xf32, #tpu.memory_space<vmem>>, %arg2: memref<3x1xi32, #tpu.memory_space<vmem>>, %arg3: memref<10x64xbf16, #tpu.memory_space<vmem>>, %arg4: memref<1x64xf32, #tpu.memory_space<vmem>>, %arg5: memref<1x64xf32, #tpu.memory_space<vmem>>, %arg6: memref<1x64xf32, #tpu.memory_space<vmem>>, %arg7: memref<64x32xbf16, #tpu.memory_space<vmem>>, %arg8: memref<1x32xf32, #tpu.memory_space<vmem>>, %arg9: memref<1x32xf32, #tpu.memory_space<vmem>>, %arg10: memref<1x32xf32, #tpu.memory_space<vmem>>, %arg11: memref<32x128xbf16, #tpu.memory_space<vmem>>, %arg12: memref<32x128xbf16, #tpu.memory_space<vmem>>, %arg13: memref<1x128xf32, #tpu.memory_space<vmem>>, %arg14: memref<1x32xf32, #tpu.memory_space<vmem>>, %arg15: memref<1x32xf32, #tpu.memory_space<vmem>>, %arg16: memref<32x64xbf16, #tpu.memory_space<vmem>>, %arg17: memref<1x64xf32, #tpu.memory_space<vmem>>, %arg18: memref<1x64xf32, #tpu.memory_space<vmem>>, %arg19: memref<1x64xf32, #tpu.memory_space<vmem>>, %arg20: memref<64x128xbf16, #tpu.memory_space<vmem>>, %arg21: memref<1x128xf32, #tpu.memory_space<vmem>>, %arg22: memref<24x128xf32, #tpu.memory_space<vmem>>, %arg23: memref<3x32xf32, #tpu.memory_space<vmem>>, %arg24: memref<3x32xf32, #tpu.memory_space<vmem>>, %arg25: memref<3x8x32xf32, #tpu.memory_space<vmem>>) attributes {dimension_semantics = [#tpu.dimension_semantics<arbitrary>], iteration_bounds = array<i64: 1>, scalar_prefetch = 0 : i64, scratch_operands = 1 : i64, tpu.core_type = #tpu.core_type<tc>, window_params = [{pipeline_mode = #tpu.pipeline_mode<synchronous>, transform_indices = @transform_0, window_bounds = array<i64: 24, 10>}, {pipeline_mode = #tpu.pipeline_mode<synchronous>, transform_indices = @transform_1, window_bounds = array<i64: 3, 1>}, {pipeline_mode = #tpu.pipeline_mode<synchronous>, transform_indices = @transform_2, window_bounds = array<i64: 10, 64>}, {pipeline_mode = #tpu.pipeline_mode<synchronous>, transform_indices = @transform_3, window_bounds = array<i64: 1, 64>}, {pipeline_mode = #tpu.pipeline_mode<synchronous>, transform_indices = @transform_4, window_bounds = array<i64: 1, 64>}, {pipeline_mode = #tpu.pipeline_mode<synchronous>, transform_indices = @transform_5, window_bounds = array<i64: 1, 64>}, {pipeline_mode = #tpu.pipeline_mode<synchronous>, transform_indices = @transform_6, window_bounds = array<i64: 64, 32>}, {pipeline_mode = #tpu.pipeline_mode<synchronous>, transform_indices = @transform_7, window_bounds = array<i64: 1, 32>}, {pipeline_mode = #tpu.pipeline_mode<synchronous>, transform_indices = @transform_8, window_bounds = array<i64: 1, 32>}, {pipeline_mode = #tpu.pipeline_mode<synchronous>, transform_indices = @transform_9, window_bounds = array<i64: 1, 32>}, {pipeline_mode = #tpu.pipeline_mode<synchronous>, transform_indices = @transform_10, window_bounds = array<i64: 32, 128>}, {pipeline_mode = #tpu.pipeline_mode<synchronous>, transform_indices = @transform_11, window_bounds = array<i64: 32, 128>}, {pipeline_mode = #tpu.pipeline_mode<synchronous>, transform_indices = @transform_12, window_bounds = array<i64: 1, 128>}, {pipeline_mode = #tpu.pipeline_mode<synchronous>, transform_indices = @transform_13, window_bounds = array<i64: 1, 32>}, {pipeline_mode = #tpu.pipeline_mode<synchronous>, transform_indices = @transform_14, window_bounds = array<i64: 1, 32>}, {pipeline_mode = #tpu.pipeline_mode<synchronous>, transform_indices = @transform_15, window_bounds = array<i64: 32, 64>}, {pipeline_mode = #tpu.pipeline_mode<synchronous>, transform_indices = @transform_16, window_bounds = array<i64: 1, 64>}, {pipeline_mode = #tpu.pipeline_mode<synchronous>, transform_indices = @transform_17, window_bounds = array<i64: 1, 64>}, {pipeline_mode = #tpu.pipeline_mode<synchronous>, transform_indices = @transform_18, window_bounds = array<i64: 1, 64>}, {pipeline_mode = #tpu.pipeline_mode<synchronous>, transform_indices = @transform_19, window_bounds = array<i64: 64, 128>}, {pipeline_mode = #tpu.pipeline_mode<synchronous>, transform_indices = @transform_20, window_bounds = array<i64: 1, 128>}, {pipeline_mode = #tpu.pipeline_mode<synchronous>, transform_indices = @transform_21, window_bounds = array<i64: 24, 128>}, {pipeline_mode = #tpu.pipeline_mode<synchronous>, transform_indices = @transform_22, window_bounds = array<i64: 3, 32>}, {pipeline_mode = #tpu.pipeline_mode<synchronous>, transform_indices = @transform_23, window_bounds = array<i64: 3, 32>}]} {
    %c0 = arith.constant 0 : index
    %c0_0 = arith.constant 0 : index
    %0 = vector.load %arg1[%c0, %c0_0] : memref<24x10xf32, #tpu.memory_space<vmem>>, vector<24x10xf32>
    %c0_1 = arith.constant 0 : index
    %c0_2 = arith.constant 0 : index
    %1 = vector.load %arg3[%c0_1, %c0_2] : memref<10x64xbf16, #tpu.memory_space<vmem>>, vector<10x64xbf16>
    %2 = arith.truncf %0 : vector<24x10xf32> to vector<24x10xbf16>
    %cst = arith.constant dense<0.000000e+00> : vector<24x64xf32>
    %3 = tpu.matmul %2, %1, %cst {dimension_numbers = #tpu.dot_dimension_numbers<[1], [0], [0], [1], [0, 0, 1, 1], [], []>} : vector<24x10xbf16>, vector<10x64xbf16>, vector<24x64xf32> -> vector<24x64xf32>
    %c0_3 = arith.constant 0 : index
    %c0_4 = arith.constant 0 : index
    %4 = vector.load %arg4[%c0_3, %c0_4] : memref<1x64xf32, #tpu.memory_space<vmem>>, vector<1x64xf32>
    %5 = vector.broadcast %4 : vector<1x64xf32> to vector<24x64xf32>
    %6 = arith.addf %3, %5 : vector<24x64xf32>
    %c0_5 = arith.constant 0 : index
    %c0_6 = arith.constant 0 : index
    %7 = vector.load %arg5[%c0_5, %c0_6] : memref<1x64xf32, #tpu.memory_space<vmem>>, vector<1x64xf32>
    %c0_7 = arith.constant 0 : index
    %c0_8 = arith.constant 0 : index
    %8 = vector.load %arg6[%c0_7, %c0_8] : memref<1x64xf32, #tpu.memory_space<vmem>>, vector<1x64xf32>
    %cst_9 = arith.constant dense<0.000000e+00> : vector<64xf32>
    %9 = vector.multi_reduction <add>, %6, %cst_9 [0] : vector<24x64xf32> to vector<64xf32>
    %10 = vector.shape_cast %9 : vector<64xf32> to vector<1x64xf32>
    %cst_10 = arith.constant 0.0416666679 : f32
    %11 = vector.broadcast %cst_10 : f32 to vector<1x64xf32>
    %12 = arith.mulf %10, %11 : vector<1x64xf32>
    %13 = arith.mulf %6, %6 : vector<24x64xf32>
    %cst_11 = arith.constant dense<0.000000e+00> : vector<64xf32>
    %14 = vector.multi_reduction <add>, %13, %cst_11 [0] : vector<24x64xf32> to vector<64xf32>
    %15 = vector.shape_cast %14 : vector<64xf32> to vector<1x64xf32>
    %cst_12 = arith.constant 0.0416666679 : f32
    %16 = vector.broadcast %cst_12 : f32 to vector<1x64xf32>
    %17 = arith.mulf %15, %16 : vector<1x64xf32>
    %18 = arith.mulf %12, %12 : vector<1x64xf32>
    %19 = arith.subf %17, %18 : vector<1x64xf32>
    %20 = vector.broadcast %12 : vector<1x64xf32> to vector<24x64xf32>
    %21 = arith.subf %6, %20 : vector<24x64xf32>
    %cst_13 = arith.constant 9.99999974E-6 : f32
    %22 = vector.broadcast %cst_13 : f32 to vector<1x64xf32>
    %23 = arith.addf %19, %22 : vector<1x64xf32>
    %24 = math.rsqrt %23 : vector<1x64xf32>
    %25 = vector.broadcast %24 : vector<1x64xf32> to vector<24x64xf32>
    %26 = arith.mulf %21, %25 : vector<24x64xf32>
    %27 = vector.broadcast %7 : vector<1x64xf32> to vector<24x64xf32>
    %28 = arith.mulf %26, %27 : vector<24x64xf32>
    %29 = vector.broadcast %8 : vector<1x64xf32> to vector<24x64xf32>
    %30 = arith.addf %28, %29 : vector<24x64xf32>
    %cst_14 = arith.constant 0.000000e+00 : f32
    %31 = vector.broadcast %cst_14 : f32 to vector<24x64xf32>
    %32 = arith.cmpf ogt, %30, %31 : vector<24x64xf32>
    %cst_15 = arith.constant 0.00999999977 : f32
    %33 = vector.broadcast %cst_15 : f32 to vector<24x64xf32>
    %34 = arith.mulf %33, %30 : vector<24x64xf32>
    %35 = arith.select %32, %30, %34 : vector<24x64xi1>, vector<24x64xf32>
    %c0_16 = arith.constant 0 : index
    %c0_17 = arith.constant 0 : index
    %36 = vector.load %arg7[%c0_16, %c0_17] : memref<64x32xbf16, #tpu.memory_space<vmem>>, vector<64x32xbf16>
    %37 = arith.truncf %35 : vector<24x64xf32> to vector<24x64xbf16>
    %cst_18 = arith.constant dense<0.000000e+00> : vector<24x32xf32>
    %38 = tpu.matmul %37, %36, %cst_18 {dimension_numbers = #tpu.dot_dimension_numbers<[1], [0], [0], [1], [0, 0, 1, 1], [], []>} : vector<24x64xbf16>, vector<64x32xbf16>, vector<24x32xf32> -> vector<24x32xf32>
    %c0_19 = arith.constant 0 : index
    %c0_20 = arith.constant 0 : index
    %39 = vector.load %arg8[%c0_19, %c0_20] : memref<1x32xf32, #tpu.memory_space<vmem>>, vector<1x32xf32>
    %40 = vector.broadcast %39 : vector<1x32xf32> to vector<24x32xf32>
    %41 = arith.addf %38, %40 : vector<24x32xf32>
    %c0_21 = arith.constant 0 : index
    %c0_22 = arith.constant 0 : index
    %42 = vector.load %arg9[%c0_21, %c0_22] : memref<1x32xf32, #tpu.memory_space<vmem>>, vector<1x32xf32>
    %c0_23 = arith.constant 0 : index
    %c0_24 = arith.constant 0 : index
    %43 = vector.load %arg10[%c0_23, %c0_24] : memref<1x32xf32, #tpu.memory_space<vmem>>, vector<1x32xf32>
    %cst_25 = arith.constant dense<0.000000e+00> : vector<32xf32>
    %44 = vector.multi_reduction <add>, %41, %cst_25 [0] : vector<24x32xf32> to vector<32xf32>
    %45 = vector.shape_cast %44 : vector<32xf32> to vector<1x32xf32>
    %cst_26 = arith.constant 0.0416666679 : f32
    %46 = vector.broadcast %cst_26 : f32 to vector<1x32xf32>
    %47 = arith.mulf %45, %46 : vector<1x32xf32>
    %48 = arith.mulf %41, %41 : vector<24x32xf32>
    %cst_27 = arith.constant dense<0.000000e+00> : vector<32xf32>
    %49 = vector.multi_reduction <add>, %48, %cst_27 [0] : vector<24x32xf32> to vector<32xf32>
    %50 = vector.shape_cast %49 : vector<32xf32> to vector<1x32xf32>
    %cst_28 = arith.constant 0.0416666679 : f32
    %51 = vector.broadcast %cst_28 : f32 to vector<1x32xf32>
    %52 = arith.mulf %50, %51 : vector<1x32xf32>
    %53 = arith.mulf %47, %47 : vector<1x32xf32>
    %54 = arith.subf %52, %53 : vector<1x32xf32>
    %55 = vector.broadcast %47 : vector<1x32xf32> to vector<24x32xf32>
    %56 = arith.subf %41, %55 : vector<24x32xf32>
    %cst_29 = arith.constant 9.99999974E-6 : f32
    %57 = vector.broadcast %cst_29 : f32 to vector<1x32xf32>
    %58 = arith.addf %54, %57 : vector<1x32xf32>
    %59 = math.rsqrt %58 : vector<1x32xf32>
    %60 = vector.broadcast %59 : vector<1x32xf32> to vector<24x32xf32>
    %61 = arith.mulf %56, %60 : vector<24x32xf32>
    %62 = vector.broadcast %42 : vector<1x32xf32> to vector<24x32xf32>
    %63 = arith.mulf %61, %62 : vector<24x32xf32>
    %64 = vector.broadcast %43 : vector<1x32xf32> to vector<24x32xf32>
    %65 = arith.addf %63, %64 : vector<24x32xf32>
    %cst_30 = arith.constant 0.000000e+00 : f32
    %66 = vector.broadcast %cst_30 : f32 to vector<24x32xf32>
    %67 = arith.cmpf ogt, %65, %66 : vector<24x32xf32>
    %cst_31 = arith.constant 0.00999999977 : f32
    %68 = vector.broadcast %cst_31 : f32 to vector<24x32xf32>
    %69 = arith.mulf %68, %65 : vector<24x32xf32>
    %70 = arith.select %67, %65, %69 : vector<24x32xi1>, vector<24x32xf32>
    %c0_32 = arith.constant 0 : index
    %c0_33 = arith.constant 0 : index
    %71 = vector.load %arg11[%c0_32, %c0_33] : memref<32x128xbf16, #tpu.memory_space<vmem>>, vector<32x128xbf16>
    %72 = arith.truncf %70 : vector<24x32xf32> to vector<24x32xbf16>
    %cst_34 = arith.constant dense<0.000000e+00> : vector<24x128xf32>
    %73 = tpu.matmul %72, %71, %cst_34 {dimension_numbers = #tpu.dot_dimension_numbers<[1], [0], [0], [1], [0, 0, 1, 1], [], []>} : vector<24x32xbf16>, vector<32x128xbf16>, vector<24x128xf32> -> vector<24x128xf32>
    %c0_35 = arith.constant 0 : index
    %c0_36 = arith.constant 0 : index
    %74 = vector.load %arg13[%c0_35, %c0_36] : memref<1x128xf32, #tpu.memory_space<vmem>>, vector<1x128xf32>
    %75 = vector.broadcast %74 : vector<1x128xf32> to vector<24x128xf32>
    %76 = arith.addf %73, %75 : vector<24x128xf32>
    %77 = vector.shape_cast %76 : vector<24x128xf32> to vector<3x8x128xf32>
    %c0_37 = arith.constant 0 : index
    %c0_38 = arith.constant 0 : index
    %78 = vector.load %arg2[%c0_37, %c0_38] : memref<3x1xi32, #tpu.memory_space<vmem>>, vector<3x1xi32>
    %c0_39 = arith.constant 0 : index
    %c0_40 = arith.constant 0 : index
    %79 = vector.load %arg12[%c0_39, %c0_40] : memref<32x128xbf16, #tpu.memory_space<vmem>>, vector<32x128xbf16>
    %cst_41 = arith.constant 0.000000e+00 : f32
    %80 = vector.broadcast %cst_41 : f32 to vector<3x32xf32>
    %cst_42 = arith.constant 0.000000e+00 : f32
    %81 = vector.broadcast %cst_42 : f32 to vector<3x32xf32>
    %82 = vector.extract_strided_slice %77 {offsets = [0, 0, 0], sizes = [3, 1, 128], strides = [1, 1, 1]} : vector<3x8x128xf32> to vector<3x1x128xf32>
    %83 = vector.shape_cast %82 : vector<3x1x128xf32> to vector<3x128xf32>
    %84 = arith.truncf %80 : vector<3x32xf32> to vector<3x32xbf16>
    %cst_43 = arith.constant dense<0.000000e+00> : vector<3x128xf32>
    %85 = tpu.matmul %84, %79, %cst_43 {dimension_numbers = #tpu.dot_dimension_numbers<[1], [0], [0], [1], [0, 0, 1, 1], [], []>} : vector<3x32xbf16>, vector<32x128xbf16>, vector<3x128xf32> -> vector<3x128xf32>
    %86 = arith.addf %83, %85 : vector<3x128xf32>
    %87 = arith.negf %86 : vector<3x128xf32>
    %88 = math.exp %87 : vector<3x128xf32>
    %cst_44 = arith.constant 1.000000e+00 : f32
    %89 = vector.broadcast %cst_44 : f32 to vector<3x128xf32>
    %90 = arith.addf %89, %88 : vector<3x128xf32>
    %91 = arith.divf %89, %90 : vector<3x128xf32>
    %92 = math.tanh %86 : vector<3x128xf32>
    %93 = vector.extract_strided_slice %91 {offsets = [0, 0], sizes = [3, 32], strides = [1, 1]} : vector<3x128xf32> to vector<3x32xf32>
    %94 = vector.extract_strided_slice %91 {offsets = [0, 32], sizes = [3, 32], strides = [1, 1]} : vector<3x128xf32> to vector<3x32xf32>
    %95 = vector.extract_strided_slice %92 {offsets = [0, 64], sizes = [3, 32], strides = [1, 1]} : vector<3x128xf32> to vector<3x32xf32>
    %96 = vector.extract_strided_slice %91 {offsets = [0, 96], sizes = [3, 32], strides = [1, 1]} : vector<3x128xf32> to vector<3x32xf32>
    %97 = arith.mulf %94, %81 : vector<3x32xf32>
    %98 = arith.mulf %93, %95 : vector<3x32xf32>
    %99 = arith.addf %97, %98 : vector<3x32xf32>
    %100 = math.tanh %99 : vector<3x32xf32>
    %101 = arith.mulf %96, %100 : vector<3x32xf32>
    %c0_i32 = arith.constant 0 : i32
    %102 = vector.broadcast %c0_i32 : i32 to vector<3x1xi32>
    %103 = arith.cmpi sgt, %78, %102 : vector<3x1xi32>
    %104 = vector.shape_cast %103 : vector<3x1xi1> to vector<3x1xi1>
    %105 = vector.broadcast %104 : vector<3x1xi1> to vector<3x32xi1>
    %106 = arith.select %105, %101, %80 : vector<3x32xi1>, vector<3x32xf32>
    %107 = vector.shape_cast %103 : vector<3x1xi1> to vector<3x1xi1>
    %108 = vector.broadcast %107 : vector<3x1xi1> to vector<3x32xi1>
    %109 = arith.select %108, %99, %81 : vector<3x32xi1>, vector<3x32xf32>
    %cst_45 = arith.constant 0.000000e+00 : f32
    %110 = vector.shape_cast %103 : vector<3x1xi1> to vector<3x1xi1>
    %111 = vector.broadcast %110 : vector<3x1xi1> to vector<3x32xi1>
    %112 = vector.broadcast %cst_45 : f32 to vector<3x32xf32>
    %113 = arith.select %111, %101, %112 : vector<3x32xi1>, vector<3x32xf32>
    %c0_46 = arith.constant 0 : index
    %c0_47 = arith.constant 0 : index
    %c0_48 = arith.constant 0 : index
    %114 = vector.load %arg25[%c0_46, %c0_47, %c0_48] : memref<3x8x32xf32, #tpu.memory_space<vmem>>, vector<3x1x32xf32>
    %115 = vector.shape_cast %114 : vector<3x1x32xf32> to vector<3x32xf32>
    %116 = vector.shape_cast %113 : vector<3x32xf32> to vector<3x1x32xf32>
    tpu.vector_store %arg25[%c0_46, %c0_47, %c0_48], %116 {strides = array<i32>} : memref<3x8x32xf32, #tpu.memory_space<vmem>>, vector<3x1x32xf32>,
    %117 = vector.extract_strided_slice %77 {offsets = [0, 1, 0], sizes = [3, 1, 128], strides = [1, 1, 1]} : vector<3x8x128xf32> to vector<3x1x128xf32>
    %118 = vector.shape_cast %117 : vector<3x1x128xf32> to vector<3x128xf32>
    %119 = arith.truncf %106 : vector<3x32xf32> to vector<3x32xbf16>
    %cst_49 = arith.constant dense<0.000000e+00> : vector<3x128xf32>
    %120 = tpu.matmul %119, %79, %cst_49 {dimension_numbers = #tpu.dot_dimension_numbers<[1], [0], [0], [1], [0, 0, 1, 1], [], []>} : vector<3x32xbf16>, vector<32x128xbf16>, vector<3x128xf32> -> vector<3x128xf32>
    %121 = arith.addf %118, %120 : vector<3x128xf32>
    %122 = arith.negf %121 : vector<3x128xf32>
    %123 = math.exp %122 : vector<3x128xf32>
    %cst_50 = arith.constant 1.000000e+00 : f32
    %124 = vector.broadcast %cst_50 : f32 to vector<3x128xf32>
    %125 = arith.addf %124, %123 : vector<3x128xf32>
    %126 = arith.divf %124, %125 : vector<3x128xf32>
    %127 = math.tanh %121 : vector<3x128xf32>
    %128 = vector.extract_strided_slice %126 {offsets = [0, 0], sizes = [3, 32], strides = [1, 1]} : vector<3x128xf32> to vector<3x32xf32>
    %129 = vector.extract_strided_slice %126 {offsets = [0, 32], sizes = [3, 32], strides = [1, 1]} : vector<3x128xf32> to vector<3x32xf32>
    %130 = vector.extract_strided_slice %127 {offsets = [0, 64], sizes = [3, 32], strides = [1, 1]} : vector<3x128xf32> to vector<3x32xf32>
    %131 = vector.extract_strided_slice %126 {offsets = [0, 96], sizes = [3, 32], strides = [1, 1]} : vector<3x128xf32> to vector<3x32xf32>
    %132 = arith.mulf %129, %109 : vector<3x32xf32>
    %133 = arith.mulf %128, %130 : vector<3x32xf32>
    %134 = arith.addf %132, %133 : vector<3x32xf32>
    %135 = math.tanh %134 : vector<3x32xf32>
    %136 = arith.mulf %131, %135 : vector<3x32xf32>
    %c1_i32 = arith.constant 1 : i32
    %137 = vector.broadcast %c1_i32 : i32 to vector<3x1xi32>
    %138 = arith.cmpi sgt, %78, %137 : vector<3x1xi32>
    %139 = vector.shape_cast %138 : vector<3x1xi1> to vector<3x1xi1>
    %140 = vector.broadcast %139 : vector<3x1xi1> to vector<3x32xi1>
    %141 = arith.select %140, %136, %106 : vector<3x32xi1>, vector<3x32xf32>
    %142 = vector.shape_cast %138 : vector<3x1xi1> to vector<3x1xi1>
    %143 = vector.broadcast %142 : vector<3x1xi1> to vector<3x32xi1>
    %144 = arith.select %143, %134, %109 : vector<3x32xi1>, vector<3x32xf32>
    %cst_51 = arith.constant 0.000000e+00 : f32
    %145 = vector.shape_cast %138 : vector<3x1xi1> to vector<3x1xi1>
    %146 = vector.broadcast %145 : vector<3x1xi1> to vector<3x32xi1>
    %147 = vector.broadcast %cst_51 : f32 to vector<3x32xf32>
    %148 = arith.select %146, %136, %147 : vector<3x32xi1>, vector<3x32xf32>
    %c0_52 = arith.constant 0 : index
    %c1 = arith.constant 1 : index
    %c0_53 = arith.constant 0 : index
    %149 = vector.load %arg25[%c0_52, %c1, %c0_53] : memref<3x8x32xf32, #tpu.memory_space<vmem>>, vector<3x1x32xf32>
    %150 = vector.shape_cast %149 : vector<3x1x32xf32> to vector<3x32xf32>
    %151 = vector.shape_cast %148 : vector<3x32xf32> to vector<3x1x32xf32>
    tpu.vector_store %arg25[%c0_52, %c1, %c0_53], %151 {strides = array<i32>} : memref<3x8x32xf32, #tpu.memory_space<vmem>>, vector<3x1x32xf32>,
    %152 = vector.extract_strided_slice %77 {offsets = [0, 2, 0], sizes = [3, 1, 128], strides = [1, 1, 1]} : vector<3x8x128xf32> to vector<3x1x128xf32>
    %153 = vector.shape_cast %152 : vector<3x1x128xf32> to vector<3x128xf32>
    %154 = arith.truncf %141 : vector<3x32xf32> to vector<3x32xbf16>
    %cst_54 = arith.constant dense<0.000000e+00> : vector<3x128xf32>
    %155 = tpu.matmul %154, %79, %cst_54 {dimension_numbers = #tpu.dot_dimension_numbers<[1], [0], [0], [1], [0, 0, 1, 1], [], []>} : vector<3x32xbf16>, vector<32x128xbf16>, vector<3x128xf32> -> vector<3x128xf32>
    %156 = arith.addf %153, %155 : vector<3x128xf32>
    %157 = arith.negf %156 : vector<3x128xf32>
    %158 = math.exp %157 : vector<3x128xf32>
    %cst_55 = arith.constant 1.000000e+00 : f32
    %159 = vector.broadcast %cst_55 : f32 to vector<3x128xf32>
    %160 = arith.addf %159, %158 : vector<3x128xf32>
    %161 = arith.divf %159, %160 : vector<3x128xf32>
    %162 = math.tanh %156 : vector<3x128xf32>
    %163 = vector.extract_strided_slice %161 {offsets = [0, 0], sizes = [3, 32], strides = [1, 1]} : vector<3x128xf32> to vector<3x32xf32>
    %164 = vector.extract_strided_slice %161 {offsets = [0, 32], sizes = [3, 32], strides = [1, 1]} : vector<3x128xf32> to vector<3x32xf32>
    %165 = vector.extract_strided_slice %162 {offsets = [0, 64], sizes = [3, 32], strides = [1, 1]} : vector<3x128xf32> to vector<3x32xf32>
    %166 = vector.extract_strided_slice %161 {offsets = [0, 96], sizes = [3, 32], strides = [1, 1]} : vector<3x128xf32> to vector<3x32xf32>
    %167 = arith.mulf %164, %144 : vector<3x32xf32>
    %168 = arith.mulf %163, %165 : vector<3x32xf32>
    %169 = arith.addf %167, %168 : vector<3x32xf32>
    %170 = math.tanh %169 : vector<3x32xf32>
    %171 = arith.mulf %166, %170 : vector<3x32xf32>
    %c2_i32 = arith.constant 2 : i32
    %172 = vector.broadcast %c2_i32 : i32 to vector<3x1xi32>
    %173 = arith.cmpi sgt, %78, %172 : vector<3x1xi32>
    %174 = vector.shape_cast %173 : vector<3x1xi1> to vector<3x1xi1>
    %175 = vector.broadcast %174 : vector<3x1xi1> to vector<3x32xi1>
    %176 = arith.select %175, %171, %141 : vector<3x32xi1>, vector<3x32xf32>
    %177 = vector.shape_cast %173 : vector<3x1xi1> to vector<3x1xi1>
    %178 = vector.broadcast %177 : vector<3x1xi1> to vector<3x32xi1>
    %179 = arith.select %178, %169, %144 : vector<3x32xi1>, vector<3x32xf32>
    %cst_56 = arith.constant 0.000000e+00 : f32
    %180 = vector.shape_cast %173 : vector<3x1xi1> to vector<3x1xi1>
    %181 = vector.broadcast %180 : vector<3x1xi1> to vector<3x32xi1>
    %182 = vector.broadcast %cst_56 : f32 to vector<3x32xf32>
    %183 = arith.select %181, %171, %182 : vector<3x32xi1>, vector<3x32xf32>
    %c0_57 = arith.constant 0 : index
    %c2 = arith.constant 2 : index
    %c0_58 = arith.constant 0 : index
    %184 = vector.load %arg25[%c0_57, %c2, %c0_58] : memref<3x8x32xf32, #tpu.memory_space<vmem>>, vector<3x1x32xf32>
    %185 = vector.shape_cast %184 : vector<3x1x32xf32> to vector<3x32xf32>
    %186 = vector.shape_cast %183 : vector<3x32xf32> to vector<3x1x32xf32>
    tpu.vector_store %arg25[%c0_57, %c2, %c0_58], %186 {strides = array<i32>} : memref<3x8x32xf32, #tpu.memory_space<vmem>>, vector<3x1x32xf32>,
    %187 = vector.extract_strided_slice %77 {offsets = [0, 3, 0], sizes = [3, 1, 128], strides = [1, 1, 1]} : vector<3x8x128xf32> to vector<3x1x128xf32>
    %188 = vector.shape_cast %187 : vector<3x1x128xf32> to vector<3x128xf32>
    %189 = arith.truncf %176 : vector<3x32xf32> to vector<3x32xbf16>
    %cst_59 = arith.constant dense<0.000000e+00> : vector<3x128xf32>
    %190 = tpu.matmul %189, %79, %cst_59 {dimension_numbers = #tpu.dot_dimension_numbers<[1], [0], [0], [1], [0, 0, 1, 1], [], []>} : vector<3x32xbf16>, vector<32x128xbf16>, vector<3x128xf32> -> vector<3x128xf32>
    %191 = arith.addf %188, %190 : vector<3x128xf32>
    %192 = arith.negf %191 : vector<3x128xf32>
    %193 = math.exp %192 : vector<3x128xf32>
    %cst_60 = arith.constant 1.000000e+00 : f32
    %194 = vector.broadcast %cst_60 : f32 to vector<3x128xf32>
    %195 = arith.addf %194, %193 : vector<3x128xf32>
    %196 = arith.divf %194, %195 : vector<3x128xf32>
    %197 = math.tanh %191 : vector<3x128xf32>
    %198 = vector.extract_strided_slice %196 {offsets = [0, 0], sizes = [3, 32], strides = [1, 1]} : vector<3x128xf32> to vector<3x32xf32>
    %199 = vector.extract_strided_slice %196 {offsets = [0, 32], sizes = [3, 32], strides = [1, 1]} : vector<3x128xf32> to vector<3x32xf32>
    %200 = vector.extract_strided_slice %197 {offsets = [0, 64], sizes = [3, 32], strides = [1, 1]} : vector<3x128xf32> to vector<3x32xf32>
    %201 = vector.extract_strided_slice %196 {offsets = [0, 96], sizes = [3, 32], strides = [1, 1]} : vector<3x128xf32> to vector<3x32xf32>
    %202 = arith.mulf %199, %179 : vector<3x32xf32>
    %203 = arith.mulf %198, %200 : vector<3x32xf32>
    %204 = arith.addf %202, %203 : vector<3x32xf32>
    %205 = math.tanh %204 : vector<3x32xf32>
    %206 = arith.mulf %201, %205 : vector<3x32xf32>
    %c3_i32 = arith.constant 3 : i32
    %207 = vector.broadcast %c3_i32 : i32 to vector<3x1xi32>
    %208 = arith.cmpi sgt, %78, %207 : vector<3x1xi32>
    %209 = vector.shape_cast %208 : vector<3x1xi1> to vector<3x1xi1>
    %210 = vector.broadcast %209 : vector<3x1xi1> to vector<3x32xi1>
    %211 = arith.select %210, %206, %176 : vector<3x32xi1>, vector<3x32xf32>
    %212 = vector.shape_cast %208 : vector<3x1xi1> to vector<3x1xi1>
    %213 = vector.broadcast %212 : vector<3x1xi1> to vector<3x32xi1>
    %214 = arith.select %213, %204, %179 : vector<3x32xi1>, vector<3x32xf32>
    %cst_61 = arith.constant 0.000000e+00 : f32
    %215 = vector.shape_cast %208 : vector<3x1xi1> to vector<3x1xi1>
    %216 = vector.broadcast %215 : vector<3x1xi1> to vector<3x32xi1>
    %217 = vector.broadcast %cst_61 : f32 to vector<3x32xf32>
    %218 = arith.select %216, %206, %217 : vector<3x32xi1>, vector<3x32xf32>
    %c0_62 = arith.constant 0 : index
    %c3 = arith.constant 3 : index
    %c0_63 = arith.constant 0 : index
    %219 = vector.load %arg25[%c0_62, %c3, %c0_63] : memref<3x8x32xf32, #tpu.memory_space<vmem>>, vector<3x1x32xf32>
    %220 = vector.shape_cast %219 : vector<3x1x32xf32> to vector<3x32xf32>
    %221 = vector.shape_cast %218 : vector<3x32xf32> to vector<3x1x32xf32>
    tpu.vector_store %arg25[%c0_62, %c3, %c0_63], %221 {strides = array<i32>} : memref<3x8x32xf32, #tpu.memory_space<vmem>>, vector<3x1x32xf32>,
    %222 = vector.extract_strided_slice %77 {offsets = [0, 4, 0], sizes = [3, 1, 128], strides = [1, 1, 1]} : vector<3x8x128xf32> to vector<3x1x128xf32>
    %223 = vector.shape_cast %222 : vector<3x1x128xf32> to vector<3x128xf32>
    %224 = arith.truncf %211 : vector<3x32xf32> to vector<3x32xbf16>
    %cst_64 = arith.constant dense<0.000000e+00> : vector<3x128xf32>
    %225 = tpu.matmul %224, %79, %cst_64 {dimension_numbers = #tpu.dot_dimension_numbers<[1], [0], [0], [1], [0, 0, 1, 1], [], []>} : vector<3x32xbf16>, vector<32x128xbf16>, vector<3x128xf32> -> vector<3x128xf32>
    %226 = arith.addf %223, %225 : vector<3x128xf32>
    %227 = arith.negf %226 : vector<3x128xf32>
    %228 = math.exp %227 : vector<3x128xf32>
    %cst_65 = arith.constant 1.000000e+00 : f32
    %229 = vector.broadcast %cst_65 : f32 to vector<3x128xf32>
    %230 = arith.addf %229, %228 : vector<3x128xf32>
    %231 = arith.divf %229, %230 : vector<3x128xf32>
    %232 = math.tanh %226 : vector<3x128xf32>
    %233 = vector.extract_strided_slice %231 {offsets = [0, 0], sizes = [3, 32], strides = [1, 1]} : vector<3x128xf32> to vector<3x32xf32>
    %234 = vector.extract_strided_slice %231 {offsets = [0, 32], sizes = [3, 32], strides = [1, 1]} : vector<3x128xf32> to vector<3x32xf32>
    %235 = vector.extract_strided_slice %232 {offsets = [0, 64], sizes = [3, 32], strides = [1, 1]} : vector<3x128xf32> to vector<3x32xf32>
    %236 = vector.extract_strided_slice %231 {offsets = [0, 96], sizes = [3, 32], strides = [1, 1]} : vector<3x128xf32> to vector<3x32xf32>
    %237 = arith.mulf %234, %214 : vector<3x32xf32>
    %238 = arith.mulf %233, %235 : vector<3x32xf32>
    %239 = arith.addf %237, %238 : vector<3x32xf32>
    %240 = math.tanh %239 : vector<3x32xf32>
    %241 = arith.mulf %236, %240 : vector<3x32xf32>
    %c4_i32 = arith.constant 4 : i32
    %242 = vector.broadcast %c4_i32 : i32 to vector<3x1xi32>
    %243 = arith.cmpi sgt, %78, %242 : vector<3x1xi32>
    %244 = vector.shape_cast %243 : vector<3x1xi1> to vector<3x1xi1>
    %245 = vector.broadcast %244 : vector<3x1xi1> to vector<3x32xi1>
    %246 = arith.select %245, %241, %211 : vector<3x32xi1>, vector<3x32xf32>
    %247 = vector.shape_cast %243 : vector<3x1xi1> to vector<3x1xi1>
    %248 = vector.broadcast %247 : vector<3x1xi1> to vector<3x32xi1>
    %249 = arith.select %248, %239, %214 : vector<3x32xi1>, vector<3x32xf32>
    %cst_66 = arith.constant 0.000000e+00 : f32
    %250 = vector.shape_cast %243 : vector<3x1xi1> to vector<3x1xi1>
    %251 = vector.broadcast %250 : vector<3x1xi1> to vector<3x32xi1>
    %252 = vector.broadcast %cst_66 : f32 to vector<3x32xf32>
    %253 = arith.select %251, %241, %252 : vector<3x32xi1>, vector<3x32xf32>
    %c0_67 = arith.constant 0 : index
    %c4 = arith.constant 4 : index
    %c0_68 = arith.constant 0 : index
    %254 = vector.load %arg25[%c0_67, %c4, %c0_68] : memref<3x8x32xf32, #tpu.memory_space<vmem>>, vector<3x1x32xf32>
    %255 = vector.shape_cast %254 : vector<3x1x32xf32> to vector<3x32xf32>
    %256 = vector.shape_cast %253 : vector<3x32xf32> to vector<3x1x32xf32>
    tpu.vector_store %arg25[%c0_67, %c4, %c0_68], %256 {strides = array<i32>} : memref<3x8x32xf32, #tpu.memory_space<vmem>>, vector<3x1x32xf32>,
    %257 = vector.extract_strided_slice %77 {offsets = [0, 5, 0], sizes = [3, 1, 128], strides = [1, 1, 1]} : vector<3x8x128xf32> to vector<3x1x128xf32>
    %258 = vector.shape_cast %257 : vector<3x1x128xf32> to vector<3x128xf32>
    %259 = arith.truncf %246 : vector<3x32xf32> to vector<3x32xbf16>
    %cst_69 = arith.constant dense<0.000000e+00> : vector<3x128xf32>
    %260 = tpu.matmul %259, %79, %cst_69 {dimension_numbers = #tpu.dot_dimension_numbers<[1], [0], [0], [1], [0, 0, 1, 1], [], []>} : vector<3x32xbf16>, vector<32x128xbf16>, vector<3x128xf32> -> vector<3x128xf32>
    %261 = arith.addf %258, %260 : vector<3x128xf32>
    %262 = arith.negf %261 : vector<3x128xf32>
    %263 = math.exp %262 : vector<3x128xf32>
    %cst_70 = arith.constant 1.000000e+00 : f32
    %264 = vector.broadcast %cst_70 : f32 to vector<3x128xf32>
    %265 = arith.addf %264, %263 : vector<3x128xf32>
    %266 = arith.divf %264, %265 : vector<3x128xf32>
    %267 = math.tanh %261 : vector<3x128xf32>
    %268 = vector.extract_strided_slice %266 {offsets = [0, 0], sizes = [3, 32], strides = [1, 1]} : vector<3x128xf32> to vector<3x32xf32>
    %269 = vector.extract_strided_slice %266 {offsets = [0, 32], sizes = [3, 32], strides = [1, 1]} : vector<3x128xf32> to vector<3x32xf32>
    %270 = vector.extract_strided_slice %267 {offsets = [0, 64], sizes = [3, 32], strides = [1, 1]} : vector<3x128xf32> to vector<3x32xf32>
    %271 = vector.extract_strided_slice %266 {offsets = [0, 96], sizes = [3, 32], strides = [1, 1]} : vector<3x128xf32> to vector<3x32xf32>
    %272 = arith.mulf %269, %249 : vector<3x32xf32>
    %273 = arith.mulf %268, %270 : vector<3x32xf32>
    %274 = arith.addf %272, %273 : vector<3x32xf32>
    %275 = math.tanh %274 : vector<3x32xf32>
    %276 = arith.mulf %271, %275 : vector<3x32xf32>
    %c5_i32 = arith.constant 5 : i32
    %277 = vector.broadcast %c5_i32 : i32 to vector<3x1xi32>
    %278 = arith.cmpi sgt, %78, %277 : vector<3x1xi32>
    %279 = vector.shape_cast %278 : vector<3x1xi1> to vector<3x1xi1>
    %280 = vector.broadcast %279 : vector<3x1xi1> to vector<3x32xi1>
    %281 = arith.select %280, %276, %246 : vector<3x32xi1>, vector<3x32xf32>
    %282 = vector.shape_cast %278 : vector<3x1xi1> to vector<3x1xi1>
    %283 = vector.broadcast %282 : vector<3x1xi1> to vector<3x32xi1>
    %284 = arith.select %283, %274, %249 : vector<3x32xi1>, vector<3x32xf32>
    %cst_71 = arith.constant 0.000000e+00 : f32
    %285 = vector.shape_cast %278 : vector<3x1xi1> to vector<3x1xi1>
    %286 = vector.broadcast %285 : vector<3x1xi1> to vector<3x32xi1>
    %287 = vector.broadcast %cst_71 : f32 to vector<3x32xf32>
    %288 = arith.select %286, %276, %287 : vector<3x32xi1>, vector<3x32xf32>
    %c0_72 = arith.constant 0 : index
    %c5 = arith.constant 5 : index
    %c0_73 = arith.constant 0 : index
    %289 = vector.load %arg25[%c0_72, %c5, %c0_73] : memref<3x8x32xf32, #tpu.memory_space<vmem>>, vector<3x1x32xf32>
    %290 = vector.shape_cast %289 : vector<3x1x32xf32> to vector<3x32xf32>
    %291 = vector.shape_cast %288 : vector<3x32xf32> to vector<3x1x32xf32>
    tpu.vector_store %arg25[%c0_72, %c5, %c0_73], %291 {strides = array<i32>} : memref<3x8x32xf32, #tpu.memory_space<vmem>>, vector<3x1x32xf32>,
    %292 = vector.extract_strided_slice %77 {offsets = [0, 6, 0], sizes = [3, 1, 128], strides = [1, 1, 1]} : vector<3x8x128xf32> to vector<3x1x128xf32>
    %293 = vector.shape_cast %292 : vector<3x1x128xf32> to vector<3x128xf32>
    %294 = arith.truncf %281 : vector<3x32xf32> to vector<3x32xbf16>
    %cst_74 = arith.constant dense<0.000000e+00> : vector<3x128xf32>
    %295 = tpu.matmul %294, %79, %cst_74 {dimension_numbers = #tpu.dot_dimension_numbers<[1], [0], [0], [1], [0, 0, 1, 1], [], []>} : vector<3x32xbf16>, vector<32x128xbf16>, vector<3x128xf32> -> vector<3x128xf32>
    %296 = arith.addf %293, %295 : vector<3x128xf32>
    %297 = arith.negf %296 : vector<3x128xf32>
    %298 = math.exp %297 : vector<3x128xf32>
    %cst_75 = arith.constant 1.000000e+00 : f32
    %299 = vector.broadcast %cst_75 : f32 to vector<3x128xf32>
    %300 = arith.addf %299, %298 : vector<3x128xf32>
    %301 = arith.divf %299, %300 : vector<3x128xf32>
    %302 = math.tanh %296 : vector<3x128xf32>
    %303 = vector.extract_strided_slice %301 {offsets = [0, 0], sizes = [3, 32], strides = [1, 1]} : vector<3x128xf32> to vector<3x32xf32>
    %304 = vector.extract_strided_slice %301 {offsets = [0, 32], sizes = [3, 32], strides = [1, 1]} : vector<3x128xf32> to vector<3x32xf32>
    %305 = vector.extract_strided_slice %302 {offsets = [0, 64], sizes = [3, 32], strides = [1, 1]} : vector<3x128xf32> to vector<3x32xf32>
    %306 = vector.extract_strided_slice %301 {offsets = [0, 96], sizes = [3, 32], strides = [1, 1]} : vector<3x128xf32> to vector<3x32xf32>
    %307 = arith.mulf %304, %284 : vector<3x32xf32>
    %308 = arith.mulf %303, %305 : vector<3x32xf32>
    %309 = arith.addf %307, %308 : vector<3x32xf32>
    %310 = math.tanh %309 : vector<3x32xf32>
    %311 = arith.mulf %306, %310 : vector<3x32xf32>
    %c6_i32 = arith.constant 6 : i32
    %312 = vector.broadcast %c6_i32 : i32 to vector<3x1xi32>
    %313 = arith.cmpi sgt, %78, %312 : vector<3x1xi32>
    %314 = vector.shape_cast %313 : vector<3x1xi1> to vector<3x1xi1>
    %315 = vector.broadcast %314 : vector<3x1xi1> to vector<3x32xi1>
    %316 = arith.select %315, %311, %281 : vector<3x32xi1>, vector<3x32xf32>
    %317 = vector.shape_cast %313 : vector<3x1xi1> to vector<3x1xi1>
    %318 = vector.broadcast %317 : vector<3x1xi1> to vector<3x32xi1>
    %319 = arith.select %318, %309, %284 : vector<3x32xi1>, vector<3x32xf32>
    %cst_76 = arith.constant 0.000000e+00 : f32
    %320 = vector.shape_cast %313 : vector<3x1xi1> to vector<3x1xi1>
    %321 = vector.broadcast %320 : vector<3x1xi1> to vector<3x32xi1>
    %322 = vector.broadcast %cst_76 : f32 to vector<3x32xf32>
    %323 = arith.select %321, %311, %322 : vector<3x32xi1>, vector<3x32xf32>
    %c0_77 = arith.constant 0 : index
    %c6 = arith.constant 6 : index
    %c0_78 = arith.constant 0 : index
    %324 = vector.load %arg25[%c0_77, %c6, %c0_78] : memref<3x8x32xf32, #tpu.memory_space<vmem>>, vector<3x1x32xf32>
    %325 = vector.shape_cast %324 : vector<3x1x32xf32> to vector<3x32xf32>
    %326 = vector.shape_cast %323 : vector<3x32xf32> to vector<3x1x32xf32>
    tpu.vector_store %arg25[%c0_77, %c6, %c0_78], %326 {strides = array<i32>} : memref<3x8x32xf32, #tpu.memory_space<vmem>>, vector<3x1x32xf32>,
    %327 = vector.extract_strided_slice %77 {offsets = [0, 7, 0], sizes = [3, 1, 128], strides = [1, 1, 1]} : vector<3x8x128xf32> to vector<3x1x128xf32>
    %328 = vector.shape_cast %327 : vector<3x1x128xf32> to vector<3x128xf32>
    %329 = arith.truncf %316 : vector<3x32xf32> to vector<3x32xbf16>
    %cst_79 = arith.constant dense<0.000000e+00> : vector<3x128xf32>
    %330 = tpu.matmul %329, %79, %cst_79 {dimension_numbers = #tpu.dot_dimension_numbers<[1], [0], [0], [1], [0, 0, 1, 1], [], []>} : vector<3x32xbf16>, vector<32x128xbf16>, vector<3x128xf32> -> vector<3x128xf32>
    %331 = arith.addf %328, %330 : vector<3x128xf32>
    %332 = arith.negf %331 : vector<3x128xf32>
    %333 = math.exp %332 : vector<3x128xf32>
    %cst_80 = arith.constant 1.000000e+00 : f32
    %334 = vector.broadcast %cst_80 : f32 to vector<3x128xf32>
    %335 = arith.addf %334, %333 : vector<3x128xf32>
    %336 = arith.divf %334, %335 : vector<3x128xf32>
    %337 = math.tanh %331 : vector<3x128xf32>
    %338 = vector.extract_strided_slice %336 {offsets = [0, 0], sizes = [3, 32], strides = [1, 1]} : vector<3x128xf32> to vector<3x32xf32>
    %339 = vector.extract_strided_slice %336 {offsets = [0, 32], sizes = [3, 32], strides = [1, 1]} : vector<3x128xf32> to vector<3x32xf32>
    %340 = vector.extract_strided_slice %337 {offsets = [0, 64], sizes = [3, 32], strides = [1, 1]} : vector<3x128xf32> to vector<3x32xf32>
    %341 = vector.extract_strided_slice %336 {offsets = [0, 96], sizes = [3, 32], strides = [1, 1]} : vector<3x128xf32> to vector<3x32xf32>
    %342 = arith.mulf %339, %319 : vector<3x32xf32>
    %343 = arith.mulf %338, %340 : vector<3x32xf32>
    %344 = arith.addf %342, %343 : vector<3x32xf32>
    %345 = math.tanh %344 : vector<3x32xf32>
    %346 = arith.mulf %341, %345 : vector<3x32xf32>
    %c7_i32 = arith.constant 7 : i32
    %347 = vector.broadcast %c7_i32 : i32 to vector<3x1xi32>
    %348 = arith.cmpi sgt, %78, %347 : vector<3x1xi32>
    %349 = vector.shape_cast %348 : vector<3x1xi1> to vector<3x1xi1>
    %350 = vector.broadcast %349 : vector<3x1xi1> to vector<3x32xi1>
    %351 = arith.select %350, %346, %316 : vector<3x32xi1>, vector<3x32xf32>
    %352 = vector.shape_cast %348 : vector<3x1xi1> to vector<3x1xi1>
    %353 = vector.broadcast %352 : vector<3x1xi1> to vector<3x32xi1>
    %354 = arith.select %353, %344, %319 : vector<3x32xi1>, vector<3x32xf32>
    %cst_81 = arith.constant 0.000000e+00 : f32
    %355 = vector.shape_cast %348 : vector<3x1xi1> to vector<3x1xi1>
    %356 = vector.broadcast %355 : vector<3x1xi1> to vector<3x32xi1>
    %357 = vector.broadcast %cst_81 : f32 to vector<3x32xf32>
    %358 = arith.select %356, %346, %357 : vector<3x32xi1>, vector<3x32xf32>
    %c0_82 = arith.constant 0 : index
    %c7 = arith.constant 7 : index
    %c0_83 = arith.constant 0 : index
    %359 = vector.load %arg25[%c0_82, %c7, %c0_83] : memref<3x8x32xf32, #tpu.memory_space<vmem>>, vector<3x1x32xf32>
    %360 = vector.shape_cast %359 : vector<3x1x32xf32> to vector<3x32xf32>
    %361 = vector.shape_cast %358 : vector<3x32xf32> to vector<3x1x32xf32>
    tpu.vector_store %arg25[%c0_82, %c7, %c0_83], %361 {strides = array<i32>} : memref<3x8x32xf32, #tpu.memory_space<vmem>>, vector<3x1x32xf32>,
    %c0_84 = arith.constant 0 : index
    %c0_85 = arith.constant 0 : index
    %362 = vector.load %arg23[%c0_84, %c0_85] : memref<3x32xf32, #tpu.memory_space<vmem>>, vector<3x32xf32>
    tpu.vector_store %arg23[%c0_84, %c0_85], %351 {strides = array<i32>} : memref<3x32xf32, #tpu.memory_space<vmem>>, vector<3x32xf32>,
    %c0_86 = arith.constant 0 : index
    %c0_87 = arith.constant 0 : index
    %363 = vector.load %arg24[%c0_86, %c0_87] : memref<3x32xf32, #tpu.memory_space<vmem>>, vector<3x32xf32>
    tpu.vector_store %arg24[%c0_86, %c0_87], %354 {strides = array<i32>} : memref<3x32xf32, #tpu.memory_space<vmem>>, vector<3x32xf32>,
    %c0_88 = arith.constant 0 : index
    %c0_89 = arith.constant 0 : index
    %c0_90 = arith.constant 0 : index
    %364 = vector.load %arg25[%c0_88, %c0_89, %c0_90] : memref<3x8x32xf32, #tpu.memory_space<vmem>>, vector<3x8x32xf32>
    %365 = vector.shape_cast %364 : vector<3x8x32xf32> to vector<24x32xf32>
    %c0_91 = arith.constant 0 : index
    %c0_92 = arith.constant 0 : index
    %366 = vector.load %arg14[%c0_91, %c0_92] : memref<1x32xf32, #tpu.memory_space<vmem>>, vector<1x32xf32>
    %c0_93 = arith.constant 0 : index
    %c0_94 = arith.constant 0 : index
    %367 = vector.load %arg15[%c0_93, %c0_94] : memref<1x32xf32, #tpu.memory_space<vmem>>, vector<1x32xf32>
    %cst_95 = arith.constant dense<0.000000e+00> : vector<32xf32>
    %368 = vector.multi_reduction <add>, %365, %cst_95 [0] : vector<24x32xf32> to vector<32xf32>
    %369 = vector.shape_cast %368 : vector<32xf32> to vector<1x32xf32>
    %cst_96 = arith.constant 0.0416666679 : f32
    %370 = vector.broadcast %cst_96 : f32 to vector<1x32xf32>
    %371 = arith.mulf %369, %370 : vector<1x32xf32>
    %372 = arith.mulf %365, %365 : vector<24x32xf32>
    %cst_97 = arith.constant dense<0.000000e+00> : vector<32xf32>
    %373 = vector.multi_reduction <add>, %372, %cst_97 [0] : vector<24x32xf32> to vector<32xf32>
    %374 = vector.shape_cast %373 : vector<32xf32> to vector<1x32xf32>
    %cst_98 = arith.constant 0.0416666679 : f32
    %375 = vector.broadcast %cst_98 : f32 to vector<1x32xf32>
    %376 = arith.mulf %374, %375 : vector<1x32xf32>
    %377 = arith.mulf %371, %371 : vector<1x32xf32>
    %378 = arith.subf %376, %377 : vector<1x32xf32>
    %379 = vector.broadcast %371 : vector<1x32xf32> to vector<24x32xf32>
    %380 = arith.subf %365, %379 : vector<24x32xf32>
    %cst_99 = arith.constant 9.99999974E-6 : f32
    %381 = vector.broadcast %cst_99 : f32 to vector<1x32xf32>
    %382 = arith.addf %378, %381 : vector<1x32xf32>
    %383 = math.rsqrt %382 : vector<1x32xf32>
    %384 = vector.broadcast %383 : vector<1x32xf32> to vector<24x32xf32>
    %385 = arith.mulf %380, %384 : vector<24x32xf32>
    %386 = vector.broadcast %366 : vector<1x32xf32> to vector<24x32xf32>
    %387 = arith.mulf %385, %386 : vector<24x32xf32>
    %388 = vector.broadcast %367 : vector<1x32xf32> to vector<24x32xf32>
    %389 = arith.addf %387, %388 : vector<24x32xf32>
    %c0_100 = arith.constant 0 : index
    %c0_101 = arith.constant 0 : index
    %390 = vector.load %arg16[%c0_100, %c0_101] : memref<32x64xbf16, #tpu.memory_space<vmem>>, vector<32x64xbf16>
    %391 = arith.truncf %389 : vector<24x32xf32> to vector<24x32xbf16>
    %cst_102 = arith.constant dense<0.000000e+00> : vector<24x64xf32>
    %392 = tpu.matmul %391, %390, %cst_102 {dimension_numbers = #tpu.dot_dimension_numbers<[1], [0], [0], [1], [0, 0, 1, 1], [], []>} : vector<24x32xbf16>, vector<32x64xbf16>, vector<24x64xf32> -> vector<24x64xf32>
    %c0_103 = arith.constant 0 : index
    %c0_104 = arith.constant 0 : index
    %393 = vector.load %arg17[%c0_103, %c0_104] : memref<1x64xf32, #tpu.memory_space<vmem>>, vector<1x64xf32>
    %394 = vector.broadcast %393 : vector<1x64xf32> to vector<24x64xf32>
    %395 = arith.addf %392, %394 : vector<24x64xf32>
    %c0_105 = arith.constant 0 : index
    %c0_106 = arith.constant 0 : index
    %396 = vector.load %arg18[%c0_105, %c0_106] : memref<1x64xf32, #tpu.memory_space<vmem>>, vector<1x64xf32>
    %c0_107 = arith.constant 0 : index
    %c0_108 = arith.constant 0 : index
    %397 = vector.load %arg19[%c0_107, %c0_108] : memref<1x64xf32, #tpu.memory_space<vmem>>, vector<1x64xf32>
    %cst_109 = arith.constant dense<0.000000e+00> : vector<64xf32>
    %398 = vector.multi_reduction <add>, %395, %cst_109 [0] : vector<24x64xf32> to vector<64xf32>
    %399 = vector.shape_cast %398 : vector<64xf32> to vector<1x64xf32>
    %cst_110 = arith.constant 0.0416666679 : f32
    %400 = vector.broadcast %cst_110 : f32 to vector<1x64xf32>
    %401 = arith.mulf %399, %400 : vector<1x64xf32>
    %402 = arith.mulf %395, %395 : vector<24x64xf32>
    %cst_111 = arith.constant dense<0.000000e+00> : vector<64xf32>
    %403 = vector.multi_reduction <add>, %402, %cst_111 [0] : vector<24x64xf32> to vector<64xf32>
    %404 = vector.shape_cast %403 : vector<64xf32> to vector<1x64xf32>
    %cst_112 = arith.constant 0.0416666679 : f32
    %405 = vector.broadcast %cst_112 : f32 to vector<1x64xf32>
    %406 = arith.mulf %404, %405 : vector<1x64xf32>
    %407 = arith.mulf %401, %401 : vector<1x64xf32>
    %408 = arith.subf %406, %407 : vector<1x64xf32>
    %409 = vector.broadcast %401 : vector<1x64xf32> to vector<24x64xf32>
    %410 = arith.subf %395, %409 : vector<24x64xf32>
    %cst_113 = arith.constant 9.99999974E-6 : f32
    %411 = vector.broadcast %cst_113 : f32 to vector<1x64xf32>
    %412 = arith.addf %408, %411 : vector<1x64xf32>
    %413 = math.rsqrt %412 : vector<1x64xf32>
    %414 = vector.broadcast %413 : vector<1x64xf32> to vector<24x64xf32>
    %415 = arith.mulf %410, %414 : vector<24x64xf32>
    %416 = vector.broadcast %396 : vector<1x64xf32> to vector<24x64xf32>
    %417 = arith.mulf %415, %416 : vector<24x64xf32>
    %418 = vector.broadcast %397 : vector<1x64xf32> to vector<24x64xf32>
    %419 = arith.addf %417, %418 : vector<24x64xf32>
    %cst_114 = arith.constant 0.000000e+00 : f32
    %420 = vector.broadcast %cst_114 : f32 to vector<24x64xf32>
    %421 = arith.cmpf ogt, %419, %420 : vector<24x64xf32>
    %cst_115 = arith.constant 0.00999999977 : f32
    %422 = vector.broadcast %cst_115 : f32 to vector<24x64xf32>
    %423 = arith.mulf %422, %419 : vector<24x64xf32>
    %424 = arith.select %421, %419, %423 : vector<24x64xi1>, vector<24x64xf32>
    %c0_116 = arith.constant 0 : index
    %c0_117 = arith.constant 0 : index
    %425 = vector.load %arg20[%c0_116, %c0_117] : memref<64x128xbf16, #tpu.memory_space<vmem>>, vector<64x128xbf16>
    %426 = arith.truncf %424 : vector<24x64xf32> to vector<24x64xbf16>
    %cst_118 = arith.constant dense<0.000000e+00> : vector<24x128xf32>
    %427 = tpu.matmul %426, %425, %cst_118 {dimension_numbers = #tpu.dot_dimension_numbers<[1], [0], [0], [1], [0, 0, 1, 1], [], []>} : vector<24x64xbf16>, vector<64x128xbf16>, vector<24x128xf32> -> vector<24x128xf32>
    %c0_119 = arith.constant 0 : index
    %c0_120 = arith.constant 0 : index
    %428 = vector.load %arg21[%c0_119, %c0_120] : memref<1x128xf32, #tpu.memory_space<vmem>>, vector<1x128xf32>
    %429 = vector.broadcast %428 : vector<1x128xf32> to vector<24x128xf32>
    %430 = arith.addf %427, %429 : vector<24x128xf32>
    %c0_121 = arith.constant 0 : index
    %c0_122 = arith.constant 0 : index
    %431 = vector.load %arg22[%c0_121, %c0_122] : memref<24x128xf32, #tpu.memory_space<vmem>>, vector<24x128xf32>
    tpu.vector_store %arg22[%c0_121, %c0_122], %430 {strides = array<i32>} : memref<24x128xf32, #tpu.memory_space<vmem>>, vector<24x128xf32>,
    return
  }
  func.func @transform_0(%arg0: i32) -> (i32, i32) {
    %c0_i32 = arith.constant 0 : i32
    %c0_i32_0 = arith.constant 0 : i32
    %c0_i32_1 = arith.constant 0 : i32
    return %c0_i32, %c0_i32_0 : i32, i32
  }
  func.func @transform_1(%arg0: i32) -> (i32, i32) {
    %c0_i32 = arith.constant 0 : i32
    %c0_i32_0 = arith.constant 0 : i32
    %c0_i32_1 = arith.constant 0 : i32
    return %c0_i32, %c0_i32_0 : i32, i32
  }
  func.func @transform_2(%arg0: i32) -> (i32, i32) {
    %c0_i32 = arith.constant 0 : i32
    %c0_i32_0 = arith.constant 0 : i32
    %c0_i32_1 = arith.constant 0 : i32
    return %c0_i32, %c0_i32_0 : i32, i32
  }
  func.func @transform_3(%arg0: i32) -> (i32, i32) {
    %c0_i32 = arith.constant 0 : i32
    %c0_i32_0 = arith.constant 0 : i32
    %c0_i32_1 = arith.constant 0 : i32
    return %c0_i32, %c0_i32_0 : i32, i32
  }
  func.func @transform_4(%arg0: i32) -> (i32, i32) {
    %c0_i32 = arith.constant 0 : i32
    %c0_i32_0 = arith.constant 0 : i32
    %c0_i32_1 = arith.constant 0 : i32
    return %c0_i32, %c0_i32_0 : i32, i32
  }
  func.func @transform_5(%arg0: i32) -> (i32, i32) {
    %c0_i32 = arith.constant 0 : i32
    %c0_i32_0 = arith.constant 0 : i32
    %c0_i32_1 = arith.constant 0 : i32
    return %c0_i32, %c0_i32_0 : i32, i32
  }
  func.func @transform_6(%arg0: i32) -> (i32, i32) {
    %c0_i32 = arith.constant 0 : i32
    %c0_i32_0 = arith.constant 0 : i32
    %c0_i32_1 = arith.constant 0 : i32
    return %c0_i32, %c0_i32_0 : i32, i32
  }
  func.func @transform_7(%arg0: i32) -> (i32, i32) {
    %c0_i32 = arith.constant 0 : i32
    %c0_i32_0 = arith.constant 0 : i32
    %c0_i32_1 = arith.constant 0 : i32
    return %c0_i32, %c0_i32_0 : i32, i32
  }
  func.func @transform_8(%arg0: i32) -> (i32, i32) {
    %c0_i32 = arith.constant 0 : i32
    %c0_i32_0 = arith.constant 0 : i32
    %c0_i32_1 = arith.constant 0 : i32
    return %c0_i32, %c0_i32_0 : i32, i32
  }
  func.func @transform_9(%arg0: i32) -> (i32, i32) {
    %c0_i32 = arith.constant 0 : i32
    %c0_i32_0 = arith.constant 0 : i32
    %c0_i32_1 = arith.constant 0 : i32
    return %c0_i32, %c0_i32_0 : i32, i32
  }
  func.func @transform_10(%arg0: i32) -> (i32, i32) {
    %c0_i32 = arith.constant 0 : i32
    %c0_i32_0 = arith.constant 0 : i32
    %c0_i32_1 = arith.constant 0 : i32
    return %c0_i32, %c0_i32_0 : i32, i32
  }
  func.func @transform_11(%arg0: i32) -> (i32, i32) {
    %c0_i32 = arith.constant 0 : i32
    %c0_i32_0 = arith.constant 0 : i32
    %c0_i32_1 = arith.constant 0 : i32
    return %c0_i32, %c0_i32_0 : i32, i32
  }
  func.func @transform_12(%arg0: i32) -> (i32, i32) {
    %c0_i32 = arith.constant 0 : i32
    %c0_i32_0 = arith.constant 0 : i32
    %c0_i32_1 = arith.constant 0 : i32
    return %c0_i32, %c0_i32_0 : i32, i32
  }
  func.func @transform_13(%arg0: i32) -> (i32, i32) {
    %c0_i32 = arith.constant 0 : i32
    %c0_i32_0 = arith.constant 0 : i32
    %c0_i32_1 = arith.constant 0 : i32
    return %c0_i32, %c0_i32_0 : i32, i32
  }
  func.func @transform_14(%arg0: i32) -> (i32, i32) {
    %c0_i32 = arith.constant 0 : i32
    %c0_i32_0 = arith.constant 0 : i32
    %c0_i32_1 = arith.constant 0 : i32
    return %c0_i32, %c0_i32_0 : i32, i32
  }
  func.func @transform_15(%arg0: i32) -> (i32, i32) {
    %c0_i32 = arith.constant 0 : i32
    %c0_i32_0 = arith.constant 0 : i32
    %c0_i32_1 = arith.constant 0 : i32
    return %c0_i32, %c0_i32_0 : i32, i32
  }
  func.func @transform_16(%arg0: i32) -> (i32, i32) {
    %c0_i32 = arith.constant 0 : i32
    %c0_i32_0 = arith.constant 0 : i32
    %c0_i32_1 = arith.constant 0 : i32
    return %c0_i32, %c0_i32_0 : i32, i32
  }
  func.func @transform_17(%arg0: i32) -> (i32, i32) {
    %c0_i32 = arith.constant 0 : i32
    %c0_i32_0 = arith.constant 0 : i32
    %c0_i32_1 = arith.constant 0 : i32
    return %c0_i32, %c0_i32_0 : i32, i32
  }
  func.func @transform_18(%arg0: i32) -> (i32, i32) {
    %c0_i32 = arith.constant 0 : i32
    %c0_i32_0 = arith.constant 0 : i32
    %c0_i32_1 = arith.constant 0 : i32
    return %c0_i32, %c0_i32_0 : i32, i32
  }
  func.func @transform_19(%arg0: i32) -> (i32, i32) {
    %c0_i32 = arith.constant 0 : i32
    %c0_i32_0 = arith.constant 0 : i32
    %c0_i32_1 = arith.constant 0 : i32
    return %c0_i32, %c0_i32_0 : i32, i32
  }
  func.func @transform_20(%arg0: i32) -> (i32, i32) {
    %c0_i32 = arith.constant 0 : i32
    %c0_i32_0 = arith.constant 0 : i32
    %c0_i32_1 = arith.constant 0 : i32
    return %c0_i32, %c0_i32_0 : i32, i32
  }
  func.func @transform_21(%arg0: i32) -> (i32, i32) {
    %c0_i32 = arith.constant 0 : i32
    %c0_i32_0 = arith.constant 0 : i32
    %c0_i32_1 = arith.constant 0 : i32
    return %c0_i32, %c0_i32_0 : i32, i32
  }
  func.func @transform_22(%arg0: i32) -> (i32, i32) {
    %c0_i32 = arith.constant 0 : i32
    %c0_i32_0 = arith.constant 0 : i32
    %c0_i32_1 = arith.constant 0 : i32
    return %c0_i32, %c0_i32_0 : i32, i32
  }
  func.func @transform_23(%arg0: i32) -> (i32, i32) {
    %c0_i32 = arith.constant 0 : i32
    %c0_i32_0 = arith.constant 0 : i32
    %c0_i32_1 = arith.constant 0 : i32
    return %c0_i32, %c0_i32_0 : i32, i32
  }
}

</mosaic_0001>

<bundles_post_ra>
// kernel: bn_ddrqn_forward.1
= control target key start
LH: loop header
LB: loop body
LE: loop exit
PB: predicated region body
PF: predicated region fallthrough
CT: control target
= control target key end

     0   :  { %s3793_s0 = inlined_call_operand.vmem [shape: f32[24,10], index: 0, kind: input, shape index: {}]   ;;  %s3794_s1 = inlined_call_operand.vmem [shape: s32[3,1], index: 1, kind: input, shape index: {}]   ;;  %s3795_s2 = inlined_call_operand.hbm [shape: bf16[10,64], index: 2, kind: input, shape index: {}]   ;;  %s3796_s3 = inlined_call_operand.vmem [shape: f32[1,64], index: 3, kind: input, shape index: {}]   ;;  %s3797_s4 = inlined_call_operand.vmem [shape: f32[1,64], index: 4, kind: input, shape index: {}]   ;;  %s3798_s5 = inlined_call_operand.vmem [shape: f32[1,64], index: 5, kind: input, shape index: {}]   ;;  %s3799_s6 = inlined_call_operand.vmem [shape: bf16[64,32], index: 6, kind: input, shape index: {}]   ;;  %s3800_s7 = inlined_call_operand.vmem [shape: f32[1,32], index: 7, kind: input, shape index: {}]   ;;  %s3801_s8 = inlined_call_operand.hbm [shape: f32[1,32], index: 8, kind: input, shape index: {}]   ;;  %s3802_s9 = inlined_call_operand.vmem [shape: f32[1,32], index: 9, kind: input, shape index: {}]   ;;  %s3803_s10 = inlined_call_operand.hbm [shape: bf16[32,128], index: 10, kind: input, shape index: {}]   ;;  %s3804_s11 = inlined_call_operand.hbm [shape: bf16[32,128], index: 11, kind: input, shape index: {}]   ;;  %s3805_s12 = inlined_call_operand.vmem [shape: f32[1,128], index: 12, kind: input, shape index: {}]   ;;  %s3806_s13 = inlined_call_operand.hbm [shape: f32[1,32], index: 13, kind: input, shape index: {}]   ;;  %s3807_s14 = inlined_call_operand.vmem [shape: f32[1,32], index: 14, kind: input, shape index: {}]   ;;  %s3808_s15 = inlined_call_operand.vmem [shape: bf16[32,64], index: 15, kind: input, shape index: {}]   ;;  %s3809_s16 = inlined_call_operand.vmem [shape: f32[1,64], index: 16, kind: input, shape index: {}]   ;;  %s3810_s17 = inlined_call_operand.hbm [shape: f32[1,64], index: 17, kind: input, shape index: {}]   ;;  %s3811_s18 = inlined_call_operand.vmem [shape: f32[1,64], index: 18, kind: input, shape index: {}]   ;;  %s3812_s19 = inlined_call_operand.vmem [shape: bf16[64,128], index: 19, kind: input, shape index: {}]   ;;  %s3813_s20 = inlined_call_operand.vmem [shape: f32[1,128], index: 20, kind: input, shape index: {}]   ;;  %s3814_s21 = inlined_call_operand.vmem [shape: f32[24,128], index: 21, kind: output, shape index: {0}]   ;;  %s3815_s22 = inlined_call_operand.vmem [shape: f32[3,32], index: 22, kind: output, shape index: {1}]   ;;  %s3816_s23 = inlined_call_operand.vmem [shape: f32[3,32], index: 23, kind: output, shape index: {2}]  }
   0x1   :  { %3821 = sst [smem:[#allocation17_spill]] %s3793_s0 }
   0x2   :  { %3822 = sst [smem:[#allocation18_spill]] %s3794_s1 }
   0x3   :  { %3823 = sst [smem:[#allocation19_spill]] %s3795_s2 }
   0x4   :  { %3824 = sst [smem:[#allocation20_spill]] %s3796_s3 }
   0x5   :  { %3825 = sst [smem:[#allocation21_spill]] %s3797_s4 }
   0x6   :  { %3826 = sst [smem:[#allocation22_spill]] %s3798_s5 }
   0x7   :  { %3827 = sst [smem:[#allocation23_spill]] %s3799_s6 }
   0x8   :  { %3828 = sst [smem:[#allocation24_spill]] %s3800_s7 }
   0x9   :  { %29 = vsyncpa [#allocation4], 0 }
   0xa   :  { %30 = vsyncpa [#allocation6], 0 }
   0xb   :  { %31 = vsyncpa [#allocation9], 0 }
   0xc   :  { %32 = vsyncpa [#allocation12], 0  ;;  %s3051_s4 = smov [#allocation5]   ;;  %s2911_s5 = scalar_lea.hbm %s3801_s8, 16 }
   0xd   :  { %s65_s30 = sshll.u32 %s3051_s4, 4  ;;  %p2912_p0 = scmp.ne.s32.totalorder %s3801_s8, %s2911_s5  ;;  %s66_s30 = int_to_ptr.vmem [resolvable:$true] %s65_s30 }
   0xe   :  { %p2915_p1 = scmp.lt.u32.totalorder %s2911_s5, %s3801_s8 }
  0x10   :  { %p2917_p2 = pnand %p2915_p1, %p2912_p0 }
  0x12   :  { %2920 = shalt.err (!%p2917_p2)
}
  0x13   :  { %s2921_s27 = scalar_lea.vmem %s66_s30, 16  ;;  %s2925_s7 = scalar_lea.vmem %s66_s30, 32 }
  0x14   :  { %p2922_p3 = scmp.ne.s32.totalorder %s66_s30, %s2921_s27  ;;  %p2926_p4 = scmp.lt.s32.totalorder %s66_s30, %s66_s30 }
  0x15   :  { %p2927_p5 = scmp.lt.s32.totalorder %s2925_s7, %s2921_s27 }
  0x17   :  { %p2928_p6 = por %p2927_p5, %p2926_p4 }
  0x19   :  { %p2929_p7 = pnand %p2928_p6, %p2922_p3 }
  0x1b   :  { %2932 = shalt.err (!%p2929_p7)
}
  0x1c   :  { %68 = dma.hbm_to_vmem [thread:$0]  %s3801_s8, 16, %s66_s30, [#allocation6]  }
  0x1d   :  { %s3052_s3 = smov [#allocation8]   ;;  %s3053_s4 = smov [#allocation3]  }
  0x1e   :  { %s88_s0 = sshll.u32 %s3052_s3, 4  ;;  %s42_s24 = sshll.u32 %s3053_s4, 4  ;;  %s89_s0 = int_to_ptr.vmem [resolvable:$true] %s88_s0  ;;  %s43_s24 = int_to_ptr.vmem [resolvable:$true] %s42_s24 }
  0x1f   :  { %s2933_s1 = scalar_lea.hbm %s3804_s11, 256 }
  0x20   :  { %p2934_p8 = scmp.ne.s32.totalorder %s3804_s11, %s2933_s1  ;;  %p2937_p9 = scmp.lt.u32.totalorder %s2933_s1, %s3804_s11 }
  0x22   :  { %p2939_p10 = pnand %p2937_p9, %p2934_p8 }
  0x24   :  { %2942 = shalt.err (!%p2939_p10)
}
  0x25   :  { %s2943_s8 = scalar_lea.vmem %s89_s0, 256  ;;  %p2948_p12 = scmp.lt.s32.totalorder %s89_s0, %s89_s0 }
  0x26   :  { %p2944_p11 = scmp.ne.s32.totalorder %s89_s0, %s2943_s8  ;;  %p2949_p13 = scmp.lt.s32.totalorder %s2943_s8, %s2943_s8 }
  0x28   :  { %p2950_p0 = por %p2949_p13, %p2948_p12 }
  0x2a   :  { %p2951_p1 = pnand %p2950_p0, %p2944_p11 }
  0x2c   :  { %2954 = shalt.err (!%p2951_p1)
}
  0x2d   :  { %s3054_s30 = smov 64   ;;  %s3055_s7 = smov 4  }
  0x2e   :  { %94 = dma.hbm_to_vmem [thread:$0]  %s3804_s11, 256, %s89_s0, [#allocation9], %s3054_s30, %s3054_s30, %s3055_s7  }
  0x2f   :  { %s3829_s25 = sld [smem:[#allocation19_spill]] }
  0x35   :  { %s2955_s5 = scalar_lea.hbm %s3829_s25, 128 }
  0x36   :  { %p2956_p2 = scmp.ne.s32.totalorder %s3829_s25, %s2955_s5  ;;  %p2959_p3 = scmp.lt.u32.totalorder %s2955_s5, %s3829_s25 }
  0x38   :  { %p2961_p4 = pnand %p2959_p3, %p2956_p2 }
  0x3a   :  { %2964 = shalt.err (!%p2961_p4)
}
  0x3b   :  { %s2965_s27 = scalar_lea.vmem %s43_s24, 128  ;;  %p2970_p6 = scmp.lt.s32.totalorder %s43_s24, %s43_s24 }
  0x3c   :  { %p2966_p5 = scmp.ne.s32.totalorder %s43_s24, %s2965_s27  ;;  %p2971_p7 = scmp.lt.s32.totalorder %s2965_s27, %s2965_s27 }
  0x3e   :  { %p2972_p8 = por %p2971_p7, %p2970_p6 }
  0x40   :  { %p2973_p9 = pnand %p2972_p8, %p2966_p5 }
  0x42   :  { %2976 = shalt.err (!%p2973_p9)
}
  0x43   :  { %48 = dma.hbm_to_vmem [thread:$0]  %s3829_s25, 128, %s43_s24, [#allocation4], %s3054_s30, %s3054_s30, %s3055_s7  }
  0x44   :  { %s3056_s8 = smov [#allocation7]   ;;  %s3057_s29 = smov [#allocation10]  }
  0x45   :  { %s76_s28 = sshll.u32 %s3056_s8, 4  ;;  %s103_s3 = sshll.u32 %s3057_s29, 4  ;;  %s77_s28 = int_to_ptr.vmem [resolvable:$true] %s76_s28  ;;  %s104_s3 = int_to_ptr.vmem [resolvable:$true] %s103_s3 }
  0x46   :  { %s2977_s1 = scalar_lea.hbm %s3803_s10, 256 }
  0x47   :  { %p2978_p10 = scmp.ne.s32.totalorder %s3803_s10, %s2977_s1  ;;  %p2981_p11 = scmp.lt.u32.totalorder %s2977_s1, %s3803_s10 }
  0x49   :  { %p2983_p12 = pnand %p2981_p11, %p2978_p10 }
  0x4b   :  { %2986 = shalt.err (!%p2983_p12)
}
  0x4c   :  { %s2987_s24 = scalar_lea.vmem %s77_s28, 256  ;;  %p2992_p0 = scmp.lt.s32.totalorder %s77_s28, %s77_s28 }
  0x4d   :  { %p2988_p13 = scmp.ne.s32.totalorder %s77_s28, %s2987_s24  ;;  %p2993_p1 = scmp.lt.s32.totalorder %s2987_s24, %s2987_s24 }
  0x4f   :  { %p2994_p2 = por %p2993_p1, %p2992_p0 }
  0x51   :  { %p2995_p3 = pnand %p2994_p2, %p2988_p13 }
  0x53   :  { %2998 = shalt.err (!%p2995_p3)
}
  0x54   :  { %82 = dma.hbm_to_vmem [thread:$0]  %s3803_s10, 256, %s77_s28, [#allocation6], %s3054_s30, %s3054_s30, %s3055_s7  }
  0x55   :  { %s2999_s29 = scalar_lea.hbm %s3806_s13, 16 }
  0x56   :  { %p3000_p4 = scmp.ne.s32.totalorder %s3806_s13, %s2999_s29  ;;  %p3003_p5 = scmp.lt.u32.totalorder %s2999_s29, %s3806_s13 }
  0x58   :  { %p3005_p6 = pnand %p3003_p5, %p3000_p4 }
  0x5a   :  { %3008 = shalt.err (!%p3005_p6)
}
  0x5b   :  { %s3009_s2 = scalar_lea.vmem %s104_s3, 16  ;;  %s3013_s6 = scalar_lea.vmem %s104_s3, 32 }
  0x5c   :  { %p3010_p7 = scmp.ne.s32.totalorder %s104_s3, %s3009_s2  ;;  %p3014_p8 = scmp.lt.s32.totalorder %s104_s3, %s104_s3 }
  0x5d   :  { %p3015_p9 = scmp.lt.s32.totalorder %s3013_s6, %s3009_s2 }
  0x5f   :  { %p3016_p10 = por %p3015_p9, %p3014_p8 }
  0x61   :  { %p3017_p11 = pnand %p3016_p10, %p3010_p7 }
  0x63   :  { %3020 = shalt.err (!%p3017_p11)
}
  0x64   :  { %106 = dma.hbm_to_vmem [thread:$0]  %s3806_s13, 16, %s104_s3, [#allocation9]  }
  0x65   :  { %s3058_s28 = smov [#allocation11]   ;;  %s3021_s11 = scalar_lea.hbm %s3810_s17, 16 }
  0x66   :  { %s119_s27 = sshll.u32 %s3058_s28, 4  ;;  %p3022_p12 = scmp.ne.s32.totalorder %s3810_s17, %s3021_s11  ;;  %s120_s27 = int_to_ptr.vmem [resolvable:$true] %s119_s27 }
  0x67   :  { %p3025_p13 = scmp.lt.u32.totalorder %s3021_s11, %s3810_s17 }
  0x69   :  { %p3027_p0 = pnand %p3025_p13, %p3022_p12 }
  0x6b   :  { %3030 = shalt.err (!%p3027_p0)
}
  0x6c   :  { %s3031_s5 = scalar_lea.vmem %s120_s27, 16  ;;  %s3035_s13 = scalar_lea.vmem %s120_s27, 32 }
  0x6d   :  { %p3032_p1 = scmp.ne.s32.totalorder %s120_s27, %s3031_s5  ;;  %p3036_p2 = scmp.lt.s32.totalorder %s120_s27, %s120_s27 }
  0x6e   :  { %p3037_p3 = scmp.lt.s32.totalorder %s3035_s13, %s3031_s5 }
  0x70   :  { %p3038_p4 = por %p3037_p3, %p3036_p2 }
  0x72   :  { %p3039_p5 = pnand %p3038_p4, %p3032_p1 }
  0x74   :  { %3042 = shalt.err (!%p3039_p5)
}
  0x75   :  { %122 = dma.hbm_to_vmem [thread:$0]  %s3810_s17, 16, %s120_s27, [#allocation12]  }
  0x76   :  { %3043 = dma.done.wait [#allocation4], 128  }
  0x77   :  { %3044 = vsyncadd [#allocation4], 4294967168 }
  0x78   :  { %3045 = dma.done.wait [#allocation6], 272  }
  0x79   :  { %3046 = vsyncadd [#allocation6], 4294967024 }
  0x7a   :  { %3047 = dma.done.wait [#allocation9], 272  }
  0x7b   :  { %3048 = vsyncadd [#allocation9], 4294967024 }
  0x7c   :  { %3049 = dma.done.wait [#allocation12], 16  }
  0x7d   :  { %3050 = vsyncadd [#allocation12], 4294967280  ;;  %vm174_vm0 = vcmask 1044480   ;;  %v2693_v0 = vld [vmem:[#allocation3] sm:$0x1f]   ;;  %s3830_s6 = sld [smem:[#allocation17_spill]] }
  0x7e   :  { %vm167_vm1 = vcmask 80896   ;;  %2676 = vmatprep.subr.msk.bf16.mxu0 %vm174_vm0, %v2693_v0  ;;  %v176_v4 = vsel %vm174_vm0, %v2693_v0, 0  ;;  %s3831_s25 = sld [smem:[#allocation23_spill]]  ;;  %s3832_s1 = sld [smem:[#allocation20_spill]]  ;;  %vm228_vm2 = vcmask 523264   ;;  %vm3061_vm6 = vmmov 0  }
  0x7f   :  { %2567 = vmatpush3.bf16.msra.mxu0 %v176_v4  ;;  %s3834_s17 = sld [smem:[#allocation22_spill]]  ;;  %s3835_s24 = sld [smem:[#allocation24_spill]]  ;;  %vm390_vm7 = vcmask 261120   ;;  %vm685_vm12 = vcmask 1041409   ;;  %vm688_vm13 = vcmask 1042434   ;;  %vm732_vm15 = vcmask 253952  }
  0x80   :  { %s3836_s4 = sld [smem:[#allocation18_spill]]  ;;  %s3063_s5 = smov 96  }
  0x83   :  { %v148_v1 = vld [vmem:[%s3830_s6] sm:$0xff]  ;;  %v149_v2 = vld [vmem:[%s3830_s6 + $0x8] sm:$0xff]  ;;  %v150_v3 = vld [vmem:[%s3830_s6 + $0x10] sm:$0xff]  ;;  %s3833_s6 = sld [smem:[#allocation21_spill]] }
  0x84   :  { %v153_v5 = vpack.c.bf16 %v149_v2, %v148_v1  ;;  %v154_v6 = vpack.c.bf16 %v150_v3, %v150_v3  ;;  %v2694_v7 = vld [vmem:[%s3831_s25] sm:$0xff]   ;;  %v2695_v8 = vld [vmem:[%s3831_s25 + $0x8] sm:$0xff]   ;;  %v2696_v9 = vld [vmem:[%s3831_s25 + $0x10] sm:$0xff]  }
  0x85   :  { %2572 = vmatprep.subr.bf16.mxu1 %v2694_v7  ;;  %v2697_v10 = vld [vmem:[%s3831_s25 + $0x18] sm:$0xff]   ;;  %v2450_v11 = vld [vmem:[%s3832_s1] ss:$0 sm:$0xff] }
  0x86   :  { %2568 = vmatprep.mubr.msk.bf16.mxu0 %vm167_vm1, %v153_v5  ;;  %2573 = vmatpush3.bf16.msra.mxu1 %v2694_v7  ;;  %v2455_v57 = vld [vmem:[%s3834_s17] ss:$0 sm:$0xff] }
  0x87   :  { %2569 = vmatmul.mubr.msk.bf16.vlgmr.msra.gmra.mrb[0].mxu0 %vm167_vm1, %v154_v6  ;;  %2574 = vmatprep.subr.bf16.mxu1 %v2695_v8 }
  0x89   :  { %v2454_v53 = vld [vmem:[%s3833_s6] ss:$0 sm:$0xff] }
  0x8a   :  { %2575 = vmatpush3.bf16.msra.mxu1 %v2695_v8  ;;  %v2698_v8 = vld [vmem:[#allocation7] sm:$0xff]  }
  0x8b   :  { %2576 = vmatprep.subr.bf16.mxu1 %v2696_v9  ;;  %2584 = vmatprep.subr.bf16.mxu0 %v2698_v8 }
  0x8c   :  { %2585 = vmatpush3.bf16.msra.mxu0 %v2698_v8 }
  0x8e   :  { %2577 = vmatpush3.bf16.msra.mxu1 %v2696_v9  ;;  %v2699_v9 = vld [vmem:[#allocation7 + $0x8] sm:$0xff]  }
  0x8f   :  { %2578 = vmatprep.subr.bf16.mxu1 %v2697_v10  ;;  %2586 = vmatprep.subr.bf16.mxu0 %v2699_v9 }
  0x90   :  { %2587 = vmatpush3.bf16.msra.mxu0 %v2699_v9 }
  0x92   :  { %2579 = vmatpush3.bf16.msra.mxu1 %v2697_v10  ;;  %v3059_v10 = vmov 0.0  }
  0x93   :  { %2592 = vmatprep.subr.bf16.mxu0 %v3059_v10  ;;  %2616 = vmatprep.subr.bf16.mxu1 %v3059_v10 }
 0x15a   :  { %v2570_v12 = vpop.f32.mrb[0].mxu0 }
 0x15b   :  { %v212_v13 = vpop.f32.mrb[1].mxu0  ;;  %v221_v14 = vadd.f32 %v2570_v12, %v2450_v11  ;;  %v3310_v12 = vld [vmem:[#allocation8 + $0x8] sm:$0xff]  }
 0x15c   :  { %v213_v15 = vadd.f32 %v2450_v11, %v212_v13  ;;  %v2571_v16 = vpop.f32.mrb[2].mxu0  ;;  %v3060_v13 = vmov 0  }
 0x15d   :  { %v215_v17 = vpop.f32.mrb[3].mxu0  ;;  %v243_v20 = vmul.f32 %v221_v14, %v221_v14  ;;  %v232_v25 = vsel %vm228_vm2, %v221_v14, 0.0  ;;  %2691 = vset.pattern.permute.xlu1 %v3060_v13  ;;  %2692 = vset.pattern.permute.xlu0 %v3060_v13 }
 0x15e   :  { %v241_v18 = vmul.f32 %v213_v15, %v213_v15  ;;  %v216_v19 = vadd.f32 %v2450_v11, %v215_v17  ;;  %v229_v21 = vsel %vm228_vm2, %v213_v15, 0.0  ;;  %v3305_v11 = vld [vmem:[#allocation8] sm:$0xff]  }
 0x15f   :  { %v247_v30 = vsel %vm228_vm2, %v243_v20, 0.0 }
 0x160   :  { %v230_v22 = vsel %vm228_vm2, %v216_v19, 0.0  ;;  %v242_v23 = vmul.f32 %v216_v19, %v216_v19  ;;  %v244_v26 = vsel %vm228_vm2, %v241_v18, 0.0 }
 0x161   :  { %v231_v24 = vadd.f32 %v230_v22, %v229_v21 }
 0x162   :  { %v245_v27 = vsel %vm228_vm2, %v242_v23, 0.0 }
 0x163   :  { %v233_v28 = vadd.f32 %v232_v25, %v231_v24  ;;  %v246_v29 = vadd.f32 %v245_v27, %v244_v26 }
 0x165   :  { %v234_v31 = vrot.slane %v233_v28, 4  ;;  %v248_v32 = vadd.f32 %v247_v30, %v246_v29 }
 0x167   :  { %v235_v33 = vadd.f32 %v234_v31, %v233_v28  ;;  %v249_v34 = vrot.slane %v248_v32, 4 }
 0x169   :  { %v236_v35 = vrot.slane %v235_v33, 2  ;;  %v250_v36 = vadd.f32 %v249_v34, %v248_v32 }
 0x16b   :  { %v237_v37 = vadd.f32 %v236_v35, %v235_v33  ;;  %v251_v38 = vrot.slane %v250_v36, 2 }
 0x16d   :  { %v238_v39 = vrot.slane %v237_v37, 1  ;;  %v252_v40 = vadd.f32 %v251_v38, %v250_v36 }
 0x16f   :  { %v239_v41 = vadd.f32 %v238_v39, %v237_v37  ;;  %v253_v42 = vrot.slane %v252_v40, 1 }
 0x171   :  { %v240_v43 = vmul.f32 0.041666668, %v239_v41  ;;  %v254_v44 = vadd.f32 %v253_v42, %v252_v40 }
 0x173   :  { %v255_v45 = vmul.f32 0.041666668, %v254_v44  ;;  %v256_v46 = vmul.f32 %v240_v43, %v240_v43  ;;  %v259_v47 = vsub.f32 %v216_v19, %v240_v43  ;;  %v258_v48 = vsub.f32 %v213_v15, %v240_v43 }
 0x174   :  { %v260_v49 = vsub.f32 %v221_v14, %v240_v43  ;;  %v2456_v14 = vld [vmem:[%s3835_s24] ss:$0 sm:$0xff] }
 0x175   :  { %v257_v50 = vsub.f32 %v255_v45, %v256_v46 }
 0x177   :  { %v261_v51 = vadd.f32 1e-05, %v257_v50 }
 0x179   :  { %2708 = vrsqrt.f32 %v261_v51 }
 0x183   :  { %v2709_v52 = vpop.eup %2708 }
 0x184   :  { %v264_v54 = vmul.f32 %v2709_v52, %v259_v47  ;;  %v263_v55 = vmul.f32 %v2709_v52, %v258_v48  ;;  %v265_v56 = vmul.f32 %v2709_v52, %v260_v49 }
 0x186   :  { %v272_v58 = vmul.f32 %v2454_v53, %v263_v55  ;;  %v273_v59 = vmul.f32 %v2454_v53, %v264_v54  ;;  %v274_v60 = vmul.f32 %v2454_v53, %v265_v56  ;;  %v2463_v56 = vld [vmem:[#allocation5] ss:$0 sm:$0xff] }
 0x188   :  { %v281_v61 = vadd.f32 %v2455_v57, %v272_v58  ;;  %v282_v62 = vadd.f32 %v2455_v57, %v273_v59  ;;  %v283_v63 = vadd.f32 %v2455_v57, %v274_v60  ;;  %v2464_v60 = vld [vmem:[%s3802_s9] ss:$0 sm:$0xff] }
 0x18a   :  { %vm284_vm3 = vcmp.gt.f32.partialorder %v281_v61, 0.0  ;;  %vm285_vm4 = vcmp.gt.f32.partialorder %v282_v62, 0.0  ;;  %v287_v0 = vmul.f32 0.01, %v281_v61  ;;  %v288_v1 = vmul.f32 0.01, %v282_v62 }
 0x18b   :  { %vm286_vm5 = vcmp.gt.f32.partialorder %v283_v63, 0.0  ;;  %v289_v2 = vmul.f32 0.01, %v283_v63 }
 0x18c   :  { %v290_v3 = vsel %vm284_vm3, %v281_v61, %v287_v0  ;;  %v291_v4 = vsel %vm285_vm4, %v282_v62, %v288_v1 }
 0x18d   :  { %v301_v5 = vpack.c.bf16 %v291_v4, %v290_v3  ;;  %v292_v6 = vsel %vm286_vm5, %v283_v63, %v289_v2 }
 0x18e   :  { %v302_v7 = vpack.c.bf16 %v292_v6, %v292_v6 }
 0x18f   :  { %2580 = vmatprep.mubr.msk.bf16.mxu1 %vm228_vm2, %v301_v5 }
 0x190   :  { %2581 = vmatmul.mubr.msk.bf16.vlgmr.msra.gmra.mrb[0].mxu1 %vm228_vm2, %v302_v7 }
 0x191   :  { %2617 = vmatpush3.bf16.msra.mxu1 %v3305_v11  ;;  %2620 = vmatprep.mubr.msk.bf16.mxu1 %vm3061_vm6, %v3059_v10 }
 0x192   :  { %2618 = vmatprep.subr.bf16.mxu1 %v3059_v10 }
 0x195   :  { %2619 = vmatpush3.bf16.msra.mxu1 %v3310_v12 }
 0x196   :  { %2632 = vmatprep.subr.bf16.mxu1 %v3059_v10 }
 0x263   :  { %v2582_v15 = vpop.f32.mrb[0].mxu1 }
 0x264   :  { %v374_v16 = vpop.f32.mrb[1].mxu1  ;;  %v383_v17 = vadd.f32 %v2582_v15, %v2456_v14 }
 0x265   :  { %v375_v18 = vadd.f32 %v2456_v14, %v374_v16  ;;  %v2583_v19 = vpop.f32.mrb[2].mxu1 }
 0x266   :  { %v377_v20 = vpop.f32.mrb[3].mxu1  ;;  %v405_v23 = vmul.f32 %v383_v17, %v383_v17  ;;  %v394_v28 = vsel %vm390_vm7, %v383_v17, 0.0  ;;  %v2465_v19 = vld [vmem:[%s3805_s12] ss:$0 sm:$0xff]  ;;  %s3062_s12 = smov 32  }
 0x267   :  { %v403_v21 = vmul.f32 %v375_v18, %v375_v18  ;;  %v378_v22 = vadd.f32 %v2456_v14, %v377_v20  ;;  %v391_v24 = vsel %vm390_vm7, %v375_v18, 0.0 }
 0x268   :  { %v409_v33 = vsel %vm390_vm7, %v405_v23, 0.0 }
 0x269   :  { %v392_v25 = vsel %vm390_vm7, %v378_v22, 0.0  ;;  %v404_v26 = vmul.f32 %v378_v22, %v378_v22  ;;  %v406_v29 = vsel %vm390_vm7, %v403_v21, 0.0 }
 0x26a   :  { %v393_v27 = vadd.f32 %v392_v25, %v391_v24 }
 0x26b   :  { %v407_v30 = vsel %vm390_vm7, %v404_v26, 0.0 }
 0x26c   :  { %v395_v31 = vadd.f32 %v394_v28, %v393_v27  ;;  %v408_v32 = vadd.f32 %v407_v30, %v406_v29 }
 0x26e   :  { %v396_v34 = vrot.slane %v395_v31, 4  ;;  %v410_v35 = vadd.f32 %v409_v33, %v408_v32 }
 0x270   :  { %v397_v36 = vadd.f32 %v396_v34, %v395_v31  ;;  %v411_v37 = vrot.slane %v410_v35, 4 }
 0x272   :  { %v398_v38 = vrot.slane %v397_v36, 2  ;;  %v412_v39 = vadd.f32 %v411_v37, %v410_v35 }
 0x274   :  { %v399_v40 = vadd.f32 %v398_v38, %v397_v36  ;;  %v413_v41 = vrot.slane %v412_v39, 2 }
 0x276   :  { %v400_v42 = vrot.slane %v399_v40, 1  ;;  %v414_v43 = vadd.f32 %v413_v41, %v412_v39 }
 0x278   :  { %v401_v44 = vadd.f32 %v400_v42, %v399_v40  ;;  %v415_v45 = vrot.slane %v414_v43, 1 }
 0x27a   :  { %v402_v46 = vmul.f32 0.041666668, %v401_v44  ;;  %v416_v47 = vadd.f32 %v415_v45, %v414_v43 }
 0x27c   :  { %v417_v48 = vmul.f32 0.041666668, %v416_v47  ;;  %v418_v49 = vmul.f32 %v402_v46, %v402_v46  ;;  %v420_v50 = vsub.f32 %v375_v18, %v402_v46  ;;  %v421_v51 = vsub.f32 %v378_v22, %v402_v46 }
 0x27d   :  { %v422_v52 = vsub.f32 %v383_v17, %v402_v46 }
 0x27e   :  { %v419_v53 = vsub.f32 %v417_v48, %v418_v49 }
 0x280   :  { %v423_v54 = vadd.f32 1e-05, %v419_v53 }
 0x282   :  { %2710 = vrsqrt.f32 %v423_v54 }
 0x28c   :  { %v2711_v55 = vpop.eup %2710 }
 0x28d   :  { %v425_v57 = vmul.f32 %v2711_v55, %v420_v50  ;;  %v426_v58 = vmul.f32 %v2711_v55, %v421_v51  ;;  %v427_v59 = vmul.f32 %v2711_v55, %v422_v52 }
 0x28f   :  { %v434_v61 = vmul.f32 %v2463_v56, %v425_v57  ;;  %v435_v62 = vmul.f32 %v2463_v56, %v426_v58  ;;  %v436_v63 = vmul.f32 %v2463_v56, %v427_v59 }
 0x291   :  { %v444_v0 = vadd.f32 %v2464_v60, %v435_v62  ;;  %v445_v1 = vadd.f32 %v2464_v60, %v436_v63  ;;  %v443_v2 = vadd.f32 %v2464_v60, %v434_v61  ;;  %v3366_v63 = vld [vmem:[%s3836_s4] sm:$0x7] }
 0x292   :  { %vm675_vm11 = vcmp.gt.s32.totalorder %v3366_v63, 0  ;;  %vm873_vm0 = vcmp.gt.s32.totalorder %v3366_v63, 1  ;;  %vm1069_vm3 = vcmp.gt.s32.totalorder %v3366_v63, 2  ;;  %vm1267_vm5 = vcmp.gt.s32.totalorder %v3366_v63, 3 }
 0x293   :  { %vm446_vm8 = vcmp.gt.f32.partialorder %v443_v2, 0.0  ;;  %vm447_vm9 = vcmp.gt.f32.partialorder %v444_v0, 0.0  ;;  %v449_v3 = vmul.f32 0.01, %v443_v2  ;;  %v450_v4 = vmul.f32 0.01, %v444_v0 }
 0x294   :  { %vm448_vm10 = vcmp.gt.f32.partialorder %v445_v1, 0.0  ;;  %v451_v5 = vmul.f32 0.01, %v445_v1 }
 0x295   :  { %v452_v6 = vsel %vm446_vm8, %v443_v2, %v449_v3  ;;  %v453_v7 = vsel %vm447_vm9, %v444_v0, %v450_v4  ;;  %v676_v2 = vsel %vm675_vm11, 1, %v3060_v13  ;;  %vm1467_vm9 = vcmp.gt.s32.totalorder %v3366_v63, 4 }
 0x296   :  { %v459_v8 = vpack.c.bf16 %v453_v7, %v452_v6  ;;  %v454_v9 = vsel %vm448_vm10, %v445_v1, %v451_v5 }
 0x297   :  { %v460_v14 = vpack.c.bf16 %v454_v9, %v454_v9 }
 0x298   :  { %2588 = vmatprep.mubr.msk.bf16.mxu0 %vm390_vm7, %v459_v8 }
 0x299   :  { %2589 = vmatmul.mubr.msk.bf16.vlgmr.msra.gmra.mrb[4].mxu0 %vm390_vm7, %v460_v14 }
 0x29a   :  { %2593 = vmatpush3.bf16.msra.mxu0 %v3305_v11  ;;  %2596 = vmatprep.mubr.msk.bf16.mxu0 %vm3061_vm6, %v3059_v10 }
 0x29b   :  { %2594 = vmatprep.subr.bf16.mxu0 %v3059_v10 }
 0x29e   :  { %2595 = vmatpush3.bf16.msra.mxu0 %v3310_v12 }
 0x29f   :  { %2600 = vmatprep.subr.bf16.mxu0 %v3059_v10 }
 0x2a1   :  { %2597 = vmatmul.mubr.bf16.vlgmr.msra.gmra.mrb[8].mxu0 %v3060_v13 }
 0x2a2   :  { %2601 = vmatpush3.bf16.msra.mxu0 %v3305_v11  ;;  %2604 = vmatprep.mubr.msk.bf16.mxu0 %vm3061_vm6, %v3059_v10 }
 0x2a3   :  { %2602 = vmatprep.subr.bf16.mxu0 %v3059_v10 }
 0x2a6   :  { %2603 = vmatpush3.bf16.msra.mxu0 %v3310_v12 }
 0x2a7   :  { %2608 = vmatprep.subr.bf16.mxu0 %v3059_v10 }
 0x36c   :  { %v2590_v15 = vpop.f32.mrb[4].mxu0 }
 0x36d   :  { %v520_v16 = vpop.f32.mrb[5].mxu0  ;;  %v3354_v30 = vadd.f32 %v2590_v15, %v2465_v19 }
 0x36e   :  { %v2591_v17 = vpop.f32.mrb[6].mxu0  ;;  %v3348_v20 = vadd.f32 %v2465_v19, %v520_v16 }
 0x36f   :  { %v523_v18 = vpop.f32.mrb[7].mxu0 }
 0x370   :  { %v3351_v25 = vadd.f32 %v2465_v19, %v523_v18 }
 0x374   :  { %v588_v21 = vpop.f32.mrb[8].mxu0 }
 0x375   :  { %v595_v22 = vrot.slane %v588_v21, 1  ;;  %v600_v23 = vadd.f32 %v588_v21, %v3348_v20  ;;  %v2598_v24 = vpop.f32.mrb[9].mxu0  ;;  %v596_v28 = vrot.slane %v588_v21, 2 }
 0x376   :  { %v591_v26 = vpop.f32.mrb[10].mxu0  ;;  %v709_v24 = vlaneseq }
 0x377   :  { %v2599_v27 = vpop.f32.mrb[11].mxu0  ;;  %2712 = vtanh.f32 %v600_v23  ;;  %v601_v29 = vadd.f32 %v595_v22, %v3351_v25  ;;  %v602_v31 = vadd.f32 %v596_v28, %v3354_v30  ;;  %v2472_v36 = vmul.f32 -1.442695, %v600_v23 }
 0x378   :  { %v3064_v22 = vmov 1966171168   ;;  %v710_v27 = vshrl.u32 %v709_v24, 7 }
 0x379   :  { %2714 = vtanh.f32 %v601_v29  ;;  %v2473_v35 = vmul.f32 -1.442695, %v601_v29  ;;  %v2474_v37 = vmul.f32 -1.442695, %v602_v31  ;;  %v707_v23 = vunpack.c.l.s4 %v3064_v22 }
 0x37a   :  { %2716 = vtanh.f32 %v602_v31 }
 0x37b   :  { %2718 = vpow2.f32 %v2473_v35  ;;  %v708_v26 = vunpack.c.0.s8 %v707_v23 }
 0x37c   :  { %2720 = vpow2.f32 %v2472_v36 }
 0x37d   :  { %2722 = vpow2.f32 %v2474_v37  ;;  %v3379_v28 = vsub.s32 %v708_v26, %v710_v27 }
 0x381   :  { %v2713_v32 = vpop.eup %2712 }
 0x382   :  { %630 = vrot.lane.b32.xlu1 %v2713_v32, %s3054_s30 }
 0x383   :  { %v2715_v33 = vpop.eup %2714 }
 0x384   :  { %632 = vrot.lane.b32.xlu0 %v2715_v33, %s3054_s30  ;;  %v2717_v34 = vpop.eup %2716 }
 0x385   :  { %v2719_v38 = vpop.eup %2718 }
 0x386   :  { %v2721_v39 = vpop.eup %2720  ;;  %v613_v40 = vadd.f32 1.0, %v2719_v38 }
 0x387   :  { %v2723_v41 = vpop.eup %2722  ;;  %v612_v42 = vadd.f32 1.0, %v2721_v39 }
 0x388   :  { %634 = vrot.lane.b32.xlu0 %v2717_v34, %s3054_s30  ;;  %v614_v43 = vadd.f32 1.0, %v2723_v41  ;;  %2724 = vrcp.f32 %v613_v40 }
 0x389   :  { %2726 = vrcp.f32 %v612_v42 }
 0x38a   :  { %2728 = vrcp.f32 %v614_v43 }
 0x392   :  { %v2725_v44 = vpop.eup %2724 }
 0x393   :  { %v2727_v48 = vpop.eup %2726  ;;  %v625_v53 = vmul.f32 0.0, %v2725_v44 }
 0x394   :  { %v2729_v49 = vpop.eup %2728  ;;  %v624_v57 = vmul.f32 0.0, %v2727_v48 }
 0x395   :  { %v626_v56 = vmul.f32 0.0, %v2729_v49 }
 0x3f4   :  { %v631_v47 = vpop.permute.xlu1 %630 }
 0x3f5   :  { %v639_v51 = vmul.f32 %v2727_v48, %v631_v47 }
 0x3f6   :  { %v633_v45 = vpop.permute.xlu0 %632 }
 0x3f7   :  { %v640_v46 = vmul.f32 %v2725_v44, %v633_v45 }
 0x3f9   :  { %647 = vrot.lane.b32.xlu1 %v640_v46, %s3062_s12 }
 0x3fa   :  { %v635_v50 = vpop.permute.xlu0 %634 }
 0x3fb   :  { %v641_v52 = vmul.f32 %v2729_v49, %v635_v50 }
 0x3fd   :  { %649 = vrot.lane.b32.xlu0 %v641_v52, %s3062_s12  ;;  %645 = vrot.lane.b32.xlu1 %v639_v51, %s3062_s12 }
 0x46b   :  { %v648_v54 = vpop.permute.xlu1 %647 }
 0x46c   :  { %v655_v55 = vadd.f32 %v648_v54, %v625_v53 }
 0x46e   :  { %2730 = vtanh.f32 %v655_v55  ;;  %v697_v3 = vrot.slane %v655_v55, 7 }
 0x46f   :  { %v650_v58 = vpop.permute.xlu0 %649  ;;  %v646_v59 = vpop.permute.xlu1 %645 }
 0x470   :  { %v656_v60 = vadd.f32 %v650_v58, %v626_v56  ;;  %v654_v61 = vadd.f32 %v646_v59, %v624_v57 }
 0x472   :  { %2732 = vtanh.f32 %v656_v60  ;;  %v699_v4 = vrot.slane %v656_v60, 6  ;;  %v698_v5 = vsel %vm685_vm12, %v697_v3, %v654_v61 }
 0x473   :  { %2734 = vtanh.f32 %v654_v61 }
 0x474   :  { %v700_v6 = vsel %vm688_vm13, %v699_v4, %v698_v5 }
 0x478   :  { %v2731_v62 = vpop.eup %2730 }
 0x479   :  { %665 = vrot.lane.b32.xlu0 %v2731_v62, %s3054_s30 }
 0x47c   :  { %v2733_v0 = vpop.eup %2732 }
 0x47d   :  { %v2735_v1 = vpop.eup %2734  ;;  %667 = vrot.lane.b32.xlu1 %v2733_v0, %s3054_s30 }
 0x47e   :  { %663 = vrot.lane.b32.xlu0 %v2735_v1, %s3054_s30 }
 0x481   :  { %678 = vperm.xlu1 %2691, %v676_v2  }
 0x485   :  { %701 = vrot.lane.b32.xlu1 %v700_v6, %s3063_s5 }
 0x4eb   :  { %v666_v7 = vpop.permute.xlu0 %665 }
 0x4ec   :  { %v673_v8 = vmul.f32 %v2725_v44, %v666_v7 }
 0x4ee   :  { %v684_v16 = vrot.slane %v673_v8, 7 }
 0x4ef   :  { %v668_v9 = vpop.permute.xlu1 %667 }
 0x4f0   :  { %v674_v14 = vmul.f32 %v2729_v49, %v668_v9  ;;  %v664_v15 = vpop.permute.xlu0 %663 }
 0x4f1   :  { %v672_v17 = vmul.f32 %v2727_v48, %v664_v15 }
 0x4f2   :  { %v687_v18 = vrot.slane %v674_v14, 6 }
 0x4f3   :  { %v686_v19 = vsel %vm685_vm12, %v684_v16, %v672_v17 }
 0x4f4   :  { %v689_v21 = vsel %vm688_vm13, %v687_v18, %v686_v19 }
 0x4f5   :  { %690 = vrot.lane.b32.xlu0 %v689_v21, %s3062_s12 }
 0x500   :  { %v679_v29 = vpop.permute.xlu1 %678 }
 0x501   :  { %vm680_vm14 = vcmp.eq.s32.totalorder %v679_v29, 1 }
 0x504   :  { %v702_v49 = vpop.permute.xlu1 %701 }
 0x505   :  { %v3405_v51 = vsel %vm680_vm14, %v702_v49, 0.0 }
 0x506   :  { %v811_v53 = vrot.slane %v3405_v51, 7  ;;  %v812_v54 = vrot.slane %v3405_v51, 1 }
 0x567   :  { %v691_v31 = vpop.permute.xlu0 %690 }
 0x568   :  { %v3382_v32 = vsel %vm680_vm14, %v691_v31, 0.0 }
 0x569   :  { %v712_v33 = vrot.slane %v3382_v32, %v3379_v28  ;;  %v736_v34 = vpack.c.bf16 %v3382_v32, %v3382_v32 }
 0x56b   :  { %v713_v35 = vcombine.high %v712_v33, %v712_v33  ;;  %v720_v36 = vrot.slane %v712_v33, %v3379_v28  ;;  %2605 = vmatmul.mubr.msk.bf16.vlgmr.msra.gmra.mrb[12].mxu0 %vm390_vm7, %v736_v34 }
 0x56c   :  { %2609 = vmatpush3.bf16.msra.mxu0 %v3305_v11  ;;  %2612 = vmatprep.mubr.msk.bf16.mxu0 %vm3061_vm6, %v3059_v10 }
 0x56d   :  { %v727_v37 = vrot.slane %v713_v35, %v3379_v28  ;;  %v728_v38 = vcombine.high %v720_v36, %v720_v36  ;;  %733 = vst.msk [vmem:[#allocation2] sm:$0x1] %vm732_vm15, %v720_v36  ;;  %2610 = vmatprep.subr.bf16.mxu0 %v3059_v10 }
 0x56f   :  { %734 = vst.msk [vmem:[#allocation2 + $0x8] sm:$0x1] %vm732_vm15, %v727_v37  ;;  %735 = vst.msk [vmem:[#allocation2 + $0x10] sm:$0x1] %vm732_vm15, %v728_v38  ;;  %v874_v38 = vsel %vm873_vm0, 1, %v3060_v13 }
 0x570   :  { %2611 = vmatpush3.bf16.msra.mxu0 %v3310_v12 }
 0x571   :  { %2624 = vmatprep.subr.bf16.mxu0 %v3059_v10 }
 0x63e   :  { %v774_v39 = vpop.f32.mrb[12].mxu0 }
 0x63f   :  { %v781_v40 = vrot.slane %v774_v39, 7  ;;  %v782_v41 = vrot.slane %v774_v39, 1  ;;  %v2606_v42 = vpop.f32.mrb[13].mxu0  ;;  %v787_v47 = vadd.f32 %v774_v39, %v3351_v25 }
 0x640   :  { %v777_v43 = vpop.f32.mrb[14].mxu0 }
 0x641   :  { %v786_v44 = vadd.f32 %v781_v40, %v3348_v20  ;;  %v2607_v45 = vpop.f32.mrb[15].mxu0  ;;  %v788_v46 = vadd.f32 %v782_v41, %v3354_v30  ;;  %v2477_v57 = vmul.f32 -1.442695, %v787_v47 }
 0x643   :  { %2736 = vtanh.f32 %v786_v44  ;;  %v2476_v55 = vmul.f32 -1.442695, %v786_v44  ;;  %v2478_v56 = vmul.f32 -1.442695, %v788_v46 }
 0x644   :  { %2738 = vtanh.f32 %v788_v46 }
 0x645   :  { %2740 = vtanh.f32 %v787_v47 }
 0x646   :  { %2742 = vpow2.f32 %v2476_v55 }
 0x647   :  { %2744 = vpow2.f32 %v2478_v56 }
 0x648   :  { %2746 = vpow2.f32 %v2477_v57 }
 0x64d   :  { %v2737_v48 = vpop.eup %2736 }
 0x64e   :  { %828 = vrot.lane.b32.xlu0 %v2737_v48, %s3054_s30  ;;  %v2739_v50 = vpop.eup %2738 }
 0x64f   :  { %v2741_v52 = vpop.eup %2740  ;;  %832 = vrot.lane.b32.xlu1 %v2739_v50, %s3054_s30 }
 0x650   :  { %v2743_v58 = vpop.eup %2742 }
 0x651   :  { %v2745_v59 = vpop.eup %2744  ;;  %v798_v60 = vadd.f32 1.0, %v2743_v58 }
 0x652   :  { %830 = vrot.lane.b32.xlu0 %v2741_v52, %s3054_s30  ;;  %v2747_v61 = vpop.eup %2746  ;;  %v800_v62 = vadd.f32 1.0, %v2745_v59 }
 0x653   :  { %813 = vrot.lane.b32.xlu1 %v811_v53, %s3062_s12  ;;  %v799_v0 = vadd.f32 1.0, %v2747_v61  ;;  %2748 = vrcp.f32 %v798_v60 }
 0x654   :  { %2750 = vrcp.f32 %v800_v62 }
 0x655   :  { %2752 = vrcp.f32 %v799_v0 }
 0x656   :  { %817 = vrot.lane.b32.xlu0 %v812_v54, %s3062_s12 }
 0x657   :  { %815 = vrot.lane.b32.xlu1 %v3405_v51, %s3062_s12 }
 0x65d   :  { %v2749_v1 = vpop.eup %2748 }
 0x65e   :  { %v2751_v4 = vpop.eup %2750 }
 0x65f   :  { %v2753_v6 = vpop.eup %2752 }
 0x6c0   :  { %v829_v2 = vpop.permute.xlu0 %828 }
 0x6c1   :  { %v837_v3 = vmul.f32 %v2749_v1, %v829_v2  ;;  %v833_v5 = vpop.permute.xlu1 %832 }
 0x6c2   :  { %v839_v7 = vmul.f32 %v2751_v4, %v833_v5 }
 0x6c3   :  { %843 = vrot.lane.b32.xlu0 %v837_v3, %s3062_s12 }
 0x6c4   :  { %v831_v8 = vpop.permute.xlu0 %830  ;;  %847 = vrot.lane.b32.xlu1 %v839_v7, %s3062_s12 }
 0x6c5   :  { %v838_v9 = vmul.f32 %v2753_v6, %v831_v8  ;;  %v814_v14 = vpop.permute.xlu1 %813 }
 0x6c6   :  { %v822_v16 = vmul.f32 %v2749_v1, %v814_v14 }
 0x6c7   :  { %845 = vrot.lane.b32.xlu0 %v838_v9, %s3062_s12 }
 0x6c8   :  { %v818_v15 = vpop.permute.xlu0 %817 }
 0x6c9   :  { %v816_v17 = vpop.permute.xlu1 %815  ;;  %v824_v21 = vmul.f32 %v2751_v4, %v818_v15 }
 0x6ca   :  { %v823_v22 = vmul.f32 %v2753_v6, %v816_v17 }
 0x735   :  { %v844_v18 = vpop.permute.xlu0 %843 }
 0x736   :  { %v852_v19 = vadd.f32 %v844_v18, %v822_v16  ;;  %v848_v23 = vpop.permute.xlu1 %847 }
 0x737   :  { %v854_v24 = vadd.f32 %v848_v23, %v824_v21 }
 0x738   :  { %2754 = vtanh.f32 %v852_v19  ;;  %v893_v27 = vrot.slane %v852_v19, 1 }
 0x739   :  { %v846_v26 = vpop.permute.xlu0 %845  ;;  %2756 = vtanh.f32 %v854_v24  ;;  %v895_v31 = vrot.slane %v854_v24, 7 }
 0x73a   :  { %v853_v29 = vadd.f32 %v846_v26, %v823_v22 }
 0x73c   :  { %2758 = vtanh.f32 %v853_v29  ;;  %v894_v33 = vsel %vm685_vm12, %v853_v29, %v893_v27 }
 0x73d   :  { %v896_v34 = vsel %vm688_vm13, %v895_v31, %v894_v33 }
 0x742   :  { %v2755_v35 = vpop.eup %2754 }
 0x743   :  { %861 = vrot.lane.b32.xlu1 %v2755_v35, %s3054_s30  ;;  %v2757_v36 = vpop.eup %2756 }
 0x744   :  { %865 = vrot.lane.b32.xlu0 %v2757_v36, %s3054_s30 }
 0x746   :  { %v2759_v37 = vpop.eup %2758 }
 0x747   :  { %863 = vrot.lane.b32.xlu1 %v2759_v37, %s3054_s30 }
 0x748   :  { %876 = vperm.xlu0 %2692, %v874_v38  }
 0x7b5   :  { %v862_v39 = vpop.permute.xlu1 %861 }
 0x7b6   :  { %v870_v40 = vmul.f32 %v2749_v1, %v862_v39  ;;  %v866_v41 = vpop.permute.xlu0 %865 }
 0x7b7   :  { %v872_v42 = vmul.f32 %v2751_v4, %v866_v41 }
 0x7b8   :  { %v882_v44 = vrot.slane %v870_v40, 1 }
 0x7b9   :  { %v864_v43 = vpop.permute.xlu1 %863  ;;  %v884_v46 = vrot.slane %v872_v42, 7 }
 0x7ba   :  { %v871_v45 = vmul.f32 %v2753_v6, %v864_v43 }
 0x7bc   :  { %v883_v47 = vsel %vm685_vm12, %v871_v45, %v882_v44 }
 0x7bd   :  { %v885_v48 = vsel %vm688_vm13, %v884_v46, %v883_v47 }
 0x7be   :  { %886 = vrot.lane.b32.xlu1 %v885_v48, %s3062_s12 }
 0x7c2   :  { %897 = vrot.lane.b32.xlu1 %v896_v34, %s3063_s5 }
 0x7c7   :  { %v877_v49 = vpop.permute.xlu0 %876 }
 0x7c8   :  { %vm878_vm1 = vcmp.eq.s32.totalorder %v877_v49, 1 }
 0x830   :  { %v887_v50 = vpop.permute.xlu1 %886 }
 0x831   :  { %v3431_v52 = vsel %vm878_vm1, %v887_v50, %v3382_v32  ;;  %v901_v53 = vsel %vm878_vm1, %v887_v50, 0.0 }
 0x832   :  { %v909_v54 = vrot.slane %v901_v53, %v3379_v28  ;;  %v932_v55 = vpack.c.bf16 %v3431_v52, %v3431_v52 }
 0x834   :  { %v910_v56 = vcombine.high %v909_v54, %v909_v54  ;;  %v917_v57 = vrot.slane %v909_v54, %v3379_v28  ;;  %2613 = vmatmul.mubr.msk.bf16.vlgmr.msra.gmra.mrb[16].mxu0 %vm390_vm7, %v932_v55  ;;  %v898_v6 = vpop.permute.xlu1 %897  ;;  %v1070_v54 = vsel %vm1069_vm3, 1, %v3060_v13  ;;  %vm2128_vm3 = vcmask 256000  }
 0x835   :  { %2625 = vmatpush3.bf16.msra.mxu0 %v3305_v11  ;;  %2628 = vmatprep.mubr.msk.bf16.mxu0 %vm3061_vm6, %v3059_v10  ;;  %v3455_v8 = vsel %vm878_vm1, %v898_v6, %v3405_v51 }
 0x836   :  { %v924_v32 = vrot.slane %v910_v56, %v3379_v28  ;;  %v925_v58 = vcombine.high %v917_v57, %v917_v57  ;;  %929 = vst.msk [vmem:[#allocation2 + $0x1] sm:$0x1] %vm732_vm15, %v917_v57  ;;  %2626 = vmatprep.subr.bf16.mxu0 %v3059_v10  ;;  %v1007_v14 = vrot.slane %v3455_v8, 6  ;;  %v1008_v15 = vrot.slane %v3455_v8, 7 }
 0x838   :  { %930 = vst.msk [vmem:[#allocation2 + $0x9] sm:$0x1] %vm732_vm15, %v924_v32  ;;  %931 = vst.msk [vmem:[#allocation2 + $0x11] sm:$0x1] %vm732_vm15, %v925_v58 }
 0x839   :  { %2627 = vmatpush3.bf16.msra.mxu0 %v3310_v12 }
 0x83a   :  { %2640 = vmatprep.subr.bf16.mxu0 %v3059_v10 }
 0x907   :  { %v970_v59 = vpop.f32.mrb[16].mxu0 }
 0x908   :  { %v977_v60 = vrot.slane %v970_v59, 6  ;;  %v978_v61 = vrot.slane %v970_v59, 7  ;;  %v2614_v62 = vpop.f32.mrb[17].mxu0  ;;  %v984_v4 = vadd.f32 %v970_v59, %v3354_v30 }
 0x909   :  { %v973_v0 = vpop.f32.mrb[18].mxu0 }
 0x90a   :  { %v982_v1 = vadd.f32 %v977_v60, %v3348_v20  ;;  %v2615_v2 = vpop.f32.mrb[19].mxu0  ;;  %v983_v3 = vadd.f32 %v978_v61, %v3351_v25  ;;  %v2482_v18 = vmul.f32 -1.442695, %v984_v4 }
 0x90c   :  { %2760 = vtanh.f32 %v982_v1  ;;  %v2480_v16 = vmul.f32 -1.442695, %v982_v1  ;;  %v2481_v17 = vmul.f32 -1.442695, %v983_v3 }
 0x90d   :  { %2762 = vtanh.f32 %v983_v3 }
 0x90e   :  { %2764 = vtanh.f32 %v984_v4 }
 0x90f   :  { %2766 = vpow2.f32 %v2480_v16 }
 0x910   :  { %2768 = vpow2.f32 %v2481_v17 }
 0x911   :  { %2770 = vpow2.f32 %v2482_v18 }
 0x916   :  { %v2761_v5 = vpop.eup %2760 }
 0x917   :  { %1024 = vrot.lane.b32.xlu0 %v2761_v5, %s3054_s30  ;;  %v2763_v7 = vpop.eup %2762 }
 0x918   :  { %v2765_v9 = vpop.eup %2764  ;;  %1026 = vrot.lane.b32.xlu1 %v2763_v7, %s3054_s30 }
 0x919   :  { %v2767_v51 = vpop.eup %2766 }
 0x91a   :  { %v2769_v19 = vpop.eup %2768  ;;  %v994_v21 = vadd.f32 1.0, %v2767_v51 }
 0x91b   :  { %1028 = vrot.lane.b32.xlu0 %v2765_v9, %s3054_s30  ;;  %v2771_v22 = vpop.eup %2770  ;;  %v995_v23 = vadd.f32 1.0, %v2769_v19 }
 0x91c   :  { %1009 = vrot.lane.b32.xlu1 %v1007_v14, %s3062_s12  ;;  %2772 = vrcp.f32 %v994_v21  ;;  %v996_v24 = vadd.f32 1.0, %v2771_v22 }
 0x91d   :  { %2774 = vrcp.f32 %v995_v23 }
 0x91e   :  { %2776 = vrcp.f32 %v996_v24 }
 0x91f   :  { %1011 = vrot.lane.b32.xlu0 %v1008_v15, %s3062_s12 }
 0x926   :  { %v2773_v26 = vpop.eup %2772 }
 0x927   :  { %v2775_v31 = vpop.eup %2774 }
 0x928   :  { %v2777_v36 = vpop.eup %2776 }
 0x989   :  { %v1025_v27 = vpop.permute.xlu0 %1024 }
 0x98a   :  { %v1033_v29 = vmul.f32 %v2773_v26, %v1025_v27  ;;  %v1027_v33 = vpop.permute.xlu1 %1026 }
 0x98b   :  { %v1034_v34 = vmul.f32 %v2775_v31, %v1027_v33 }
 0x98c   :  { %1039 = vrot.lane.b32.xlu1 %v1033_v29, %s3062_s12 }
 0x98d   :  { %v1029_v35 = vpop.permute.xlu0 %1028  ;;  %1041 = vrot.lane.b32.xlu0 %v1034_v34, %s3062_s12 }
 0x98e   :  { %v1035_v37 = vmul.f32 %v2777_v36, %v1029_v35  ;;  %v1010_v38 = vpop.permute.xlu1 %1009 }
 0x98f   :  { %v1018_v39 = vmul.f32 %v2773_v26, %v1010_v38 }
 0x990   :  { %1013 = vrot.lane.b32.xlu1 %v3455_v8, %s3062_s12 }
 0x991   :  { %1043 = vrot.lane.b32.xlu0 %v1035_v37, %s3062_s12  ;;  %v1012_v40 = vpop.permute.xlu0 %1011 }
 0x992   :  { %v1019_v43 = vmul.f32 %v2775_v31, %v1012_v40 }
 0x9fe   :  { %v1040_v41 = vpop.permute.xlu1 %1039 }
 0x9ff   :  { %v1048_v42 = vadd.f32 %v1040_v41, %v1018_v39  ;;  %v1042_v44 = vpop.permute.xlu0 %1041 }
 0xa00   :  { %v1049_v45 = vadd.f32 %v1042_v44, %v1019_v43 }
 0xa01   :  { %2778 = vtanh.f32 %v1048_v42  ;;  %v1089_v56 = vrot.slane %v1048_v42, 2 }
 0xa02   :  { %v1014_v46 = vpop.permute.xlu1 %1013  ;;  %2780 = vtanh.f32 %v1049_v45  ;;  %v1090_v55 = vrot.slane %v1049_v45, 1 }
 0xa03   :  { %v1020_v47 = vmul.f32 %v2777_v36, %v1014_v46  ;;  %v1044_v48 = vpop.permute.xlu0 %1043 }
 0xa04   :  { %v1091_v32 = vsel %vm685_vm12, %v1090_v55, %v1089_v56 }
 0xa05   :  { %v1050_v49 = vadd.f32 %v1044_v48, %v1020_v47 }
 0xa07   :  { %2782 = vtanh.f32 %v1050_v49  ;;  %v1092_v58 = vsel %vm688_vm13, %v1050_v49, %v1091_v32 }
 0xa0b   :  { %v2779_v50 = vpop.eup %2778 }
 0xa0c   :  { %1057 = vrot.lane.b32.xlu1 %v2779_v50, %s3054_s30  ;;  %v2781_v53 = vpop.eup %2780 }
 0xa0d   :  { %1059 = vrot.lane.b32.xlu0 %v2781_v53, %s3054_s30 }
 0xa11   :  { %v2783_v57 = vpop.eup %2782  ;;  %1072 = vperm.xlu0 %2692, %v1070_v54  }
 0xa12   :  { %1061 = vrot.lane.b32.xlu1 %v2783_v57, %s3054_s30 }
 0xa15   :  { %1093 = vrot.lane.b32.xlu0 %v1092_v58, %s3063_s5 }
 0xa7e   :  { %v1058_v59 = vpop.permute.xlu1 %1057 }
 0xa7f   :  { %v1066_v60 = vmul.f32 %v2773_v26, %v1058_v59  ;;  %v1060_v61 = vpop.permute.xlu0 %1059 }
 0xa80   :  { %v1067_v62 = vmul.f32 %v2775_v31, %v1060_v61 }
 0xa81   :  { %v1078_v0 = vrot.slane %v1066_v60, 2 }
 0xa82   :  { %v1079_v1 = vrot.slane %v1067_v62, 1 }
 0xa84   :  { %v1062_v2 = vpop.permute.xlu1 %1061  ;;  %v1080_v4 = vsel %vm685_vm12, %v1079_v1, %v1078_v0 }
 0xa85   :  { %v1068_v3 = vmul.f32 %v2777_v36, %v1062_v2 }
 0xa87   :  { %v1081_v5 = vsel %vm688_vm13, %v1068_v3, %v1080_v4 }
 0xa88   :  { %1082 = vrot.lane.b32.xlu1 %v1081_v5, %s3062_s12 }
 0xa90   :  { %v1073_v6 = vpop.permute.xlu0 %1072 }
 0xa91   :  { %vm1074_vm4 = vcmp.eq.s32.totalorder %v1073_v6, 1 }
 0xa94   :  { %v1094_v33 = vpop.permute.xlu0 %1093 }
 0xa95   :  { %v3504_v35 = vsel %vm1074_vm4, %v1094_v33, %v3455_v8 }
 0xa96   :  { %v1204_v36 = vrot.slane %v3504_v35, 5  ;;  %v1206_v38 = vrot.slane %v3504_v35, 7  ;;  %v1205_v39 = vrot.slane %v3504_v35, 6 }
 0xafa   :  { %v1083_v7 = vpop.permute.xlu1 %1082 }
 0xafb   :  { %v3481_v9 = vsel %vm1074_vm4, %v1083_v7, %v3431_v52  ;;  %v1097_v14 = vsel %vm1074_vm4, %v1083_v7, 0.0 }
 0xafc   :  { %v1105_v15 = vrot.slane %v1097_v14, %v3379_v28  ;;  %v1128_v16 = vpack.c.bf16 %v3481_v9, %v3481_v9 }
 0xafe   :  { %v1106_v17 = vcombine.high %v1105_v15, %v1105_v15  ;;  %v1113_v18 = vrot.slane %v1105_v15, %v3379_v28  ;;  %2621 = vmatmul.mubr.msk.bf16.vlgmr.msra.gmra.mrb[4].mxu1 %vm390_vm7, %v1128_v16  ;;  %v1268_v15 = vsel %vm1267_vm5, 1, %v3060_v13 }
 0xaff   :  { %2633 = vmatpush3.bf16.msra.mxu1 %v3305_v11  ;;  %2636 = vmatprep.mubr.msk.bf16.mxu1 %vm3061_vm6, %v3059_v10 }
 0xb00   :  { %v1120_v52 = vrot.slane %v1106_v17, %v3379_v28  ;;  %v1121_v51 = vcombine.high %v1113_v18, %v1113_v18  ;;  %1125 = vst.msk [vmem:[#allocation2 + $0x2] sm:$0x1] %vm732_vm15, %v1113_v18  ;;  %2634 = vmatprep.subr.bf16.mxu1 %v3059_v10 }
 0xb02   :  { %1126 = vst.msk [vmem:[#allocation2 + $0xa] sm:$0x1] %vm732_vm15, %v1120_v52  ;;  %1127 = vst.msk [vmem:[#allocation2 + $0x12] sm:$0x1] %vm732_vm15, %v1121_v51 }
 0xb03   :  { %2635 = vmatpush3.bf16.msra.mxu1 %v3310_v12 }
 0xb04   :  { %2648 = vmatprep.subr.bf16.mxu1 %v3059_v10 }
 0xbd1   :  { %v1166_v19 = vpop.f32.mrb[4].mxu1 }
 0xbd2   :  { %v1173_v11 = vrot.slane %v1166_v19, 5  ;;  %v1174_v21 = vrot.slane %v1166_v19, 6  ;;  %v2622_v22 = vpop.f32.mrb[5].mxu1  ;;  %v1175_v23 = vrot.slane %v1166_v19, 7 }
 0xbd3   :  { %v1169_v24 = vpop.f32.mrb[6].mxu1 }
 0xbd4   :  { %v1179_v26 = vadd.f32 %v1173_v11, %v3348_v20  ;;  %v1180_v27 = vadd.f32 %v1174_v21, %v3351_v25  ;;  %v2623_v29 = vpop.f32.mrb[7].mxu1  ;;  %v1181_v31 = vadd.f32 %v1175_v23, %v3354_v30 }
 0xbd6   :  { %2784 = vtanh.f32 %v1179_v26  ;;  %v2484_v8 = vmul.f32 -1.442695, %v1179_v26  ;;  %v2485_v40 = vmul.f32 -1.442695, %v1180_v27  ;;  %v2486_v41 = vmul.f32 -1.442695, %v1181_v31 }
 0xbd7   :  { %2786 = vtanh.f32 %v1180_v27 }
 0xbd8   :  { %2788 = vtanh.f32 %v1181_v31 }
 0xbd9   :  { %2790 = vpow2.f32 %v2484_v8 }
 0xbda   :  { %2792 = vpow2.f32 %v2485_v40 }
 0xbdb   :  { %2794 = vpow2.f32 %v2486_v41 }
 0xbe0   :  { %v2785_v12 = vpop.eup %2784 }
 0xbe1   :  { %v2787_v34 = vpop.eup %2786  ;;  %1222 = vrot.lane.b32.xlu1 %v2785_v12, %s3054_s30 }
 0xbe2   :  { %1224 = vrot.lane.b32.xlu0 %v2787_v34, %s3054_s30  ;;  %v2789_v37 = vpop.eup %2788 }
 0xbe3   :  { %v2791_v42 = vpop.eup %2790 }
 0xbe4   :  { %v2793_v43 = vpop.eup %2792  ;;  %v1191_v44 = vadd.f32 1.0, %v2791_v42  ;;  %v3539_v42 = vld [vmem:[#allocation8] sm:$0xff]  }
 0xbe5   :  { %1226 = vrot.lane.b32.xlu1 %v2789_v37, %s3054_s30  ;;  %v1192_v45 = vadd.f32 1.0, %v2793_v43  ;;  %v2795_v46 = vpop.eup %2794 }
 0xbe6   :  { %1207 = vrot.lane.b32.xlu0 %v1204_v36, %s3062_s12  ;;  %2796 = vrcp.f32 %v1191_v44  ;;  %v1193_v47 = vadd.f32 1.0, %v2795_v46  ;;  %v3549_v44 = vld [vmem:[#allocation8 + $0x8] sm:$0xff]  }
 0xbe7   :  { %2798 = vrcp.f32 %v1192_v45 }
 0xbe8   :  { %2800 = vrcp.f32 %v1193_v47 }
 0xbe9   :  { %1209 = vrot.lane.b32.xlu1 %v1205_v39, %s3062_s12 }
 0xbea   :  { %1211 = vrot.lane.b32.xlu0 %v1206_v38, %s3062_s12 }
 0xbf0   :  { %v2797_v48 = vpop.eup %2796 }
 0xbf1   :  { %v2799_v50 = vpop.eup %2798 }
 0xbf2   :  { %v2801_v56 = vpop.eup %2800 }
 0xc53   :  { %v1223_v49 = vpop.permute.xlu1 %1222 }
 0xc54   :  { %v1225_v53 = vpop.permute.xlu0 %1224  ;;  %v1231_v54 = vmul.f32 %v2797_v48, %v1223_v49 }
 0xc55   :  { %v1232_v55 = vmul.f32 %v2799_v50, %v1225_v53 }
 0xc56   :  { %1237 = vrot.lane.b32.xlu1 %v1231_v54, %s3062_s12 }
 0xc57   :  { %1239 = vrot.lane.b32.xlu0 %v1232_v55, %s3062_s12  ;;  %v1227_v57 = vpop.permute.xlu1 %1226 }
 0xc58   :  { %v1233_v32 = vmul.f32 %v2801_v56, %v1227_v57  ;;  %v1208_v58 = vpop.permute.xlu0 %1207 }
 0xc59   :  { %v1216_v61 = vmul.f32 %v2797_v48, %v1208_v58 }
 0xc5a   :  { %1241 = vrot.lane.b32.xlu1 %v1233_v32, %s3062_s12 }
 0xc5b   :  { %v1210_v59 = vpop.permute.xlu1 %1209 }
 0xc5c   :  { %v1212_v60 = vpop.permute.xlu0 %1211  ;;  %v1217_v62 = vmul.f32 %v2799_v50, %v1210_v59 }
 0xc5d   :  { %v1218_v4 = vmul.f32 %v2801_v56, %v1212_v60 }
 0xcc8   :  { %v1238_v0 = vpop.permute.xlu1 %1237 }
 0xcc9   :  { %v1240_v1 = vpop.permute.xlu0 %1239  ;;  %v1246_v2 = vadd.f32 %v1238_v0, %v1216_v61 }
 0xcca   :  { %v1247_v3 = vadd.f32 %v1240_v1, %v1217_v62 }
 0xccb   :  { %2802 = vtanh.f32 %v1246_v2  ;;  %v1288_v17 = vrot.slane %v1246_v2, 3 }
 0xccc   :  { %2804 = vtanh.f32 %v1247_v3  ;;  %v1242_v5 = vpop.permute.xlu1 %1241  ;;  %v1289_v16 = vrot.slane %v1247_v3, 2 }
 0xccd   :  { %v1248_v6 = vadd.f32 %v1242_v5, %v1218_v4 }
 0xcce   :  { %v1290_v51 = vsel %vm685_vm12, %v1289_v16, %v1288_v17 }
 0xccf   :  { %2806 = vtanh.f32 %v1248_v6  ;;  %v1291_v52 = vrot.slane %v1248_v6, 1 }
 0xcd1   :  { %v1292_v19 = vsel %vm688_vm13, %v1291_v52, %v1290_v51 }
 0xcd5   :  { %v2803_v7 = vpop.eup %2802 }
 0xcd6   :  { %v2805_v14 = vpop.eup %2804  ;;  %1255 = vrot.lane.b32.xlu0 %v2803_v7, %s3054_s30 }
 0xcd7   :  { %1257 = vrot.lane.b32.xlu1 %v2805_v14, %s3054_s30 }
 0xcd9   :  { %v2807_v18 = vpop.eup %2806 }
 0xcda   :  { %1259 = vrot.lane.b32.xlu0 %v2807_v18, %s3054_s30 }
 0xcdb   :  { %1270 = vperm.xlu1 %2691, %v1268_v15  }
 0xcdf   :  { %1293 = vrot.lane.b32.xlu1 %v1292_v19, %s3063_s5 }
 0xd48   :  { %v1256_v11 = vpop.permute.xlu0 %1255 }
 0xd49   :  { %v1258_v21 = vpop.permute.xlu1 %1257  ;;  %v1264_v22 = vmul.f32 %v2797_v48, %v1256_v11 }
 0xd4a   :  { %v1265_v23 = vmul.f32 %v2799_v50, %v1258_v21 }
 0xd4b   :  { %v1276_v26 = vrot.slane %v1264_v22, 3 }
 0xd4c   :  { %v1277_v24 = vrot.slane %v1265_v23, 2  ;;  %v1260_v27 = vpop.permute.xlu0 %1259 }
 0xd4d   :  { %v1266_v29 = vmul.f32 %v2801_v56, %v1260_v27 }
 0xd4e   :  { %v1278_v33 = vsel %vm685_vm12, %v1277_v24, %v1276_v26 }
 0xd4f   :  { %v1279_v31 = vrot.slane %v1266_v29, 1 }
 0xd51   :  { %v1280_v12 = vsel %vm688_vm13, %v1279_v31, %v1278_v33 }
 0xd52   :  { %1281 = vrot.lane.b32.xlu0 %v1280_v12, %s3062_s12 }
 0xd5a   :  { %v1271_v34 = vpop.permute.xlu1 %1270 }
 0xd5b   :  { %vm1272_vm8 = vcmp.eq.s32.totalorder %v1271_v34, 1 }
 0xd5e   :  { %v1294_v57 = vpop.permute.xlu1 %1293 }
 0xd5f   :  { %v3557_v59 = vsel %vm1272_vm8, %v1294_v57, %v3504_v35 }
 0xd60   :  { %v1404_v60 = vrot.slane %v3557_v59, 4  ;;  %v1406_v62 = vrot.slane %v3557_v59, 6  ;;  %v1405_v0 = vrot.slane %v3557_v59, 5 }
 0xdc4   :  { %v1282_v36 = vpop.permute.xlu0 %1281 }
 0xdc5   :  { %v3531_v37 = vsel %vm1272_vm8, %v1282_v36, %v3481_v9  ;;  %v1297_v38 = vsel %vm1272_vm8, %v1282_v36, 0.0 }
 0xdc6   :  { %v1305_v39 = vrot.slane %v1297_v38, %v3379_v28  ;;  %v1328_v8 = vpack.c.bf16 %v3531_v37, %v3531_v37 }
 0xdc8   :  { %v1306_v40 = vcombine.high %v1305_v39, %v1305_v39  ;;  %v1313_v41 = vrot.slane %v1305_v39, %v3379_v28  ;;  %2629 = vmatmul.mubr.msk.bf16.vlgmr.msra.gmra.mrb[20].mxu0 %vm390_vm7, %v1328_v8 }
 0xdc9   :  { %2641 = vmatpush3.bf16.msra.mxu0 %v3539_v42  ;;  %2644 = vmatprep.mubr.msk.bf16.mxu0 %vm3061_vm6, %v3059_v10 }
 0xdca   :  { %v1320_v9 = vrot.slane %v1306_v40, %v3379_v28  ;;  %v1321_v43 = vcombine.high %v1313_v41, %v1313_v41  ;;  %1325 = vst.msk [vmem:[#allocation2 + $0x3] sm:$0x1] %vm732_vm15, %v1313_v41  ;;  %2642 = vmatprep.subr.bf16.mxu0 %v3059_v10  ;;  %v1468_v40 = vsel %vm1467_vm9, 1, %v3060_v13 }
 0xdcc   :  { %1326 = vst.msk [vmem:[#allocation2 + $0xb] sm:$0x1] %vm732_vm15, %v1320_v9  ;;  %1327 = vst.msk [vmem:[#allocation2 + $0x13] sm:$0x1] %vm732_vm15, %v1321_v43 }
 0xdcd   :  { %2643 = vmatpush3.bf16.msra.mxu0 %v3549_v44 }
 0xe9b   :  { %v1366_v45 = vpop.f32.mrb[20].mxu0 }
 0xe9c   :  { %v1373_v46 = vrot.slane %v1366_v45, 4  ;;  %v1374_v47 = vrot.slane %v1366_v45, 5  ;;  %v2630_v48 = vpop.f32.mrb[21].mxu0  ;;  %v1375_v49 = vrot.slane %v1366_v45, 6 }
 0xe9d   :  { %v1369_v50 = vpop.f32.mrb[22].mxu0 }
 0xe9e   :  { %v1379_v53 = vadd.f32 %v1373_v46, %v3348_v20  ;;  %v1380_v54 = vadd.f32 %v1374_v47, %v3351_v25  ;;  %v2631_v55 = vpop.f32.mrb[23].mxu0  ;;  %v1381_v56 = vadd.f32 %v1375_v49, %v3354_v30 }
 0xea0   :  { %2808 = vtanh.f32 %v1379_v53  ;;  %v2488_v35 = vmul.f32 -1.442695, %v1379_v53  ;;  %v2489_v1 = vmul.f32 -1.442695, %v1380_v54  ;;  %v2490_v2 = vmul.f32 -1.442695, %v1381_v56 }
 0xea1   :  { %2810 = vtanh.f32 %v1380_v54 }
 0xea2   :  { %2812 = vtanh.f32 %v1381_v56 }
 0xea3   :  { %2814 = vpow2.f32 %v2488_v35 }
 0xea4   :  { %2816 = vpow2.f32 %v2489_v1 }
 0xea5   :  { %2818 = vpow2.f32 %v2490_v2 }
 0xeaa   :  { %v2809_v32 = vpop.eup %2808 }
 0xeab   :  { %v2811_v58 = vpop.eup %2810  ;;  %1422 = vrot.lane.b32.xlu0 %v2809_v32, %s3054_s30 }
 0xeac   :  { %1424 = vrot.lane.b32.xlu1 %v2811_v58, %s3054_s30  ;;  %v2813_v61 = vpop.eup %2812 }
 0xead   :  { %v2815_v3 = vpop.eup %2814 }
 0xeae   :  { %v2817_v4 = vpop.eup %2816  ;;  %v1391_v5 = vadd.f32 1.0, %v2815_v3 }
 0xeaf   :  { %1426 = vrot.lane.b32.xlu0 %v2813_v61, %s3054_s30  ;;  %v1392_v6 = vadd.f32 1.0, %v2817_v4  ;;  %v2819_v7 = vpop.eup %2818 }
 0xeb0   :  { %1407 = vrot.lane.b32.xlu1 %v1404_v60, %s3062_s12  ;;  %2820 = vrcp.f32 %v1391_v5  ;;  %v1393_v14 = vadd.f32 1.0, %v2819_v7 }
 0xeb1   :  { %2822 = vrcp.f32 %v1392_v6 }
 0xeb2   :  { %2824 = vrcp.f32 %v1393_v14 }
 0xeb3   :  { %1409 = vrot.lane.b32.xlu0 %v1405_v0, %s3062_s12 }
 0xeb4   :  { %1411 = vrot.lane.b32.xlu1 %v1406_v62, %s3062_s12 }
 0xeba   :  { %v2821_v15 = vpop.eup %2820 }
 0xebb   :  { %v2823_v17 = vpop.eup %2822 }
 0xebc   :  { %v2825_v19 = vpop.eup %2824 }
 0xf1d   :  { %v1423_v16 = vpop.permute.xlu0 %1422 }
 0xf1e   :  { %v1425_v18 = vpop.permute.xlu1 %1424  ;;  %v1431_v52 = vmul.f32 %v2821_v15, %v1423_v16 }
 0xf1f   :  { %v1432_v51 = vmul.f32 %v2823_v17, %v1425_v18 }
 0xf20   :  { %1437 = vrot.lane.b32.xlu0 %v1431_v52, %s3062_s12 }
 0xf21   :  { %1439 = vrot.lane.b32.xlu1 %v1432_v51, %s3062_s12  ;;  %v1427_v11 = vpop.permute.xlu0 %1426 }
 0xf22   :  { %v1433_v21 = vmul.f32 %v2825_v19, %v1427_v11  ;;  %v1408_v22 = vpop.permute.xlu1 %1407 }
 0xf23   :  { %v1416_v26 = vmul.f32 %v2821_v15, %v1408_v22 }
 0xf24   :  { %1441 = vrot.lane.b32.xlu0 %v1433_v21, %s3062_s12 }
 0xf25   :  { %v1410_v23 = vpop.permute.xlu0 %1409 }
 0xf26   :  { %v1412_v24 = vpop.permute.xlu1 %1411  ;;  %v1417_v27 = vmul.f32 %v2823_v17, %v1410_v23 }
 0xf27   :  { %v1418_v34 = vmul.f32 %v2825_v19, %v1412_v24 }
 0xf92   :  { %v1438_v29 = vpop.permute.xlu0 %1437 }
 0xf93   :  { %v1440_v31 = vpop.permute.xlu1 %1439  ;;  %v1446_v33 = vadd.f32 %v1438_v29, %v1416_v26 }
 0xf94   :  { %v1447_v12 = vadd.f32 %v1440_v31, %v1417_v27 }
 0xf95   :  { %2826 = vtanh.f32 %v1446_v33  ;;  %v1488_v9 = vrot.slane %v1446_v33, 4 }
 0xf96   :  { %2828 = vtanh.f32 %v1447_v12  ;;  %v1442_v36 = vpop.permute.xlu0 %1441  ;;  %v1489_v41 = vrot.slane %v1447_v12, 3 }
 0xf97   :  { %v1448_v38 = vadd.f32 %v1442_v36, %v1418_v34 }
 0xf98   :  { %v1490_v46 = vsel %vm685_vm12, %v1489_v41, %v1488_v9 }
 0xf99   :  { %2830 = vtanh.f32 %v1448_v38  ;;  %v1491_v45 = vrot.slane %v1448_v38, 2 }
 0xf9b   :  { %v1492_v47 = vsel %vm688_vm13, %v1491_v45, %v1490_v46 }
 0xf9f   :  { %v2827_v39 = vpop.eup %2826 }
 0xfa0   :  { %v2829_v8 = vpop.eup %2828  ;;  %1455 = vrot.lane.b32.xlu1 %v2827_v39, %s3054_s30 }
 0xfa1   :  { %1457 = vrot.lane.b32.xlu0 %v2829_v8, %s3054_s30 }
 0xfa3   :  { %v2831_v43 = vpop.eup %2830 }
 0xfa4   :  { %1459 = vrot.lane.b32.xlu1 %v2831_v43, %s3054_s30 }
 0xfa5   :  { %1470 = vperm.xlu0 %2692, %v1468_v40  }
 0xfa9   :  { %1493 = vrot.lane.b32.xlu0 %v1492_v47, %s3063_s5 }
0x1012   :  { %v1456_v63 = vpop.permute.xlu1 %1455 }
0x1013   :  { %v1458_v48 = vpop.permute.xlu0 %1457  ;;  %v1464_v49 = vmul.f32 %v2821_v15, %v1456_v63 }
0x1014   :  { %v1465_v50 = vmul.f32 %v2823_v17, %v1458_v48 }
0x1015   :  { %v1476_v54 = vrot.slane %v1464_v49, 4 }
0x1016   :  { %v1477_v53 = vrot.slane %v1465_v50, 3  ;;  %v1460_v55 = vpop.permute.xlu1 %1459 }
0x1017   :  { %v1466_v56 = vmul.f32 %v2825_v19, %v1460_v55 }
0x1018   :  { %v1478_v32 = vsel %vm685_vm12, %v1477_v53, %v1476_v54 }
0x1019   :  { %v1479_v57 = vrot.slane %v1466_v56, 2 }
0x101b   :  { %v1480_v58 = vsel %vm688_vm13, %v1479_v57, %v1478_v32 }
0x101c   :  { %1481 = vrot.lane.b32.xlu1 %v1480_v58, %s3062_s12 }
0x1024   :  { %v1471_v60 = vpop.permute.xlu0 %1470 }
0x1025   :  { %vm1472_vm10 = vcmp.eq.s32.totalorder %v1471_v60, 1  ;;  %v3623_v60 = vld [vmem:[%s3836_s4] sm:$0x7] }
0x1026   :  { %vm1867_vm14 = vcmp.gt.s32.totalorder %v3623_v60, 6  ;;  %vm2067_vm1 = vcmp.gt.s32.totalorder %v3623_v60, 7 }
0x1028   :  { %v1494_v52 = vpop.permute.xlu0 %1493 }
0x108e   :  { %v1482_v61 = vpop.permute.xlu1 %1481 }
0x108f   :  { %v3584_v62 = vsel %vm1472_vm10, %v1482_v61, %v3531_v37  ;;  %v1497_v0 = vsel %vm1472_vm10, %v1482_v61, 0.0 }
0x1090   :  { %v1505_v35 = vrot.slane %v1497_v0, %v3379_v28  ;;  %v1528_v1 = vpack.c.bf16 %v3584_v62, %v3584_v62 }
0x1092   :  { %v1506_v2 = vcombine.high %v1505_v35, %v1505_v35  ;;  %v1513_v3 = vrot.slane %v1505_v35, %v3379_v28  ;;  %2637 = vmatmul.mubr.msk.bf16.vlgmr.msra.gmra.mrb[8].mxu1 %vm390_vm7, %v1528_v1 }
0x1093   :  { %2649 = vmatpush3.bf16.msra.mxu1 %v3539_v42  ;;  %2652 = vmatprep.mubr.msk.bf16.mxu1 %vm3061_vm6, %v3059_v10  ;;  %vm1667_vm6 = vcmp.gt.s32.totalorder %v3623_v60, 5 }
0x1094   :  { %v1520_v37 = vrot.slane %v1506_v2, %v3379_v28  ;;  %v1521_v4 = vcombine.high %v1513_v3, %v1513_v3  ;;  %1525 = vst.msk [vmem:[#allocation2 + $0x4] sm:$0x1] %vm732_vm15, %v1513_v3  ;;  %2650 = vmatprep.subr.bf16.mxu1 %v3059_v10  ;;  %v1668_v0 = vsel %vm1667_vm6, 1, %v3060_v13 }
0x1096   :  { %1526 = vst.msk [vmem:[#allocation2 + $0xc] sm:$0x1] %vm732_vm15, %v1520_v37  ;;  %1527 = vst.msk [vmem:[#allocation2 + $0x14] sm:$0x1] %vm732_vm15, %v1521_v4 }
0x1097   :  { %2651 = vmatpush3.bf16.msra.mxu1 %v3549_v44  ;;  %v3606_v44 = vsel %vm1472_vm10, %v1494_v52, %v3557_v59 }
0x1098   :  { %v1604_v11 = vrot.slane %v3606_v44, 3  ;;  %v1606_v22 = vrot.slane %v3606_v44, 5  ;;  %v1605_v23 = vrot.slane %v3606_v44, 4 }
0x1165   :  { %v1566_v5 = vpop.f32.mrb[8].mxu1 }
0x1166   :  { %v1573_v6 = vrot.slane %v1566_v5, 3  ;;  %v1574_v7 = vrot.slane %v1566_v5, 4  ;;  %v2638_v42 = vpop.f32.mrb[9].mxu1  ;;  %v1575_v14 = vrot.slane %v1566_v5, 5 }
0x1167   :  { %v1569_v15 = vpop.f32.mrb[10].mxu1 }
0x1168   :  { %v1579_v16 = vadd.f32 %v1573_v6, %v3348_v20  ;;  %v1580_v17 = vadd.f32 %v1574_v7, %v3351_v25  ;;  %v2639_v18 = vpop.f32.mrb[11].mxu1  ;;  %v1581_v10 = vadd.f32 %v1575_v14, %v3354_v30 }
0x116a   :  { %2832 = vtanh.f32 %v1579_v16  ;;  %v2492_v59 = vmul.f32 -1.442695, %v1579_v16  ;;  %v2493_v24 = vmul.f32 -1.442695, %v1580_v17  ;;  %v2494_v26 = vmul.f32 -1.442695, %v1581_v10 }
0x116b   :  { %2834 = vtanh.f32 %v1580_v17 }
0x116c   :  { %2836 = vtanh.f32 %v1581_v10 }
0x116d   :  { %2838 = vpow2.f32 %v2492_v59 }
0x116e   :  { %2840 = vpow2.f32 %v2493_v24 }
0x116f   :  { %2842 = vpow2.f32 %v2494_v26 }
0x1174   :  { %v2833_v51 = vpop.eup %2832 }
0x1175   :  { %v2835_v19 = vpop.eup %2834  ;;  %1622 = vrot.lane.b32.xlu1 %v2833_v51, %s3054_s30 }
0x1176   :  { %1624 = vrot.lane.b32.xlu0 %v2835_v19, %s3054_s30  ;;  %v2837_v21 = vpop.eup %2836 }
0x1177   :  { %v2839_v27 = vpop.eup %2838 }
0x1178   :  { %v2841_v29 = vpop.eup %2840  ;;  %v1591_v31 = vadd.f32 1.0, %v2839_v27 }
0x1179   :  { %1626 = vrot.lane.b32.xlu1 %v2837_v21, %s3054_s30  ;;  %v1592_v33 = vadd.f32 1.0, %v2841_v29  ;;  %v2843_v12 = vpop.eup %2842 }
0x117a   :  { %1607 = vrot.lane.b32.xlu0 %v1604_v11, %s3062_s12  ;;  %2844 = vrcp.f32 %v1591_v31  ;;  %v1593_v34 = vadd.f32 1.0, %v2843_v12 }
0x117b   :  { %2846 = vrcp.f32 %v1592_v33 }
0x117c   :  { %2848 = vrcp.f32 %v1593_v34 }
0x117d   :  { %1609 = vrot.lane.b32.xlu1 %v1605_v23, %s3062_s12 }
0x117e   :  { %1611 = vrot.lane.b32.xlu0 %v1606_v22, %s3062_s12 }
0x1184   :  { %v2845_v36 = vpop.eup %2844 }
0x1185   :  { %v2847_v39 = vpop.eup %2846 }
0x1186   :  { %v2849_v9 = vpop.eup %2848 }
0x11e7   :  { %v1623_v38 = vpop.permute.xlu1 %1622 }
0x11e8   :  { %v1625_v8 = vpop.permute.xlu0 %1624  ;;  %v1631_v40 = vmul.f32 %v2845_v36, %v1623_v38 }
0x11e9   :  { %v1632_v41 = vmul.f32 %v2847_v39, %v1625_v8 }
0x11ea   :  { %1637 = vrot.lane.b32.xlu1 %v1631_v40, %s3062_s12 }
0x11eb   :  { %1639 = vrot.lane.b32.xlu0 %v1632_v41, %s3062_s12  ;;  %v1627_v43 = vpop.permute.xlu1 %1626 }
0x11ec   :  { %v1633_v45 = vmul.f32 %v2849_v9, %v1627_v43  ;;  %v1608_v46 = vpop.permute.xlu0 %1607 }
0x11ed   :  { %v1616_v48 = vmul.f32 %v2845_v36, %v1608_v46 }
0x11ee   :  { %1641 = vrot.lane.b32.xlu1 %v1633_v45, %s3062_s12 }
0x11ef   :  { %v1610_v47 = vpop.permute.xlu1 %1609 }
0x11f0   :  { %v1612_v63 = vpop.permute.xlu0 %1611  ;;  %v1617_v49 = vmul.f32 %v2847_v39, %v1610_v47 }
0x11f1   :  { %v1618_v56 = vmul.f32 %v2849_v9, %v1612_v63 }
0x125c   :  { %v1638_v50 = vpop.permute.xlu1 %1637 }
0x125d   :  { %v1640_v53 = vpop.permute.xlu0 %1639  ;;  %v1646_v54 = vadd.f32 %v1638_v50, %v1616_v48 }
0x125e   :  { %v1647_v55 = vadd.f32 %v1640_v53, %v1617_v49 }
0x125f   :  { %2850 = vtanh.f32 %v1646_v54  ;;  %v1688_v1 = vrot.slane %v1646_v54, 5 }
0x1260   :  { %2852 = vtanh.f32 %v1647_v55  ;;  %v1642_v57 = vpop.permute.xlu1 %1641  ;;  %v1689_v35 = vrot.slane %v1647_v55, 4 }
0x1261   :  { %v1648_v32 = vadd.f32 %v1642_v57, %v1618_v56 }
0x1262   :  { %v1690_v37 = vsel %vm685_vm12, %v1689_v35, %v1688_v1 }
0x1263   :  { %2854 = vtanh.f32 %v1648_v32  ;;  %v1691_v3 = vrot.slane %v1648_v32, 3 }
0x1265   :  { %v1692_v4 = vsel %vm688_vm13, %v1691_v3, %v1690_v37 }
0x1269   :  { %v2851_v58 = vpop.eup %2850 }
0x126a   :  { %v2853_v61 = vpop.eup %2852  ;;  %1655 = vrot.lane.b32.xlu0 %v2851_v58, %s3054_s30 }
0x126b   :  { %1657 = vrot.lane.b32.xlu1 %v2853_v61, %s3054_s30 }
0x126d   :  { %v2855_v2 = vpop.eup %2854 }
0x126e   :  { %1659 = vrot.lane.b32.xlu0 %v2855_v2, %s3054_s30 }
0x126f   :  { %1670 = vperm.xlu1 %2691, %v1668_v0  }
0x1273   :  { %1693 = vrot.lane.b32.xlu1 %v1692_v4, %s3063_s5 }
0x12dc   :  { %v1656_v5 = vpop.permute.xlu0 %1655 }
0x12dd   :  { %v1658_v6 = vpop.permute.xlu1 %1657  ;;  %v1664_v7 = vmul.f32 %v2845_v36, %v1656_v5 }
0x12de   :  { %v1665_v42 = vmul.f32 %v2847_v39, %v1658_v6 }
0x12df   :  { %v1676_v15 = vrot.slane %v1664_v7, 5 }
0x12e0   :  { %v1677_v14 = vrot.slane %v1665_v42, 4  ;;  %v1660_v16 = vpop.permute.xlu0 %1659 }
0x12e1   :  { %v1666_v17 = vmul.f32 %v2849_v9, %v1660_v16 }
0x12e2   :  { %v1678_v10 = vsel %vm685_vm12, %v1677_v14, %v1676_v15 }
0x12e3   :  { %v1679_v18 = vrot.slane %v1666_v17, 3 }
0x12e5   :  { %v1680_v52 = vsel %vm688_vm13, %v1679_v18, %v1678_v10 }
0x12e6   :  { %1681 = vrot.lane.b32.xlu0 %v1680_v52, %s3062_s12 }
0x12ee   :  { %v1671_v51 = vpop.permute.xlu1 %1670 }
0x12ef   :  { %vm1672_vm11 = vcmp.eq.s32.totalorder %v1671_v51, 1 }
0x12f2   :  { %v1694_v40 = vpop.permute.xlu1 %1693 }
0x12f3   :  { %v3655_v43 = vsel %vm1672_vm11, %v1694_v40, %v3606_v44 }
0x12f4   :  { %v1804_v45 = vrot.slane %v3655_v43, 2  ;;  %v1806_v47 = vrot.slane %v3655_v43, 4  ;;  %v1805_v63 = vrot.slane %v3655_v43, 3 }
0x1358   :  { %v1682_v19 = vpop.permute.xlu0 %1681 }
0x1359   :  { %v3638_v11 = vsel %vm1672_vm11, %v1682_v19, %v3584_v62  ;;  %v1697_v21 = vsel %vm1672_vm11, %v1682_v19, 0.0 }
0x135a   :  { %v1705_v22 = vrot.slane %v1697_v21, %v3379_v28  ;;  %v1728_v23 = vpack.c.bf16 %v3638_v11, %v3638_v11  ;;  %v1868_v21 = vsel %vm1867_vm14, 1, %v3060_v13 }
0x135c   :  { %v1706_v59 = vcombine.high %v1705_v22, %v1705_v22  ;;  %v1713_v24 = vrot.slane %v1705_v22, %v3379_v28  ;;  %2645 = vmatmul.mubr.msk.bf16.vlgmr.msra.gmra.mrb[24].mxu0 %vm390_vm7, %v1728_v23 }
0x135e   :  { %v1720_v26 = vrot.slane %v1706_v59, %v3379_v28  ;;  %v1721_v27 = vcombine.high %v1713_v24, %v1713_v24  ;;  %1725 = vst.msk [vmem:[#allocation2 + $0x5] sm:$0x1] %vm732_vm15, %v1713_v24 }
0x1360   :  { %1726 = vst.msk [vmem:[#allocation2 + $0xd] sm:$0x1] %vm732_vm15, %v1720_v26  ;;  %1727 = vst.msk [vmem:[#allocation2 + $0x15] sm:$0x1] %vm732_vm15, %v1721_v27 }
0x142f   :  { %v1766_v62 = vpop.f32.mrb[24].mxu0 }
0x1430   :  { %v1773_v29 = vrot.slane %v1766_v62, 2  ;;  %v1774_v31 = vrot.slane %v1766_v62, 3  ;;  %v2646_v33 = vpop.f32.mrb[25].mxu0  ;;  %v1775_v12 = vrot.slane %v1766_v62, 4 }
0x1431   :  { %v1769_v34 = vpop.f32.mrb[26].mxu0 }
0x1432   :  { %v1779_v36 = vadd.f32 %v1773_v29, %v3348_v20  ;;  %v1780_v38 = vadd.f32 %v1774_v31, %v3351_v25  ;;  %v2647_v39 = vpop.f32.mrb[27].mxu0  ;;  %v1781_v8 = vadd.f32 %v1775_v12, %v3354_v30 }
0x1434   :  { %2856 = vtanh.f32 %v1779_v36  ;;  %v2496_v44 = vmul.f32 -1.442695, %v1779_v36  ;;  %v2497_v48 = vmul.f32 -1.442695, %v1780_v38  ;;  %v2498_v49 = vmul.f32 -1.442695, %v1781_v8 }
0x1435   :  { %2858 = vtanh.f32 %v1780_v38 }
0x1436   :  { %2860 = vtanh.f32 %v1781_v8 }
0x1437   :  { %2862 = vpow2.f32 %v2496_v44 }
0x1438   :  { %2864 = vpow2.f32 %v2497_v48 }
0x1439   :  { %2866 = vpow2.f32 %v2498_v49 }
0x143e   :  { %v2857_v41 = vpop.eup %2856 }
0x143f   :  { %v2859_v9 = vpop.eup %2858  ;;  %1822 = vrot.lane.b32.xlu0 %v2857_v41, %s3054_s30 }
0x1440   :  { %1824 = vrot.lane.b32.xlu1 %v2859_v9, %s3054_s30  ;;  %v2861_v46 = vpop.eup %2860 }
0x1441   :  { %v2863_v50 = vpop.eup %2862 }
0x1442   :  { %v2865_v53 = vpop.eup %2864  ;;  %v1791_v54 = vadd.f32 1.0, %v2863_v50 }
0x1443   :  { %1826 = vrot.lane.b32.xlu0 %v2861_v46, %s3054_s30  ;;  %v1792_v55 = vadd.f32 1.0, %v2865_v53  ;;  %v2867_v56 = vpop.eup %2866 }
0x1444   :  { %1807 = vrot.lane.b32.xlu1 %v1804_v45, %s3062_s12  ;;  %2868 = vrcp.f32 %v1791_v54  ;;  %v1793_v57 = vadd.f32 1.0, %v2867_v56 }
0x1445   :  { %2870 = vrcp.f32 %v1792_v55 }
0x1446   :  { %2872 = vrcp.f32 %v1793_v57 }
0x1447   :  { %1809 = vrot.lane.b32.xlu0 %v1805_v63, %s3062_s12 }
0x1448   :  { %1811 = vrot.lane.b32.xlu1 %v1806_v47, %s3062_s12 }
0x144e   :  { %v2869_v32 = vpop.eup %2868 }
0x144f   :  { %v2871_v61 = vpop.eup %2870 }
0x1450   :  { %v2873_v2 = vpop.eup %2872 }
0x14b1   :  { %v1823_v58 = vpop.permute.xlu0 %1822 }
0x14b2   :  { %v1825_v0 = vpop.permute.xlu1 %1824  ;;  %v1831_v35 = vmul.f32 %v2869_v32, %v1823_v58 }
0x14b3   :  { %v1832_v1 = vmul.f32 %v2871_v61, %v1825_v0 }
0x14b4   :  { %1837 = vrot.lane.b32.xlu0 %v1831_v35, %s3062_s12 }
0x14b5   :  { %1839 = vrot.lane.b32.xlu1 %v1832_v1, %s3062_s12  ;;  %v1827_v3 = vpop.permute.xlu0 %1826 }
0x14b6   :  { %v1833_v37 = vmul.f32 %v2873_v2, %v1827_v3  ;;  %v1808_v4 = vpop.permute.xlu1 %1807 }
0x14b7   :  { %v1816_v7 = vmul.f32 %v2869_v32, %v1808_v4 }
0x14b8   :  { %1841 = vrot.lane.b32.xlu0 %v1833_v37, %s3062_s12 }
0x14b9   :  { %v1810_v5 = vpop.permute.xlu0 %1809 }
0x14ba   :  { %v1812_v6 = vpop.permute.xlu1 %1811  ;;  %v1817_v42 = vmul.f32 %v2871_v61, %v1810_v5 }
0x14bb   :  { %v1818_v18 = vmul.f32 %v2873_v2, %v1812_v6 }
0x1526   :  { %v1838_v14 = vpop.permute.xlu0 %1837 }
0x1527   :  { %v1840_v15 = vpop.permute.xlu1 %1839  ;;  %v1846_v16 = vadd.f32 %v1838_v14, %v1816_v7 }
0x1528   :  { %v1847_v17 = vadd.f32 %v1840_v15, %v1817_v42 }
0x1529   :  { %2874 = vtanh.f32 %v1846_v16  ;;  %v1888_v23 = vrot.slane %v1846_v16, 6 }
0x152a   :  { %2876 = vtanh.f32 %v1847_v17  ;;  %v1842_v10 = vpop.permute.xlu0 %1841  ;;  %v1889_v22 = vrot.slane %v1847_v17, 5 }
0x152b   :  { %v1848_v52 = vadd.f32 %v1842_v10, %v1818_v18 }
0x152c   :  { %v1890_v26 = vsel %vm685_vm12, %v1889_v22, %v1888_v23 }
0x152d   :  { %2878 = vtanh.f32 %v1848_v52  ;;  %v1891_v24 = vrot.slane %v1848_v52, 4 }
0x152f   :  { %v1892_v27 = vsel %vm688_vm13, %v1891_v24, %v1890_v26 }
0x1533   :  { %v2875_v51 = vpop.eup %2874 }
0x1534   :  { %v2877_v19 = vpop.eup %2876  ;;  %1855 = vrot.lane.b32.xlu1 %v2875_v51, %s3054_s30 }
0x1535   :  { %1857 = vrot.lane.b32.xlu0 %v2877_v19, %s3054_s30 }
0x1537   :  { %v2879_v59 = vpop.eup %2878 }
0x1538   :  { %1859 = vrot.lane.b32.xlu1 %v2879_v59, %s3054_s30 }
0x1539   :  { %1870 = vperm.xlu0 %2692, %v1868_v21  }
0x153d   :  { %1893 = vrot.lane.b32.xlu0 %v1892_v27, %s3063_s5 }
0x15a6   :  { %v1856_v62 = vpop.permute.xlu1 %1855 }
0x15a7   :  { %v1858_v29 = vpop.permute.xlu0 %1857  ;;  %v1864_v31 = vmul.f32 %v2869_v32, %v1856_v62 }
0x15a8   :  { %v1865_v33 = vmul.f32 %v2871_v61, %v1858_v29 }
0x15a9   :  { %v1876_v34 = vrot.slane %v1864_v31, 6 }
0x15aa   :  { %v1877_v12 = vrot.slane %v1865_v33, 5  ;;  %v1860_v36 = vpop.permute.xlu1 %1859 }
0x15ab   :  { %v1866_v38 = vmul.f32 %v2873_v2, %v1860_v36 }
0x15ac   :  { %v1878_v8 = vsel %vm685_vm12, %v1877_v12, %v1876_v34 }
0x15ad   :  { %v1879_v39 = vrot.slane %v1866_v38, 4 }
0x15af   :  { %v1880_v40 = vsel %vm688_vm13, %v1879_v39, %v1878_v8 }
0x15b0   :  { %1881 = vrot.lane.b32.xlu1 %v1880_v40, %s3062_s12  ;;  %v2068_v40 = vsel %vm2067_vm1, 1, %v3060_v13 }
0x15b8   :  { %v1871_v41 = vpop.permute.xlu0 %1870 }
0x15b9   :  { %vm1872_vm0 = vcmp.eq.s32.totalorder %v1871_v41, 1 }
0x15bc   :  { %v1894_v35 = vpop.permute.xlu0 %1893 }
0x15bd   :  { %v3699_v3 = vsel %vm1872_vm0, %v1894_v35, %v3655_v43 }
0x15be   :  { %v2006_v37 = vrot.slane %v3699_v3, 3 }
0x1622   :  { %v1882_v9 = vpop.permute.xlu1 %1881 }
0x1623   :  { %v3682_v45 = vsel %vm1872_vm0, %v1882_v9, %v3638_v11  ;;  %v1897_v46 = vsel %vm1872_vm0, %v1882_v9, 0.0 }
0x1624   :  { %v1905_v47 = vrot.slane %v1897_v46, %v3379_v28  ;;  %v1928_v63 = vpack.c.bf16 %v3682_v45, %v3682_v45 }
0x1626   :  { %v1906_v44 = vcombine.high %v1905_v47, %v1905_v47  ;;  %v1913_v48 = vrot.slane %v1905_v47, %v3379_v28  ;;  %2653 = vmatmul.mubr.msk.bf16.vlgmr.msra.gmra.mrb[12].mxu1 %vm390_vm7, %v1928_v63 }
0x1628   :  { %v1920_v49 = vrot.slane %v1906_v44, %v3379_v28  ;;  %v1921_v50 = vcombine.high %v1913_v48, %v1913_v48  ;;  %1925 = vst.msk [vmem:[#allocation2 + $0x6] sm:$0x1] %vm732_vm15, %v1913_v48 }
0x162a   :  { %1926 = vst.msk [vmem:[#allocation2 + $0xe] sm:$0x1] %vm732_vm15, %v1920_v49  ;;  %1927 = vst.msk [vmem:[#allocation2 + $0x16] sm:$0x1] %vm732_vm15, %v1921_v50 }
0x16f9   :  { %v1966_v11 = vpop.f32.mrb[12].mxu1 }
0x16fa   :  { %v1973_v53 = vrot.slane %v1966_v11, 1  ;;  %v1974_v54 = vrot.slane %v1966_v11, 2  ;;  %v2654_v55 = vpop.f32.mrb[13].mxu1  ;;  %v1975_v56 = vrot.slane %v1966_v11, 3 }
0x16fb   :  { %v1969_v57 = vpop.f32.mrb[14].mxu1  ;;  %v2703_v55 = vld [vmem:[%s3808_s15 + $0x8] sm:$0xff]  }
0x16fc   :  { %v1979_v32 = vadd.f32 %v1973_v53, %v3348_v20  ;;  %v1980_v58 = vadd.f32 %v1974_v54, %v3351_v25  ;;  %v2655_v61 = vpop.f32.mrb[15].mxu1  ;;  %v1981_v0 = vadd.f32 %v1975_v56, %v3354_v30  ;;  %v2004_v20 = vrot.slane %v3699_v3, 1  ;;  %v2702_v54 = vld [vmem:[%s3808_s15] sm:$0xff]  }
0x16fd   :  { %v2005_v30 = vrot.slane %v3699_v3, 2  ;;  %2656 = vmatprep.subr.bf16.mxu0 %v2702_v54 }
0x16fe   :  { %2880 = vtanh.f32 %v1979_v32  ;;  %v2500_v43 = vmul.f32 -1.442695, %v1979_v32  ;;  %v2501_v4 = vmul.f32 -1.442695, %v1980_v58  ;;  %v2502_v5 = vmul.f32 -1.442695, %v1981_v0  ;;  %2657 = vmatpush3.bf16.msra.mxu0 %v2702_v54 }
0x16ff   :  { %2882 = vtanh.f32 %v1980_v58  ;;  %2658 = vmatprep.subr.bf16.mxu0 %v2703_v55 }
0x1700   :  { %2884 = vtanh.f32 %v1981_v0 }
0x1701   :  { %2886 = vpow2.f32 %v2500_v43 }
0x1702   :  { %2888 = vpow2.f32 %v2501_v4  ;;  %2659 = vmatpush3.bf16.msra.mxu0 %v2703_v55 }
0x1703   :  { %2890 = vpow2.f32 %v2502_v5 }
0x1708   :  { %v2881_v1 = vpop.eup %2880 }
0x1709   :  { %v2883_v2 = vpop.eup %2882  ;;  %2022 = vrot.lane.b32.xlu1 %v2881_v1, %s3054_s30 }
0x170a   :  { %2024 = vrot.lane.b32.xlu0 %v2883_v2, %s3054_s30  ;;  %v2885_v25 = vpop.eup %2884 }
0x170b   :  { %v2887_v6 = vpop.eup %2886 }
0x170c   :  { %v2889_v7 = vpop.eup %2888  ;;  %v1991_v42 = vadd.f32 1.0, %v2887_v6 }
0x170d   :  { %2026 = vrot.lane.b32.xlu1 %v2885_v25, %s3054_s30  ;;  %v1992_v14 = vadd.f32 1.0, %v2889_v7  ;;  %v2891_v15 = vpop.eup %2890 }
0x170e   :  { %2007 = vrot.lane.b32.xlu0 %v2004_v20, %s3062_s12  ;;  %2892 = vrcp.f32 %v1991_v42  ;;  %v1993_v16 = vadd.f32 1.0, %v2891_v15 }
0x170f   :  { %2894 = vrcp.f32 %v1992_v14 }
0x1710   :  { %2896 = vrcp.f32 %v1993_v16 }
0x1711   :  { %2009 = vrot.lane.b32.xlu1 %v2005_v30, %s3062_s12 }
0x1712   :  { %2011 = vrot.lane.b32.xlu0 %v2006_v37, %s3062_s12 }
0x1718   :  { %v2893_v17 = vpop.eup %2892 }
0x1719   :  { %v2895_v10 = vpop.eup %2894 }
0x171a   :  { %v2897_v21 = vpop.eup %2896 }
0x177b   :  { %v2023_v18 = vpop.permute.xlu1 %2022 }
0x177c   :  { %v2025_v52 = vpop.permute.xlu0 %2024  ;;  %v2031_v51 = vmul.f32 %v2893_v17, %v2023_v18 }
0x177d   :  { %v2032_v19 = vmul.f32 %v2895_v10, %v2025_v52 }
0x177e   :  { %2037 = vrot.lane.b32.xlu1 %v2031_v51, %s3062_s12 }
0x177f   :  { %2039 = vrot.lane.b32.xlu0 %v2032_v19, %s3062_s12  ;;  %v2027_v22 = vpop.permute.xlu1 %2026 }
0x1780   :  { %v2033_v23 = vmul.f32 %v2897_v21, %v2027_v22  ;;  %v2008_v59 = vpop.permute.xlu0 %2007 }
0x1781   :  { %v2016_v27 = vmul.f32 %v2893_v17, %v2008_v59 }
0x1782   :  { %2041 = vrot.lane.b32.xlu1 %v2033_v23, %s3062_s12 }
0x1783   :  { %v2010_v24 = vpop.permute.xlu1 %2009 }
0x1784   :  { %v2012_v26 = vpop.permute.xlu0 %2011  ;;  %v2017_v62 = vmul.f32 %v2895_v10, %v2010_v24 }
0x1785   :  { %v2018_v34 = vmul.f32 %v2897_v21, %v2012_v26 }
0x17f0   :  { %v2038_v29 = vpop.permute.xlu1 %2037 }
0x17f1   :  { %v2040_v31 = vpop.permute.xlu0 %2039  ;;  %v2046_v33 = vadd.f32 %v2038_v29, %v2016_v27 }
0x17f2   :  { %v2047_v12 = vadd.f32 %v2040_v31, %v2017_v62 }
0x17f3   :  { %2898 = vtanh.f32 %v2046_v33  ;;  %v2088_v9 = vrot.slane %v2046_v33, 7 }
0x17f4   :  { %2900 = vtanh.f32 %v2047_v12  ;;  %v2042_v36 = vpop.permute.xlu1 %2041  ;;  %v2089_v41 = vrot.slane %v2047_v12, 6 }
0x17f5   :  { %v2048_v38 = vadd.f32 %v2042_v36, %v2018_v34 }
0x17f6   :  { %v2090_v63 = vsel %vm685_vm12, %v2089_v41, %v2088_v9 }
0x17f7   :  { %2902 = vtanh.f32 %v2048_v38  ;;  %v2091_v47 = vrot.slane %v2048_v38, 5 }
0x17f9   :  { %v2092_v44 = vsel %vm688_vm13, %v2091_v47, %v2090_v63  ;;  %v2503_v47 = vld [vmem:[#allocation10] ss:$0 sm:$0xff] }
0x17fd   :  { %v2899_v39 = vpop.eup %2898 }
0x17fe   :  { %v2901_v8 = vpop.eup %2900  ;;  %2055 = vrot.lane.b32.xlu0 %v2899_v39, %s3054_s30 }
0x17ff   :  { %2057 = vrot.lane.b32.xlu1 %v2901_v8, %s3054_s30 }
0x1801   :  { %v2903_v46 = vpop.eup %2902 }
0x1802   :  { %2059 = vrot.lane.b32.xlu0 %v2903_v46, %s3054_s30 }
0x1803   :  { %2070 = vperm.xlu1 %2691, %v2068_v40  }
0x1807   :  { %2093 = vrot.lane.b32.xlu1 %v2092_v44, %s3063_s5 }
0x1870   :  { %v2056_v60 = vpop.permute.xlu0 %2055 }
0x1871   :  { %v2058_v48 = vpop.permute.xlu1 %2057  ;;  %v2064_v49 = vmul.f32 %v2893_v17, %v2056_v60 }
0x1872   :  { %v2065_v50 = vmul.f32 %v2895_v10, %v2058_v48  ;;  %v2504_v48 = vld [vmem:[%s3807_s14] ss:$0 sm:$0xff] }
0x1873   :  { %v2076_v53 = vrot.slane %v2064_v49, 7 }
0x1874   :  { %v2077_v11 = vrot.slane %v2065_v50, 6  ;;  %v2060_v13 = vpop.permute.xlu0 %2059 }
0x1875   :  { %v2066_v56 = vmul.f32 %v2897_v21, %v2060_v13 }
0x1876   :  { %v2078_v32 = vsel %vm685_vm12, %v2077_v11, %v2076_v53 }
0x1877   :  { %v2079_v57 = vrot.slane %v2066_v56, 5 }
0x1879   :  { %v2080_v58 = vsel %vm688_vm13, %v2079_v57, %v2078_v32  ;;  %v2704_v57 = vld [vmem:[%s3812_s19] sm:$0xff]   ;;  %v2705_v32 = vld [vmem:[%s3812_s19 + $0x8] sm:$0xff]  }
0x187a   :  { %2081 = vrot.lane.b32.xlu0 %v2080_v58, %s3062_s12  ;;  %2664 = vmatprep.subr.bf16.mxu1 %v2704_v57  ;;  %v2706_v58 = vld [vmem:[%s3812_s19 + $0x10] sm:$0xff]  }
0x187b   :  { %2665 = vmatpush3.bf16.msra.mxu1 %v2704_v57 }
0x187c   :  { %2666 = vmatprep.subr.bf16.mxu1 %v2705_v32 }
0x187f   :  { %2667 = vmatpush3.bf16.msra.mxu1 %v2705_v32  ;;  %v2512_v32 = vld [vmem:[%s3813_s20] ss:$0 sm:$0xff] }
0x1880   :  { %2668 = vmatprep.subr.bf16.mxu1 %v2706_v58 }
0x1882   :  { %v2071_v61 = vpop.permute.xlu1 %2070 }
0x1883   :  { %vm2072_vm4 = vcmp.eq.s32.totalorder %v2071_v61, 1  ;;  %v2707_v61 = vld [vmem:[%s3812_s19 + $0x18] sm:$0xff]   ;;  %2669 = vmatpush3.bf16.msra.mxu1 %v2706_v58 }
0x1884   :  { %2670 = vmatprep.subr.bf16.mxu1 %v2707_v61 }
0x1886   :  { %v2094_v0 = vpop.permute.xlu1 %2093 }
0x1887   :  { %v2096_v35 = vsel %vm2072_vm4, %v2094_v0, %v3699_v3  ;;  %2671 = vmatpush3.bf16.msra.mxu1 %v2707_v61  ;;  %v2505_v0 = vld [vmem:[%s3809_s16] ss:$0 sm:$0xff] }
0x1888   :  { %2130 = vst.msk [vmem:[%s3816_s23] sm:$0x7] %vm2128_vm3, %v2096_v35 }
0x18ec   :  { %v2082_v1 = vpop.permute.xlu0 %2081 }
0x18ed   :  { %v2084_v2 = vsel %vm2072_vm4, %v2082_v1, %v3682_v45  ;;  %v2097_v20 = vsel %vm2072_vm4, %v2082_v1, 0.0 }
0x18ee   :  { %v2105_v25 = vrot.slane %v2097_v20, %v3379_v28  ;;  %2129 = vst.msk [vmem:[%s3815_s22] sm:$0x7] %vm2128_vm3, %v2084_v2 }
0x18f0   :  { %v2106_v30 = vcombine.high %v2105_v25, %v2105_v25  ;;  %v2113_v37 = vrot.slane %v2105_v25, %v3379_v28 }
0x18f2   :  { %v2120_v43 = vrot.slane %v2106_v30, %v3379_v28  ;;  %v2121_v3 = vcombine.high %v2113_v37, %v2113_v37  ;;  %2125 = vst.msk [vmem:[#allocation2 + $0x7] sm:$0x1] %vm732_vm15, %v2113_v37 }
0x18f4   :  { %2126 = vst.msk [vmem:[#allocation2 + $0xf] sm:$0x1] %vm732_vm15, %v2120_v43  ;;  %2127 = vst.msk [vmem:[#allocation2 + $0x17] sm:$0x1] %vm732_vm15, %v2121_v3 }
0x18f9   :  { %v2131_v45 = vld [vmem:[#allocation2] sm:$0xff] }
0x18fa   :  { %v2148_v4 = vmul.f32 %v2131_v45, %v2131_v45  ;;  %v2136_v7 = vsel %vm390_vm7, %v2131_v45, 0.0 }
0x18fb   :  { %v2132_v5 = vld [vmem:[#allocation2 + $0x8] sm:$0xff]  ;;  %v2133_v6 = vld [vmem:[#allocation2 + $0x10] sm:$0xff] }
0x18fc   :  { %v2137_v42 = vsel %vm390_vm7, %v2132_v5, 0.0  ;;  %v2149_v14 = vmul.f32 %v2132_v5, %v2132_v5  ;;  %v2150_v15 = vmul.f32 %v2133_v6, %v2133_v6  ;;  %v2139_v28 = vsel %vm390_vm7, %v2133_v6, 0.0 }
0x18fd   :  { %v2138_v16 = vadd.f32 %v2137_v42, %v2136_v7  ;;  %v2151_v17 = vsel %vm390_vm7, %v2148_v4, 0.0 }
0x18fe   :  { %v2152_v18 = vsel %vm390_vm7, %v2149_v14, 0.0  ;;  %v2154_v51 = vsel %vm390_vm7, %v2150_v15, 0.0 }
0x18ff   :  { %v2140_v10 = vadd.f32 %v2139_v28, %v2138_v16  ;;  %v2153_v52 = vadd.f32 %v2152_v18, %v2151_v17 }
0x1901   :  { %v2141_v19 = vrot.slane %v2140_v10, 4  ;;  %v2155_v21 = vadd.f32 %v2154_v51, %v2153_v52 }
0x1903   :  { %v2142_v22 = vadd.f32 %v2141_v19, %v2140_v10  ;;  %v2156_v23 = vrot.slane %v2155_v21, 4 }
0x1905   :  { %v2143_v59 = vrot.slane %v2142_v22, 2  ;;  %v2157_v24 = vadd.f32 %v2156_v23, %v2155_v21 }
0x1907   :  { %v2144_v26 = vadd.f32 %v2143_v59, %v2142_v22  ;;  %v2158_v27 = vrot.slane %v2157_v24, 2 }
0x1909   :  { %v2145_v62 = vrot.slane %v2144_v26, 1  ;;  %v2159_v29 = vadd.f32 %v2158_v27, %v2157_v24 }
0x190b   :  { %v2146_v31 = vadd.f32 %v2145_v62, %v2144_v26  ;;  %v2160_v33 = vrot.slane %v2159_v29, 1 }
0x190d   :  { %v2147_v12 = vmul.f32 0.041666668, %v2146_v31  ;;  %v2161_v34 = vadd.f32 %v2160_v33, %v2159_v29 }
0x190f   :  { %v2162_v36 = vmul.f32 0.041666668, %v2161_v34  ;;  %v2163_v38 = vmul.f32 %v2147_v12, %v2147_v12  ;;  %v2165_v40 = vsub.f32 %v2131_v45, %v2147_v12  ;;  %v2166_v41 = vsub.f32 %v2132_v5, %v2147_v12 }
0x1910   :  { %v2167_v9 = vsub.f32 %v2133_v6, %v2147_v12 }
0x1911   :  { %v2164_v39 = vsub.f32 %v2162_v36, %v2163_v38 }
0x1913   :  { %v2168_v8 = vadd.f32 1e-05, %v2164_v39 }
0x1915   :  { %2904 = vrsqrt.f32 %v2168_v8  ;;  %v2510_v8 = vld [vmem:[#allocation11] ss:$0 sm:$0xff] }
0x191f   :  { %v2905_v46 = vpop.eup %2904 }
0x1920   :  { %v2170_v63 = vmul.f32 %v2905_v46, %v2165_v40  ;;  %v2171_v44 = vmul.f32 %v2905_v46, %v2166_v41  ;;  %v2172_v60 = vmul.f32 %v2905_v46, %v2167_v9  ;;  %v2511_v46 = vld [vmem:[%s3811_s18] ss:$0 sm:$0xff] }
0x1922   :  { %v2179_v49 = vmul.f32 %v2503_v47, %v2170_v63  ;;  %v2180_v50 = vmul.f32 %v2503_v47, %v2171_v44  ;;  %v2181_v11 = vmul.f32 %v2503_v47, %v2172_v60 }
0x1924   :  { %v2188_v53 = vadd.f32 %v2504_v48, %v2179_v49  ;;  %v2189_v13 = vadd.f32 %v2504_v48, %v2180_v50  ;;  %v2190_v54 = vadd.f32 %v2504_v48, %v2181_v11 }
0x1926   :  { %v2195_v55 = vpack.c.bf16 %v2189_v13, %v2188_v53  ;;  %v2196_v56 = vpack.c.bf16 %v2190_v54, %v2190_v54 }
0x1928   :  { %2660 = vmatprep.mubr.msk.bf16.mxu0 %vm390_vm7, %v2195_v55 }
0x1929   :  { %2661 = vmatmul.mubr.msk.bf16.vlgmr.msra.gmra.mrb[28].mxu0 %vm390_vm7, %v2196_v56 }
0x19fc   :  { %v2662_v35 = vpop.f32.mrb[28].mxu0 }
0x19fd   :  { %v2256_v1 = vpop.f32.mrb[29].mxu0  ;;  %v2265_v2 = vadd.f32 %v2662_v35, %v2505_v0 }
0x19fe   :  { %v2257_v20 = vadd.f32 %v2505_v0, %v2256_v1  ;;  %v2663_v25 = vpop.f32.mrb[30].mxu0 }
0x19ff   :  { %v2259_v30 = vpop.f32.mrb[31].mxu0  ;;  %v2286_v3 = vmul.f32 %v2265_v2, %v2265_v2  ;;  %v2275_v7 = vsel %vm228_vm2, %v2265_v2, 0.0 }
0x1a00   :  { %v2284_v37 = vmul.f32 %v2257_v20, %v2257_v20  ;;  %v2260_v43 = vadd.f32 %v2505_v0, %v2259_v30  ;;  %v2272_v45 = vsel %vm228_vm2, %v2257_v20, 0.0 }
0x1a01   :  { %v2290_v28 = vsel %vm228_vm2, %v2286_v3, 0.0 }
0x1a02   :  { %v2273_v4 = vsel %vm228_vm2, %v2260_v43, 0.0  ;;  %v2285_v5 = vmul.f32 %v2260_v43, %v2260_v43  ;;  %v2287_v42 = vsel %vm228_vm2, %v2284_v37, 0.0 }
0x1a03   :  { %v2274_v6 = vadd.f32 %v2273_v4, %v2272_v45 }
0x1a04   :  { %v2288_v14 = vsel %vm228_vm2, %v2285_v5, 0.0 }
0x1a05   :  { %v2276_v15 = vadd.f32 %v2275_v7, %v2274_v6  ;;  %v2289_v16 = vadd.f32 %v2288_v14, %v2287_v42 }
0x1a07   :  { %v2277_v17 = vrot.slane %v2276_v15, 4  ;;  %v2291_v18 = vadd.f32 %v2290_v28, %v2289_v16 }
0x1a09   :  { %v2278_v10 = vadd.f32 %v2277_v17, %v2276_v15  ;;  %v2292_v52 = vrot.slane %v2291_v18, 4 }
0x1a0b   :  { %v2279_v51 = vrot.slane %v2278_v10, 2  ;;  %v2293_v19 = vadd.f32 %v2292_v52, %v2291_v18 }
0x1a0d   :  { %v2280_v21 = vadd.f32 %v2279_v51, %v2278_v10  ;;  %v2294_v22 = vrot.slane %v2293_v19, 2 }
0x1a0f   :  { %v2281_v23 = vrot.slane %v2280_v21, 1  ;;  %v2295_v59 = vadd.f32 %v2294_v22, %v2293_v19 }
0x1a11   :  { %v2282_v24 = vadd.f32 %v2281_v23, %v2280_v21  ;;  %v2296_v26 = vrot.slane %v2295_v59, 1 }
0x1a13   :  { %v2283_v27 = vmul.f32 0.041666668, %v2282_v24  ;;  %v2297_v62 = vadd.f32 %v2296_v26, %v2295_v59 }
0x1a15   :  { %v2298_v29 = vmul.f32 0.041666668, %v2297_v62  ;;  %v2299_v31 = vmul.f32 %v2283_v27, %v2283_v27  ;;  %v2301_v33 = vsub.f32 %v2257_v20, %v2283_v27  ;;  %v2302_v12 = vsub.f32 %v2260_v43, %v2283_v27 }
0x1a16   :  { %v2303_v34 = vsub.f32 %v2265_v2, %v2283_v27 }
0x1a17   :  { %v2300_v36 = vsub.f32 %v2298_v29, %v2299_v31 }
0x1a19   :  { %v2304_v38 = vadd.f32 1e-05, %v2300_v36 }
0x1a1b   :  { %2906 = vrsqrt.f32 %v2304_v38 }
0x1a25   :  { %v2907_v39 = vpop.eup %2906 }
0x1a26   :  { %v2306_v40 = vmul.f32 %v2907_v39, %v2301_v33  ;;  %v2307_v41 = vmul.f32 %v2907_v39, %v2302_v12  ;;  %v2308_v9 = vmul.f32 %v2907_v39, %v2303_v34 }
0x1a28   :  { %v2315_v47 = vmul.f32 %v2510_v8, %v2306_v40  ;;  %v2316_v63 = vmul.f32 %v2510_v8, %v2307_v41  ;;  %v2317_v44 = vmul.f32 %v2510_v8, %v2308_v9 }
0x1a2a   :  { %v2325_v60 = vadd.f32 %v2511_v46, %v2316_v63  ;;  %v2326_v48 = vadd.f32 %v2511_v46, %v2317_v44  ;;  %v2324_v49 = vadd.f32 %v2511_v46, %v2315_v47 }
0x1a2c   :  { %vm2327_vm7 = vcmp.gt.f32.partialorder %v2324_v49, 0.0  ;;  %vm2328_vm12 = vcmp.gt.f32.partialorder %v2325_v60, 0.0  ;;  %v2330_v50 = vmul.f32 0.01, %v2324_v49  ;;  %v2331_v11 = vmul.f32 0.01, %v2325_v60 }
0x1a2d   :  { %vm2329_vm13 = vcmp.gt.f32.partialorder %v2326_v48, 0.0  ;;  %v2332_v53 = vmul.f32 0.01, %v2326_v48 }
0x1a2e   :  { %v2333_v13 = vsel %vm2327_vm7, %v2324_v49, %v2330_v50  ;;  %v2334_v54 = vsel %vm2328_vm12, %v2325_v60, %v2331_v11 }
0x1a2f   :  { %v2344_v55 = vpack.c.bf16 %v2334_v54, %v2333_v13  ;;  %v2335_v56 = vsel %vm2329_vm13, %v2326_v48, %v2332_v53 }
0x1a30   :  { %v2345_v57 = vpack.c.bf16 %v2335_v56, %v2335_v56 }
0x1a31   :  { %2672 = vmatprep.mubr.msk.bf16.mxu1 %vm228_vm2, %v2344_v55 }
0x1a32   :  { %2673 = vmatmul.mubr.msk.bf16.vlgmr.msra.gmra.mrb[16].mxu1 %vm228_vm2, %v2345_v57 }
0x1b05   :  { %v2674_v58 = vpop.f32.mrb[16].mxu1 }
0x1b06   :  { %v2426_v61 = vadd.f32 %v2674_v58, %v2512_v32  ;;  %v2417_v0 = vpop.f32.mrb[17].mxu1 }
0x1b07   :  { %v2418_v35 = vadd.f32 %v2512_v32, %v2417_v0  ;;  %v2675_v1 = vpop.f32.mrb[18].mxu1 }
0x1b08   :  { %2433 = vst [vmem:[%s3814_s21 + $0x10] sm:$0xff] %v2426_v61  ;;  %v2420_v2 = vpop.f32.mrb[19].mxu1 }
0x1b09   :  { %2431 = vst [vmem:[%s3814_s21] sm:$0xff] %v2418_v35  ;;  %v2421_v20 = vadd.f32 %v2512_v32, %v2420_v2 }
0x1b0b   :  { %2432 = vst [vmem:[%s3814_s21 + $0x8] sm:$0xff] %v2421_v20 }
0x1b0c   :  { %2446 = vsyncpa [#allocation4], 1 }
0x1b0d   :  { %2447 = vsyncpa [#allocation6], 1 }
0x1b0e   :  { %2448 = vsyncpa [#allocation9], 1 }
0x1b0f   :  { %2449 = vsyncpa [#allocation12], 1 }

</bundles_post_ra>
